<compile_context>
chip_gen: v5e
topology: v5e:2x2
jax: 0.10.0
libtpu: 0.0.40
codegen_flags: <defaults>
</compile_context>

<pallas_src>
import jax
import jax.numpy as jnp
import numpy as np
from jax import lax
from jax.experimental import pallas as pl
from jax.experimental.pallas import tpu as pltpu

LANES = 128  # TPU lane width; every channel dim is zero-padded to this.


# ---------------------------------------------------------------------------
# Geometry helpers (all static Python ints)
# ---------------------------------------------------------------------------
def _layer_dims(h, w):
    """Geometry of one conv3x3(pad=1)+relu+maxpool2x2 block operating on a
    zero-padded, row-major flattened canvas of shape ((h+2)*(w+2), 128)."""
    wp = w + 2
    m = h * wp - 2        # rows of the contiguous conv-output strip
    mz = m - wp - 1       # rows of the 2x2-max candidate strip
    return wp, m, mz


def _pool_sel(h, w, pad_next):
    """0/1 matrix gathering the (h//2)x(w//2) pooled pixels out of the 2x2-max
    candidate strip, laid out as the next layer's zero-padded canvas
    (or, for the last conv, as a dense row-major (h//2 * w//2) block)."""
    wp, _, mz = _layer_dims(h, w)
    ph, pw = h // 2, w // 2
    rows = (ph + 2) * (pw + 2) if pad_next else ph * pw
    sel = np.zeros((rows, mz), np.float32)
    for i in range(ph):
        for j in range(pw):
            src = 2 * i * wp + 2 * j
            dst = (i + 1) * (pw + 2) + (j + 1) if pad_next else i * pw + j
            sel[dst, src] = 1.0
    return sel


# ---------------------------------------------------------------------------
# Fused Pallas kernel (one program per image)
# ---------------------------------------------------------------------------
def _build_kernel(H, W):
    wp1, m1, mz1 = _layer_dims(H, W)
    wp2, m2, mz2 = _layer_dims(H // 2, W // 2)
    wp3, m3, mz3 = _layer_dims(H // 4, W // 4)
    s3 = (H // 8) * (W // 8)

    def conv_relu_pool(tap, wp, m, mz, w_ref, b_ref, y_ref, sel_ref, dst_ref):
        # conv3x3 -> +bias -> relu -> maxpool2x2 -> (gather + zero-pad next canvas)
        # 9 shifted canvas slices, lane-concatenated (128-aligned), one MXU matmul.
        a = jnp.concatenate([tap(k).astype(jnp.bfloat16) for k in range(9)], axis=-1)
        y = jnp.dot(a, w_ref[...], preferred_element_type=jnp.float32)     # (m, 128)
        y_ref[...] = jnp.maximum(y + b_ref[...], 0.0)
        zc = jnp.maximum(
            jnp.maximum(y_ref[0:mz, :], y_ref[1:1 + mz, :]),
            jnp.maximum(y_ref[wp:wp + mz, :], y_ref[wp + 1:wp + 1 + mz, :]))
        dst_ref[...] = jnp.dot(sel_ref[...], zc.astype(jnp.bfloat16),
                               preferred_element_type=jnp.float32)

    def kernel(xc_ref,
               wc1_ref, bc1_ref, sel1_ref,
               wc2_ref, bc2_ref, sel2_ref,
               wc3_ref, bc3_ref, sel3_ref,
               w1_ref, b1_ref, w2_ref, b2_ref, w3_ref, b3_ref,
               out_ref,
               y1_ref, c2_ref, y2_ref, c3_ref, y3_ref, z3_ref):
        conv_relu_pool(
            lambda k: xc_ref[0, (k // 3) * wp1 + (k % 3):(k // 3) * wp1 + (k % 3) + m1, :],
            wp1, m1, mz1, wc1_ref, bc1_ref, y1_ref, sel1_ref, c2_ref)
        conv_relu_pool(
            lambda k: c2_ref[(k // 3) * wp2 + (k % 3):(k // 3) * wp2 + (k % 3) + m2, :],
            wp2, m2, mz2, wc2_ref, bc2_ref, y2_ref, sel2_ref, c3_ref)
        conv_relu_pool(
            lambda k: c3_ref[(k // 3) * wp3 + (k % 3):(k // 3) * wp3 + (k % 3) + m3, :],
            wp3, m3, mz3, wc3_ref, bc3_ref, y3_ref, sel3_ref, z3_ref)

        # Flatten (fc1 weight rows were pre-permuted to torch's NCHW flatten order).
        flat = jnp.concatenate([z3_ref[s:s + 1, :] for s in range(s3)], axis=-1)
        h = jnp.dot(flat.astype(jnp.bfloat16), w1_ref[...],
                    preferred_element_type=jnp.float32) + b1_ref[...]
        h = jnp.maximum(h, 0.0)
        h = jnp.dot(h.astype(jnp.bfloat16), w2_ref[...],
                    preferred_element_type=jnp.float32) + b2_ref[...]
        h = jnp.maximum(h, 0.0)
        out_ref[0] = jnp.dot(h.astype(jnp.bfloat16), w3_ref[...],
                             preferred_element_type=jnp.float32) + b3_ref[...]

    return kernel, (wp1, m1, mz1), (wp2, m2, mz2), (wp3, m3, mz3), s3


# ---------------------------------------------------------------------------
# Weight packing (torch layouts -> lane-padded kernel layouts)
# ---------------------------------------------------------------------------
def pack_params(params, s3):
    LP = LANES

    def conv_pack(w, b):                                  # w: (co, ci, 3, 3)
        co, ci = w.shape[0], w.shape[1]
        wk = jnp.transpose(w, (2, 3, 1, 0))               # (3, 3, ci, co)  HWIO
        wk = jnp.pad(wk, ((0, 0), (0, 0), (0, LP - ci), (0, LP - co)))
        wk = wk.reshape(9 * LP, LP).astype(jnp.bfloat16)  # row = (3*dh+dw)*128 + c
        bk = jnp.pad(b, (0, LP - co)).astype(jnp.float32).reshape(1, LP)
        return wk, bk

    wc1, bc1 = conv_pack(*params["conv1"])
    wc2, bc2 = conv_pack(*params["conv2"])
    wc3, bc3 = conv_pack(*params["conv3"])

    w1, b1 = params["fc1"]                                # (256, 64*s3), (256,)
    c3out = params["conv3"][0].shape[0]
    d1 = w1.shape[0]
    assert w1.shape[1] == c3out * s3
    w1k = w1.T.reshape(c3out, s3, d1)                     # torch flatten: c*s3 + s
    w1k = jnp.transpose(w1k, (1, 0, 2))                   # (s, c, out)
    w1k = jnp.pad(w1k, ((0, 0), (0, LANES - c3out), (0, 0)))
    w1k = w1k.reshape(s3 * LANES, d1).astype(jnp.bfloat16)
    b1k = b1.astype(jnp.float32).reshape(1, d1)

    w2, b2 = params["fc2"]
    w2k = w2.T.astype(jnp.bfloat16)                       # (256, 128)
    b2k = b2.astype(jnp.float32).reshape(1, -1)

    w3, b3 = params["fc3"]                                # (108, 128)
    d3 = w3.shape[0]
    w3k = jnp.pad(w3.T, ((0, 0), (0, LANES - d3))).astype(jnp.bfloat16)
    b3k = jnp.pad(b3, (0, LANES - d3)).astype(jnp.float32).reshape(1, LANES)

    return dict(wc1=wc1, bc1=bc1, wc2=wc2, bc2=bc2, wc3=wc3, bc3=bc3,
                w1=w1k, b1=b1k, w2=w2k, b2=b2k, w3=w3k, b3=b3k)


# ---------------------------------------------------------------------------
# Forward wrapper
# ---------------------------------------------------------------------------
@jax.jit
def forward(x_nchw, params):
    """Pallas equivalent of simplestBackbone.forward (NCHW input)."""
    N, Cin, H, W = x_nchw.shape
    assert H % 8 == 0 and W % 8 == 0 and Cin <= LANES
    kernel, (wp1, m1, mz1), (wp2, m2, mz2), (wp3, m3, mz3), s3 = _build_kernel(H, W)
    kp = pack_params(params, s3)
    sel1 = jnp.asarray(_pool_sel(H, W, True), jnp.bfloat16)
    sel2 = jnp.asarray(_pool_sel(H // 2, W // 2, True), jnp.bfloat16)
    sel3 = jnp.asarray(_pool_sel(H // 4, W // 4, False), jnp.bfloat16)

    # Layer-1 canvas: NHWC, spatial zero-pad by 1, channels zero-padded to 128
    # lanes, row-major flattened; bf16 halves the (only) HBM activation read.
    x = jnp.transpose(x_nchw, (0, 2, 3, 1)).astype(jnp.float32)
    x = jnp.pad(x, ((0, 0), (1, 1), (1, 1), (0, LANES - Cin)))
    canvas = x.reshape(N, (H + 2) * (W + 2), LANES).astype(jnp.bfloat16)

    weights = (kp["wc1"], kp["bc1"], sel1, kp["wc2"], kp["bc2"], sel2,
               kp["wc3"], kp["bc3"], sel3, kp["w1"], kp["b1"], kp["w2"],
               kp["b2"], kp["w3"], kp["b3"])

    c2_rows = (H // 2 + 2) * (W // 2 + 2)
    c3_rows = (H // 4 + 2) * (W // 4 + 2)

    flops = 2 * N * ((m1 + m2 + m3) * 9 * LANES * LANES
                     + (c2_rows * mz1 + c3_rows * mz2 + s3 * mz3) * LANES
                     + kp["w1"].shape[0] * kp["w1"].shape[1]
                     + kp["w2"].shape[0] * kp["w2"].shape[1]
                     + kp["w3"].shape[0] * kp["w3"].shape[1])
    bytes_accessed = int(canvas.size * 2
                         + sum(int(a.size) * a.dtype.itemsize for a in weights)
                         + N * LANES * 4)

    out = pl.pallas_call(
        kernel,
        out_shape=jax.ShapeDtypeStruct((N, 1, LANES), jnp.float32),
        grid_spec=pltpu.PrefetchScalarGridSpec(
            num_scalar_prefetch=0,
            grid=(N,),
            in_specs=[pl.BlockSpec((1, (H + 2) * (W + 2), LANES), lambda n: (n, 0, 0))]
                     + [pl.BlockSpec(a.shape, lambda n: (0, 0)) for a in weights],
            out_specs=pl.BlockSpec((1, 1, LANES), lambda n: (n, 0, 0)),
            scratch_shapes=[
                pltpu.VMEM((m1, LANES), jnp.float32),       # relu(conv1 + b)
                pltpu.VMEM((c2_rows, LANES), jnp.float32),  # padded canvas, layer 2
                pltpu.VMEM((m2, LANES), jnp.float32),       # relu(conv2 + b)
                pltpu.VMEM((c3_rows, LANES), jnp.float32),  # padded canvas, layer 3
                pltpu.VMEM((m3, LANES), jnp.float32),       # relu(conv3 + b)
                pltpu.VMEM((s3, LANES), jnp.float32),       # pooled conv3 output
            ],
        ),
        compiler_params=pltpu.CompilerParams(dimension_semantics=("parallel",)),
        cost_estimate=pl.CostEstimate(flops=int(flops), transcendentals=0,
                                      bytes_accessed=bytes_accessed),
    )(canvas, *weights)

    n_out = params["fc3"][0].shape[0]
    return out[:, 0, :n_out]


# ---------------------------------------------------------------------------
# Deterministic parameter init (torch-style layouts)
# ---------------------------------------------------------------------------
def init_params(key, cin, h, w):
    ks = jax.random.split(key, 12)

    def conv_w(k, co, ci):
        return jax.random.normal(k, (co, ci, 3, 3), jnp.float32) / np.sqrt(9 * ci)

    def fc_w(k, dout, din):
        return jax.random.normal(k, (dout, din), jnp.float32) / np.sqrt(din)

    def bias(k, n):
        return 0.01 * jax.random.normal(k, (n,), jnp.float32)

    s3 = (h // 8) * (w // 8)
    return {
        "conv1": (conv_w(ks[0], 16, cin), bias(ks[1], 16)),
        "conv2": (conv_w(ks[2], 32, 16), bias(ks[3], 32)),
        "conv3": (conv_w(ks[4], 64, 32), bias(ks[5], 64)),
        "fc1": (fc_w(ks[6], 256, 64 * s3), bias(ks[7], 256)),
        "fc2": (fc_w(ks[8], 128, 256), bias(ks[9], 128)),
        "fc3": (fc_w(ks[10], 108, 128), bias(ks[11], 108)),
    }


# ---------------------------------------------------------------------------
# References
# ---------------------------------------------------------------------------
def ref_forward_f32(x_nchw, params):
    """Pure-JAX f32 reference with the exact module semantics."""
    x = jnp.transpose(x_nchw, (0, 2, 3, 1)).astype(jnp.float32)
    for name in ("conv1", "conv2", "conv3"):
        w, b = params[name]
        w4 = jnp.transpose(w, (2, 3, 1, 0))
        y = lax.conv_general_dilated(x, w4, (1, 1), "SAME",
                                     dimension_numbers=("NHWC", "HWIO", "NHWC"))
        y = jnp.maximum(y + b.reshape(1, 1, 1, -1), 0.0)
        x = lax.reduce_window(y, -jnp.inf, lax.max, (1, 2, 2, 1), (1, 2, 2, 1), "VALID")
    n = x.shape[0]
    h = jnp.transpose(x, (0, 3, 1, 2)).reshape(n, -1)   # torch.flatten on NCHW
    for name, act in (("fc1", True), ("fc2", True), ("fc3", False)):
        w, b = params[name]
        h = h @ w.T + b
        if act:
            h = jnp.maximum(h, 0.0)
    return h


def ref_forward_bf16(x_nchw, params):
    """Same forward, matching the kernel's mixed-precision policy
    (bf16 matmul operands, f32 accumulation, pooled activations rounded to bf16)."""
    x = jnp.transpose(x_nchw, (0, 2, 3, 1)).astype(jnp.float32)
    for name in ("conv1", "conv2", "conv3"):
        w, b = params[name]
        w4 = jnp.transpose(w, (2, 3, 1, 0))
        y = lax.conv_general_dilated(x.astype(jnp.bfloat16), w4.astype(jnp.bfloat16),
                                     (1, 1), "SAME",
                                     dimension_numbers=("NHWC", "HWIO", "NHWC"),
                                     preferred_element_type=jnp.float32)
        y = jnp.maximum(y + b.reshape(1, 1, 1, -1), 0.0)
        x = lax.reduce_window(y, -jnp.inf, lax.max, (1, 2, 2, 1), (1, 2, 2, 1), "VALID")
        x = x.astype(jnp.bfloat16).astype(jnp.float32)
    n = x.shape[0]
    h = jnp.transpose(x, (0, 3, 1, 2)).reshape(n, -1)
    for name, act in (("fc1", True), ("fc2", True), ("fc3", False)):
        w, b = params[name]
        h = jnp.dot(h.astype(jnp.bfloat16), w.T.astype(jnp.bfloat16),
                    preferred_element_type=jnp.float32) + b
        if act:
            h = jnp.maximum(h, 0.0)
    return h


if __name__ == "__main__":
    key = jax.random.PRNGKey(0)
    kx, kparam = jax.random.split(key)

    N, Cin, H, W = 2, 4, 16, 16
    x = jax.random.normal(kx, (N, Cin, H, W), jnp.float32)
    params = init_params(kparam, Cin, H, W)

    out = jax.block_until_ready(forward(x, params))
    assert out.shape == (N, 108), out.shape

    ref_mixed = jax.block_until_ready(ref_forward_bf16(x, params))
    ref_full = jax.block_until_ready(ref_forward_f32(x, params))
    assert jnp.allclose(out, ref_mixed, rtol=5e-3, atol=5e-3), \
        float(jnp.max(jnp.abs(out - ref_mixed)))
    assert jnp.allclose(out, ref_full, rtol=1e-1, atol=1e-1), \
        float(jnp.max(jnp.abs(out - ref_full)))

    print("KERNEL_OK")
</pallas_src>

<mosaic_0001>
module attributes {stable_mosaic.version = 11 : i64} {
  func.func @kernel(%arg0: i32, %arg1: memref<1x324x128xbf16, #tpu.memory_space<vmem>>, %arg2: memref<1152x128xbf16, #tpu.memory_space<vmem>>, %arg3: memref<1x128xf32, #tpu.memory_space<vmem>>, %arg4: memref<100x267xbf16, #tpu.memory_space<vmem>>, %arg5: memref<1152x128xbf16, #tpu.memory_space<vmem>>, %arg6: memref<1x128xf32, #tpu.memory_space<vmem>>, %arg7: memref<36x67xbf16, #tpu.memory_space<vmem>>, %arg8: memref<1152x128xbf16, #tpu.memory_space<vmem>>, %arg9: memref<1x128xf32, #tpu.memory_space<vmem>>, %arg10: memref<4x15xbf16, #tpu.memory_space<vmem>>, %arg11: memref<512x256xbf16, #tpu.memory_space<vmem>>, %arg12: memref<1x256xf32, #tpu.memory_space<vmem>>, %arg13: memref<256x128xbf16, #tpu.memory_space<vmem>>, %arg14: memref<1x128xf32, #tpu.memory_space<vmem>>, %arg15: memref<128x128xbf16, #tpu.memory_space<vmem>>, %arg16: memref<1x128xf32, #tpu.memory_space<vmem>>, %arg17: memref<1x1x128xf32, #tpu.memory_space<vmem>>, %arg18: memref<286x128xf32, #tpu.memory_space<vmem>>, %arg19: memref<100x128xf32, #tpu.memory_space<vmem>>, %arg20: memref<78x128xf32, #tpu.memory_space<vmem>>, %arg21: memref<36x128xf32, #tpu.memory_space<vmem>>, %arg22: memref<22x128xf32, #tpu.memory_space<vmem>>, %arg23: memref<4x128xf32, #tpu.memory_space<vmem>>) attributes {dimension_semantics = [#tpu.dimension_semantics<parallel>], iteration_bounds = array<i64: 2>, scalar_prefetch = 0 : i64, scratch_operands = 6 : i64, tpu.core_type = #tpu.core_type<tc>, window_params = [{transform_indices = @transform_0, window_bounds = array<i64: 1, 324, 128>}, {pipeline_mode = #tpu.pipeline_mode<synchronous>, transform_indices = @transform_1, window_bounds = array<i64: 1152, 128>}, {pipeline_mode = #tpu.pipeline_mode<synchronous>, transform_indices = @transform_2, window_bounds = array<i64: 1, 128>}, {pipeline_mode = #tpu.pipeline_mode<synchronous>, transform_indices = @transform_3, window_bounds = array<i64: 100, 267>}, {pipeline_mode = #tpu.pipeline_mode<synchronous>, transform_indices = @transform_4, window_bounds = array<i64: 1152, 128>}, {pipeline_mode = #tpu.pipeline_mode<synchronous>, transform_indices = @transform_5, window_bounds = array<i64: 1, 128>}, {pipeline_mode = #tpu.pipeline_mode<synchronous>, transform_indices = @transform_6, window_bounds = array<i64: 36, 67>}, {pipeline_mode = #tpu.pipeline_mode<synchronous>, transform_indices = @transform_7, window_bounds = array<i64: 1152, 128>}, {pipeline_mode = #tpu.pipeline_mode<synchronous>, transform_indices = @transform_8, window_bounds = array<i64: 1, 128>}, {pipeline_mode = #tpu.pipeline_mode<synchronous>, transform_indices = @transform_9, window_bounds = array<i64: 4, 15>}, {pipeline_mode = #tpu.pipeline_mode<synchronous>, transform_indices = @transform_10, window_bounds = array<i64: 512, 256>}, {pipeline_mode = #tpu.pipeline_mode<synchronous>, transform_indices = @transform_11, window_bounds = array<i64: 1, 256>}, {pipeline_mode = #tpu.pipeline_mode<synchronous>, transform_indices = @transform_12, window_bounds = array<i64: 256, 128>}, {pipeline_mode = #tpu.pipeline_mode<synchronous>, transform_indices = @transform_13, window_bounds = array<i64: 1, 128>}, {pipeline_mode = #tpu.pipeline_mode<synchronous>, transform_indices = @transform_14, window_bounds = array<i64: 128, 128>}, {pipeline_mode = #tpu.pipeline_mode<synchronous>, transform_indices = @transform_15, window_bounds = array<i64: 1, 128>}, {transform_indices = @transform_16, window_bounds = array<i64: 1, 1, 128>}]} {
    %c0 = arith.constant 0 : index
    %c0_0 = arith.constant 0 : index
    %c0_1 = arith.constant 0 : index
    %0 = vector.load %arg1[%c0, %c0_0, %c0_1] : memref<1x324x128xbf16, #tpu.memory_space<vmem>>, vector<1x286x128xbf16>
    %1 = vector.shape_cast %0 : vector<1x286x128xbf16> to vector<286x128xbf16>
    %c0_2 = arith.constant 0 : index
    %c1 = arith.constant 1 : index
    %c0_3 = arith.constant 0 : index
    %2 = vector.load %arg1[%c0_2, %c1, %c0_3] : memref<1x324x128xbf16, #tpu.memory_space<vmem>>, vector<1x286x128xbf16>
    %3 = vector.shape_cast %2 : vector<1x286x128xbf16> to vector<286x128xbf16>
    %c0_4 = arith.constant 0 : index
    %c2 = arith.constant 2 : index
    %c0_5 = arith.constant 0 : index
    %4 = vector.load %arg1[%c0_4, %c2, %c0_5] : memref<1x324x128xbf16, #tpu.memory_space<vmem>>, vector<1x286x128xbf16>
    %5 = vector.shape_cast %4 : vector<1x286x128xbf16> to vector<286x128xbf16>
    %c0_6 = arith.constant 0 : index
    %c18 = arith.constant 18 : index
    %c0_7 = arith.constant 0 : index
    %6 = vector.load %arg1[%c0_6, %c18, %c0_7] : memref<1x324x128xbf16, #tpu.memory_space<vmem>>, vector<1x286x128xbf16>
    %7 = vector.shape_cast %6 : vector<1x286x128xbf16> to vector<286x128xbf16>
    %c0_8 = arith.constant 0 : index
    %c19 = arith.constant 19 : index
    %c0_9 = arith.constant 0 : index
    %8 = vector.load %arg1[%c0_8, %c19, %c0_9] : memref<1x324x128xbf16, #tpu.memory_space<vmem>>, vector<1x286x128xbf16>
    %9 = vector.shape_cast %8 : vector<1x286x128xbf16> to vector<286x128xbf16>
    %c0_10 = arith.constant 0 : index
    %c20 = arith.constant 20 : index
    %c0_11 = arith.constant 0 : index
    %10 = vector.load %arg1[%c0_10, %c20, %c0_11] : memref<1x324x128xbf16, #tpu.memory_space<vmem>>, vector<1x286x128xbf16>
    %11 = vector.shape_cast %10 : vector<1x286x128xbf16> to vector<286x128xbf16>
    %c0_12 = arith.constant 0 : index
    %c36 = arith.constant 36 : index
    %c0_13 = arith.constant 0 : index
    %12 = vector.load %arg1[%c0_12, %c36, %c0_13] : memref<1x324x128xbf16, #tpu.memory_space<vmem>>, vector<1x286x128xbf16>
    %13 = vector.shape_cast %12 : vector<1x286x128xbf16> to vector<286x128xbf16>
    %c0_14 = arith.constant 0 : index
    %c37 = arith.constant 37 : index
    %c0_15 = arith.constant 0 : index
    %14 = vector.load %arg1[%c0_14, %c37, %c0_15] : memref<1x324x128xbf16, #tpu.memory_space<vmem>>, vector<1x286x128xbf16>
    %15 = vector.shape_cast %14 : vector<1x286x128xbf16> to vector<286x128xbf16>
    %c0_16 = arith.constant 0 : index
    %c38 = arith.constant 38 : index
    %c0_17 = arith.constant 0 : index
    %16 = vector.load %arg1[%c0_16, %c38, %c0_17] : memref<1x324x128xbf16, #tpu.memory_space<vmem>>, vector<1x286x128xbf16>
    %17 = vector.shape_cast %16 : vector<1x286x128xbf16> to vector<286x128xbf16>
    %18 = tpu.concatenate %1, %3, %5, %7, %9, %11, %13, %15, %17 in 1 : vector<286x128xbf16>, vector<286x128xbf16>, vector<286x128xbf16>, vector<286x128xbf16>, vector<286x128xbf16>, vector<286x128xbf16>, vector<286x128xbf16>, vector<286x128xbf16>, vector<286x128xbf16> -> vector<286x1152xbf16>
    %c0_18 = arith.constant 0 : index
    %c0_19 = arith.constant 0 : index
    %19 = vector.load %arg2[%c0_18, %c0_19] : memref<1152x128xbf16, #tpu.memory_space<vmem>>, vector<1152x128xbf16>
    %cst = arith.constant dense<0.000000e+00> : vector<286x128xf32>
    %20 = tpu.matmul %18, %19, %cst {dimension_numbers = #tpu.dot_dimension_numbers<[1], [0], [0], [1], [0, 0, 1, 1], [], []>} : vector<286x1152xbf16>, vector<1152x128xbf16>, vector<286x128xf32> -> vector<286x128xf32>
    %c0_20 = arith.constant 0 : index
    %c0_21 = arith.constant 0 : index
    %21 = vector.load %arg3[%c0_20, %c0_21] : memref<1x128xf32, #tpu.memory_space<vmem>>, vector<1x128xf32>
    %22 = vector.broadcast %21 : vector<1x128xf32> to vector<286x128xf32>
    %23 = arith.addf %20, %22 : vector<286x128xf32>
    %cst_22 = arith.constant 0.000000e+00 : f32
    %24 = vector.broadcast %cst_22 : f32 to vector<286x128xf32>
    %25 = arith.maximumf %23, %24 : vector<286x128xf32>
    %c0_23 = arith.constant 0 : index
    %c0_24 = arith.constant 0 : index
    %26 = vector.load %arg18[%c0_23, %c0_24] : memref<286x128xf32, #tpu.memory_space<vmem>>, vector<286x128xf32>
    tpu.vector_store %arg18[%c0_23, %c0_24], %25 {strides = array<i32>} : memref<286x128xf32, #tpu.memory_space<vmem>>, vector<286x128xf32>,
    %c0_25 = arith.constant 0 : index
    %c0_26 = arith.constant 0 : index
    %27 = vector.load %arg18[%c0_25, %c0_26] : memref<286x128xf32, #tpu.memory_space<vmem>>, vector<267x128xf32>
    %c1_27 = arith.constant 1 : index
    %c0_28 = arith.constant 0 : index
    %28 = vector.load %arg18[%c1_27, %c0_28] : memref<286x128xf32, #tpu.memory_space<vmem>>, vector<267x128xf32>
    %29 = arith.maximumf %27, %28 : vector<267x128xf32>
    %c18_29 = arith.constant 18 : index
    %c0_30 = arith.constant 0 : index
    %30 = vector.load %arg18[%c18_29, %c0_30] : memref<286x128xf32, #tpu.memory_space<vmem>>, vector<267x128xf32>
    %c19_31 = arith.constant 19 : index
    %c0_32 = arith.constant 0 : index
    %31 = vector.load %arg18[%c19_31, %c0_32] : memref<286x128xf32, #tpu.memory_space<vmem>>, vector<267x128xf32>
    %32 = arith.maximumf %30, %31 : vector<267x128xf32>
    %33 = arith.maximumf %29, %32 : vector<267x128xf32>
    %c0_33 = arith.constant 0 : index
    %c0_34 = arith.constant 0 : index
    %34 = vector.load %arg4[%c0_33, %c0_34] : memref<100x267xbf16, #tpu.memory_space<vmem>>, vector<100x267xbf16>
    %35 = arith.truncf %33 : vector<267x128xf32> to vector<267x128xbf16>
    %cst_35 = arith.constant dense<0.000000e+00> : vector<100x128xf32>
    %36 = tpu.matmul %34, %35, %cst_35 {dimension_numbers = #tpu.dot_dimension_numbers<[1], [0], [0], [1], [0, 0, 1, 1], [], []>} : vector<100x267xbf16>, vector<267x128xbf16>, vector<100x128xf32> -> vector<100x128xf32>
    %c0_36 = arith.constant 0 : index
    %c0_37 = arith.constant 0 : index
    %37 = vector.load %arg19[%c0_36, %c0_37] : memref<100x128xf32, #tpu.memory_space<vmem>>, vector<100x128xf32>
    tpu.vector_store %arg19[%c0_36, %c0_37], %36 {strides = array<i32>} : memref<100x128xf32, #tpu.memory_space<vmem>>, vector<100x128xf32>,
    %c0_38 = arith.constant 0 : index
    %c0_39 = arith.constant 0 : index
    %38 = vector.load %arg19[%c0_38, %c0_39] : memref<100x128xf32, #tpu.memory_space<vmem>>, vector<78x128xf32>
    %39 = arith.truncf %38 : vector<78x128xf32> to vector<78x128xbf16>
    %c1_40 = arith.constant 1 : index
    %c0_41 = arith.constant 0 : index
    %40 = vector.load %arg19[%c1_40, %c0_41] : memref<100x128xf32, #tpu.memory_space<vmem>>, vector<78x128xf32>
    %41 = arith.truncf %40 : vector<78x128xf32> to vector<78x128xbf16>
    %c2_42 = arith.constant 2 : index
    %c0_43 = arith.constant 0 : index
    %42 = vector.load %arg19[%c2_42, %c0_43] : memref<100x128xf32, #tpu.memory_space<vmem>>, vector<78x128xf32>
    %43 = arith.truncf %42 : vector<78x128xf32> to vector<78x128xbf16>
    %c10 = arith.constant 10 : index
    %c0_44 = arith.constant 0 : index
    %44 = vector.load %arg19[%c10, %c0_44] : memref<100x128xf32, #tpu.memory_space<vmem>>, vector<78x128xf32>
    %45 = arith.truncf %44 : vector<78x128xf32> to vector<78x128xbf16>
    %c11 = arith.constant 11 : index
    %c0_45 = arith.constant 0 : index
    %46 = vector.load %arg19[%c11, %c0_45] : memref<100x128xf32, #tpu.memory_space<vmem>>, vector<78x128xf32>
    %47 = arith.truncf %46 : vector<78x128xf32> to vector<78x128xbf16>
    %c12 = arith.constant 12 : index
    %c0_46 = arith.constant 0 : index
    %48 = vector.load %arg19[%c12, %c0_46] : memref<100x128xf32, #tpu.memory_space<vmem>>, vector<78x128xf32>
    %49 = arith.truncf %48 : vector<78x128xf32> to vector<78x128xbf16>
    %c20_47 = arith.constant 20 : index
    %c0_48 = arith.constant 0 : index
    %50 = vector.load %arg19[%c20_47, %c0_48] : memref<100x128xf32, #tpu.memory_space<vmem>>, vector<78x128xf32>
    %51 = arith.truncf %50 : vector<78x128xf32> to vector<78x128xbf16>
    %c21 = arith.constant 21 : index
    %c0_49 = arith.constant 0 : index
    %52 = vector.load %arg19[%c21, %c0_49] : memref<100x128xf32, #tpu.memory_space<vmem>>, vector<78x128xf32>
    %53 = arith.truncf %52 : vector<78x128xf32> to vector<78x128xbf16>
    %c22 = arith.constant 22 : index
    %c0_50 = arith.constant 0 : index
    %54 = vector.load %arg19[%c22, %c0_50] : memref<100x128xf32, #tpu.memory_space<vmem>>, vector<78x128xf32>
    %55 = arith.truncf %54 : vector<78x128xf32> to vector<78x128xbf16>
    %56 = tpu.concatenate %39, %41, %43, %45, %47, %49, %51, %53, %55 in 1 : vector<78x128xbf16>, vector<78x128xbf16>, vector<78x128xbf16>, vector<78x128xbf16>, vector<78x128xbf16>, vector<78x128xbf16>, vector<78x128xbf16>, vector<78x128xbf16>, vector<78x128xbf16> -> vector<78x1152xbf16>
    %c0_51 = arith.constant 0 : index
    %c0_52 = arith.constant 0 : index
    %57 = vector.load %arg5[%c0_51, %c0_52] : memref<1152x128xbf16, #tpu.memory_space<vmem>>, vector<1152x128xbf16>
    %cst_53 = arith.constant dense<0.000000e+00> : vector<78x128xf32>
    %58 = tpu.matmul %56, %57, %cst_53 {dimension_numbers = #tpu.dot_dimension_numbers<[1], [0], [0], [1], [0, 0, 1, 1], [], []>} : vector<78x1152xbf16>, vector<1152x128xbf16>, vector<78x128xf32> -> vector<78x128xf32>
    %c0_54 = arith.constant 0 : index
    %c0_55 = arith.constant 0 : index
    %59 = vector.load %arg6[%c0_54, %c0_55] : memref<1x128xf32, #tpu.memory_space<vmem>>, vector<1x128xf32>
    %60 = vector.broadcast %59 : vector<1x128xf32> to vector<78x128xf32>
    %61 = arith.addf %58, %60 : vector<78x128xf32>
    %cst_56 = arith.constant 0.000000e+00 : f32
    %62 = vector.broadcast %cst_56 : f32 to vector<78x128xf32>
    %63 = arith.maximumf %61, %62 : vector<78x128xf32>
    %c0_57 = arith.constant 0 : index
    %c0_58 = arith.constant 0 : index
    %64 = vector.load %arg20[%c0_57, %c0_58] : memref<78x128xf32, #tpu.memory_space<vmem>>, vector<78x128xf32>
    tpu.vector_store %arg20[%c0_57, %c0_58], %63 {strides = array<i32>} : memref<78x128xf32, #tpu.memory_space<vmem>>, vector<78x128xf32>,
    %c0_59 = arith.constant 0 : index
    %c0_60 = arith.constant 0 : index
    %65 = vector.load %arg20[%c0_59, %c0_60] : memref<78x128xf32, #tpu.memory_space<vmem>>, vector<67x128xf32>
    %c1_61 = arith.constant 1 : index
    %c0_62 = arith.constant 0 : index
    %66 = vector.load %arg20[%c1_61, %c0_62] : memref<78x128xf32, #tpu.memory_space<vmem>>, vector<67x128xf32>
    %67 = arith.maximumf %65, %66 : vector<67x128xf32>
    %c10_63 = arith.constant 10 : index
    %c0_64 = arith.constant 0 : index
    %68 = vector.load %arg20[%c10_63, %c0_64] : memref<78x128xf32, #tpu.memory_space<vmem>>, vector<67x128xf32>
    %c11_65 = arith.constant 11 : index
    %c0_66 = arith.constant 0 : index
    %69 = vector.load %arg20[%c11_65, %c0_66] : memref<78x128xf32, #tpu.memory_space<vmem>>, vector<67x128xf32>
    %70 = arith.maximumf %68, %69 : vector<67x128xf32>
    %71 = arith.maximumf %67, %70 : vector<67x128xf32>
    %c0_67 = arith.constant 0 : index
    %c0_68 = arith.constant 0 : index
    %72 = vector.load %arg7[%c0_67, %c0_68] : memref<36x67xbf16, #tpu.memory_space<vmem>>, vector<36x67xbf16>
    %73 = arith.truncf %71 : vector<67x128xf32> to vector<67x128xbf16>
    %cst_69 = arith.constant dense<0.000000e+00> : vector<36x128xf32>
    %74 = tpu.matmul %72, %73, %cst_69 {dimension_numbers = #tpu.dot_dimension_numbers<[1], [0], [0], [1], [0, 0, 1, 1], [], []>} : vector<36x67xbf16>, vector<67x128xbf16>, vector<36x128xf32> -> vector<36x128xf32>
    %c0_70 = arith.constant 0 : index
    %c0_71 = arith.constant 0 : index
    %75 = vector.load %arg21[%c0_70, %c0_71] : memref<36x128xf32, #tpu.memory_space<vmem>>, vector<36x128xf32>
    tpu.vector_store %arg21[%c0_70, %c0_71], %74 {strides = array<i32>} : memref<36x128xf32, #tpu.memory_space<vmem>>, vector<36x128xf32>,
    %c0_72 = arith.constant 0 : index
    %c0_73 = arith.constant 0 : index
    %76 = vector.load %arg21[%c0_72, %c0_73] : memref<36x128xf32, #tpu.memory_space<vmem>>, vector<22x128xf32>
    %77 = arith.truncf %76 : vector<22x128xf32> to vector<22x128xbf16>
    %c1_74 = arith.constant 1 : index
    %c0_75 = arith.constant 0 : index
    %78 = vector.load %arg21[%c1_74, %c0_75] : memref<36x128xf32, #tpu.memory_space<vmem>>, vector<22x128xf32>
    %79 = arith.truncf %78 : vector<22x128xf32> to vector<22x128xbf16>
    %c2_76 = arith.constant 2 : index
    %c0_77 = arith.constant 0 : index
    %80 = vector.load %arg21[%c2_76, %c0_77] : memref<36x128xf32, #tpu.memory_space<vmem>>, vector<22x128xf32>
    %81 = arith.truncf %80 : vector<22x128xf32> to vector<22x128xbf16>
    %c6 = arith.constant 6 : index
    %c0_78 = arith.constant 0 : index
    %82 = vector.load %arg21[%c6, %c0_78] : memref<36x128xf32, #tpu.memory_space<vmem>>, vector<22x128xf32>
    %83 = arith.truncf %82 : vector<22x128xf32> to vector<22x128xbf16>
    %c7 = arith.constant 7 : index
    %c0_79 = arith.constant 0 : index
    %84 = vector.load %arg21[%c7, %c0_79] : memref<36x128xf32, #tpu.memory_space<vmem>>, vector<22x128xf32>
    %85 = arith.truncf %84 : vector<22x128xf32> to vector<22x128xbf16>
    %c8 = arith.constant 8 : index
    %c0_80 = arith.constant 0 : index
    %86 = vector.load %arg21[%c8, %c0_80] : memref<36x128xf32, #tpu.memory_space<vmem>>, vector<22x128xf32>
    %87 = arith.truncf %86 : vector<22x128xf32> to vector<22x128xbf16>
    %c12_81 = arith.constant 12 : index
    %c0_82 = arith.constant 0 : index
    %88 = vector.load %arg21[%c12_81, %c0_82] : memref<36x128xf32, #tpu.memory_space<vmem>>, vector<22x128xf32>
    %89 = arith.truncf %88 : vector<22x128xf32> to vector<22x128xbf16>
    %c13 = arith.constant 13 : index
    %c0_83 = arith.constant 0 : index
    %90 = vector.load %arg21[%c13, %c0_83] : memref<36x128xf32, #tpu.memory_space<vmem>>, vector<22x128xf32>
    %91 = arith.truncf %90 : vector<22x128xf32> to vector<22x128xbf16>
    %c14 = arith.constant 14 : index
    %c0_84 = arith.constant 0 : index
    %92 = vector.load %arg21[%c14, %c0_84] : memref<36x128xf32, #tpu.memory_space<vmem>>, vector<22x128xf32>
    %93 = arith.truncf %92 : vector<22x128xf32> to vector<22x128xbf16>
    %94 = tpu.concatenate %77, %79, %81, %83, %85, %87, %89, %91, %93 in 1 : vector<22x128xbf16>, vector<22x128xbf16>, vector<22x128xbf16>, vector<22x128xbf16>, vector<22x128xbf16>, vector<22x128xbf16>, vector<22x128xbf16>, vector<22x128xbf16>, vector<22x128xbf16> -> vector<22x1152xbf16>
    %c0_85 = arith.constant 0 : index
    %c0_86 = arith.constant 0 : index
    %95 = vector.load %arg8[%c0_85, %c0_86] : memref<1152x128xbf16, #tpu.memory_space<vmem>>, vector<1152x128xbf16>
    %cst_87 = arith.constant dense<0.000000e+00> : vector<22x128xf32>
    %96 = tpu.matmul %94, %95, %cst_87 {dimension_numbers = #tpu.dot_dimension_numbers<[1], [0], [0], [1], [0, 0, 1, 1], [], []>} : vector<22x1152xbf16>, vector<1152x128xbf16>, vector<22x128xf32> -> vector<22x128xf32>
    %c0_88 = arith.constant 0 : index
    %c0_89 = arith.constant 0 : index
    %97 = vector.load %arg9[%c0_88, %c0_89] : memref<1x128xf32, #tpu.memory_space<vmem>>, vector<1x128xf32>
    %98 = vector.broadcast %97 : vector<1x128xf32> to vector<22x128xf32>
    %99 = arith.addf %96, %98 : vector<22x128xf32>
    %cst_90 = arith.constant 0.000000e+00 : f32
    %100 = vector.broadcast %cst_90 : f32 to vector<22x128xf32>
    %101 = arith.maximumf %99, %100 : vector<22x128xf32>
    %c0_91 = arith.constant 0 : index
    %c0_92 = arith.constant 0 : index
    %102 = vector.load %arg22[%c0_91, %c0_92] : memref<22x128xf32, #tpu.memory_space<vmem>>, vector<22x128xf32>
    tpu.vector_store %arg22[%c0_91, %c0_92], %101 {strides = array<i32>} : memref<22x128xf32, #tpu.memory_space<vmem>>, vector<22x128xf32>,
    %c0_93 = arith.constant 0 : index
    %c0_94 = arith.constant 0 : index
    %103 = vector.load %arg22[%c0_93, %c0_94] : memref<22x128xf32, #tpu.memory_space<vmem>>, vector<15x128xf32>
    %c1_95 = arith.constant 1 : index
    %c0_96 = arith.constant 0 : index
    %104 = vector.load %arg22[%c1_95, %c0_96] : memref<22x128xf32, #tpu.memory_space<vmem>>, vector<15x128xf32>
    %105 = arith.maximumf %103, %104 : vector<15x128xf32>
    %c6_97 = arith.constant 6 : index
    %c0_98 = arith.constant 0 : index
    %106 = vector.load %arg22[%c6_97, %c0_98] : memref<22x128xf32, #tpu.memory_space<vmem>>, vector<15x128xf32>
    %c7_99 = arith.constant 7 : index
    %c0_100 = arith.constant 0 : index
    %107 = vector.load %arg22[%c7_99, %c0_100] : memref<22x128xf32, #tpu.memory_space<vmem>>, vector<15x128xf32>
    %108 = arith.maximumf %106, %107 : vector<15x128xf32>
    %109 = arith.maximumf %105, %108 : vector<15x128xf32>
    %c0_101 = arith.constant 0 : index
    %c0_102 = arith.constant 0 : index
    %110 = vector.load %arg10[%c0_101, %c0_102] : memref<4x15xbf16, #tpu.memory_space<vmem>>, vector<4x15xbf16>
    %111 = arith.truncf %109 : vector<15x128xf32> to vector<15x128xbf16>
    %cst_103 = arith.constant dense<0.000000e+00> : vector<4x128xf32>
    %112 = tpu.matmul %110, %111, %cst_103 {dimension_numbers = #tpu.dot_dimension_numbers<[1], [0], [0], [1], [0, 0, 1, 1], [], []>} : vector<4x15xbf16>, vector<15x128xbf16>, vector<4x128xf32> -> vector<4x128xf32>
    %c0_104 = arith.constant 0 : index
    %c0_105 = arith.constant 0 : index
    %113 = vector.load %arg23[%c0_104, %c0_105] : memref<4x128xf32, #tpu.memory_space<vmem>>, vector<4x128xf32>
    tpu.vector_store %arg23[%c0_104, %c0_105], %112 {strides = array<i32>} : memref<4x128xf32, #tpu.memory_space<vmem>>, vector<4x128xf32>,
    %c0_106 = arith.constant 0 : index
    %c0_107 = arith.constant 0 : index
    %114 = vector.load %arg23[%c0_106, %c0_107] : memref<4x128xf32, #tpu.memory_space<vmem>>, vector<1x128xf32>
    %c1_108 = arith.constant 1 : index
    %c0_109 = arith.constant 0 : index
    %115 = vector.load %arg23[%c1_108, %c0_109] : memref<4x128xf32, #tpu.memory_space<vmem>>, vector<1x128xf32>
    %c2_110 = arith.constant 2 : index
    %c0_111 = arith.constant 0 : index
    %116 = vector.load %arg23[%c2_110, %c0_111] : memref<4x128xf32, #tpu.memory_space<vmem>>, vector<1x128xf32>
    %c3 = arith.constant 3 : index
    %c0_112 = arith.constant 0 : index
    %117 = vector.load %arg23[%c3, %c0_112] : memref<4x128xf32, #tpu.memory_space<vmem>>, vector<1x128xf32>
    %118 = tpu.concatenate %114, %115, %116, %117 in 1 : vector<1x128xf32>, vector<1x128xf32>, vector<1x128xf32>, vector<1x128xf32> -> vector<1x512xf32>
    %119 = arith.truncf %118 : vector<1x512xf32> to vector<1x512xbf16>
    %c0_113 = arith.constant 0 : index
    %c0_114 = arith.constant 0 : index
    %120 = vector.load %arg11[%c0_113, %c0_114] : memref<512x256xbf16, #tpu.memory_space<vmem>>, vector<512x256xbf16>
    %cst_115 = arith.constant dense<0.000000e+00> : vector<1x256xf32>
    %121 = tpu.matmul %119, %120, %cst_115 {dimension_numbers = #tpu.dot_dimension_numbers<[1], [0], [0], [1], [0, 0, 1, 1], [], []>} : vector<1x512xbf16>, vector<512x256xbf16>, vector<1x256xf32> -> vector<1x256xf32>
    %c0_116 = arith.constant 0 : index
    %c0_117 = arith.constant 0 : index
    %122 = vector.load %arg12[%c0_116, %c0_117] : memref<1x256xf32, #tpu.memory_space<vmem>>, vector<1x256xf32>
    %123 = arith.addf %121, %122 : vector<1x256xf32>
    %cst_118 = arith.constant 0.000000e+00 : f32
    %124 = vector.broadcast %cst_118 : f32 to vector<1x256xf32>
    %125 = arith.maximumf %123, %124 : vector<1x256xf32>
    %126 = arith.truncf %125 : vector<1x256xf32> to vector<1x256xbf16>
    %c0_119 = arith.constant 0 : index
    %c0_120 = arith.constant 0 : index
    %127 = vector.load %arg13[%c0_119, %c0_120] : memref<256x128xbf16, #tpu.memory_space<vmem>>, vector<256x128xbf16>
    %cst_121 = arith.constant dense<0.000000e+00> : vector<1x128xf32>
    %128 = tpu.matmul %126, %127, %cst_121 {dimension_numbers = #tpu.dot_dimension_numbers<[1], [0], [0], [1], [0, 0, 1, 1], [], []>} : vector<1x256xbf16>, vector<256x128xbf16>, vector<1x128xf32> -> vector<1x128xf32>
    %c0_122 = arith.constant 0 : index
    %c0_123 = arith.constant 0 : index
    %129 = vector.load %arg14[%c0_122, %c0_123] : memref<1x128xf32, #tpu.memory_space<vmem>>, vector<1x128xf32>
    %130 = arith.addf %128, %129 : vector<1x128xf32>
    %cst_124 = arith.constant 0.000000e+00 : f32
    %131 = vector.broadcast %cst_124 : f32 to vector<1x128xf32>
    %132 = arith.maximumf %130, %131 : vector<1x128xf32>
    %133 = arith.truncf %132 : vector<1x128xf32> to vector<1x128xbf16>
    %c0_125 = arith.constant 0 : index
    %c0_126 = arith.constant 0 : index
    %134 = vector.load %arg15[%c0_125, %c0_126] : memref<128x128xbf16, #tpu.memory_space<vmem>>, vector<128x128xbf16>
    %cst_127 = arith.constant dense<0.000000e+00> : vector<1x128xf32>
    %135 = tpu.matmul %133, %134, %cst_127 {dimension_numbers = #tpu.dot_dimension_numbers<[1], [0], [0], [1], [0, 0, 1, 1], [], []>} : vector<1x128xbf16>, vector<128x128xbf16>, vector<1x128xf32> -> vector<1x128xf32>
    %c0_128 = arith.constant 0 : index
    %c0_129 = arith.constant 0 : index
    %136 = vector.load %arg16[%c0_128, %c0_129] : memref<1x128xf32, #tpu.memory_space<vmem>>, vector<1x128xf32>
    %137 = arith.addf %135, %136 : vector<1x128xf32>
    %c0_130 = arith.constant 0 : index
    %c0_131 = arith.constant 0 : index
    %c0_132 = arith.constant 0 : index
    %138 = vector.load %arg17[%c0_130, %c0_131, %c0_132] : memref<1x1x128xf32, #tpu.memory_space<vmem>>, vector<1x1x128xf32>
    %139 = vector.shape_cast %138 : vector<1x1x128xf32> to vector<1x128xf32>
    %140 = vector.shape_cast %137 : vector<1x128xf32> to vector<1x1x128xf32>
    tpu.vector_store %arg17[%c0_130, %c0_131, %c0_132], %140 {strides = array<i32>} : memref<1x1x128xf32, #tpu.memory_space<vmem>>, vector<1x1x128xf32>,
    return
  }
  func.func @transform_0(%arg0: i32) -> (i32, i32, i32) {
    %c0_i32 = arith.constant 0 : i32
    %c0_i32_0 = arith.constant 0 : i32
    %c0_i32_1 = arith.constant 0 : i32
    return %arg0, %c0_i32, %c0_i32_0 : i32, i32, i32
  }
  func.func @transform_1(%arg0: i32) -> (i32, i32) {
    %c0_i32 = arith.constant 0 : i32
    %c0_i32_0 = arith.constant 0 : i32
    %c0_i32_1 = arith.constant 0 : i32
    return %c0_i32, %c0_i32_0 : i32, i32
  }
  func.func @transform_2(%arg0: i32) -> (i32, i32) {
    %c0_i32 = arith.constant 0 : i32
    %c0_i32_0 = arith.constant 0 : i32
    %c0_i32_1 = arith.constant 0 : i32
    return %c0_i32, %c0_i32_0 : i32, i32
  }
  func.func @transform_3(%arg0: i32) -> (i32, i32) {
    %c0_i32 = arith.constant 0 : i32
    %c0_i32_0 = arith.constant 0 : i32
    %c0_i32_1 = arith.constant 0 : i32
    return %c0_i32, %c0_i32_0 : i32, i32
  }
  func.func @transform_4(%arg0: i32) -> (i32, i32) {
    %c0_i32 = arith.constant 0 : i32
    %c0_i32_0 = arith.constant 0 : i32
    %c0_i32_1 = arith.constant 0 : i32
    return %c0_i32, %c0_i32_0 : i32, i32
  }
  func.func @transform_5(%arg0: i32) -> (i32, i32) {
    %c0_i32 = arith.constant 0 : i32
    %c0_i32_0 = arith.constant 0 : i32
    %c0_i32_1 = arith.constant 0 : i32
    return %c0_i32, %c0_i32_0 : i32, i32
  }
  func.func @transform_6(%arg0: i32) -> (i32, i32) {
    %c0_i32 = arith.constant 0 : i32
    %c0_i32_0 = arith.constant 0 : i32
    %c0_i32_1 = arith.constant 0 : i32
    return %c0_i32, %c0_i32_0 : i32, i32
  }
  func.func @transform_7(%arg0: i32) -> (i32, i32) {
    %c0_i32 = arith.constant 0 : i32
    %c0_i32_0 = arith.constant 0 : i32
    %c0_i32_1 = arith.constant 0 : i32
    return %c0_i32, %c0_i32_0 : i32, i32
  }
  func.func @transform_8(%arg0: i32) -> (i32, i32) {
    %c0_i32 = arith.constant 0 : i32
    %c0_i32_0 = arith.constant 0 : i32
    %c0_i32_1 = arith.constant 0 : i32
    return %c0_i32, %c0_i32_0 : i32, i32
  }
  func.func @transform_9(%arg0: i32) -> (i32, i32) {
    %c0_i32 = arith.constant 0 : i32
    %c0_i32_0 = arith.constant 0 : i32
    %c0_i32_1 = arith.constant 0 : i32
    return %c0_i32, %c0_i32_0 : i32, i32
  }
  func.func @transform_10(%arg0: i32) -> (i32, i32) {
    %c0_i32 = arith.constant 0 : i32
    %c0_i32_0 = arith.constant 0 : i32
    %c0_i32_1 = arith.constant 0 : i32
    return %c0_i32, %c0_i32_0 : i32, i32
  }
  func.func @transform_11(%arg0: i32) -> (i32, i32) {
    %c0_i32 = arith.constant 0 : i32
    %c0_i32_0 = arith.constant 0 : i32
    %c0_i32_1 = arith.constant 0 : i32
    return %c0_i32, %c0_i32_0 : i32, i32
  }
  func.func @transform_12(%arg0: i32) -> (i32, i32) {
    %c0_i32 = arith.constant 0 : i32
    %c0_i32_0 = arith.constant 0 : i32
    %c0_i32_1 = arith.constant 0 : i32
    return %c0_i32, %c0_i32_0 : i32, i32
  }
  func.func @transform_13(%arg0: i32) -> (i32, i32) {
    %c0_i32 = arith.constant 0 : i32
    %c0_i32_0 = arith.constant 0 : i32
    %c0_i32_1 = arith.constant 0 : i32
    return %c0_i32, %c0_i32_0 : i32, i32
  }
  func.func @transform_14(%arg0: i32) -> (i32, i32) {
    %c0_i32 = arith.constant 0 : i32
    %c0_i32_0 = arith.constant 0 : i32
    %c0_i32_1 = arith.constant 0 : i32
    return %c0_i32, %c0_i32_0 : i32, i32
  }
  func.func @transform_15(%arg0: i32) -> (i32, i32) {
    %c0_i32 = arith.constant 0 : i32
    %c0_i32_0 = arith.constant 0 : i32
    %c0_i32_1 = arith.constant 0 : i32
    return %c0_i32, %c0_i32_0 : i32, i32
  }
  func.func @transform_16(%arg0: i32) -> (i32, i32, i32) {
    %c0_i32 = arith.constant 0 : i32
    %c0_i32_0 = arith.constant 0 : i32
    %c0_i32_1 = arith.constant 0 : i32
    return %arg0, %c0_i32, %c0_i32_0 : i32, i32, i32
  }
}

</mosaic_0001>

<bundles_post_ra>
// kernel: forward.1
= control target key start
LH: loop header
LB: loop body
LE: loop exit
PB: predicated region body
PF: predicated region fallthrough
CT: control target
= control target key end

     0   :  { %s11213_s0 = inlined_call_operand.vmem [shape: bf16[2,324,128], index: 0, kind: input, shape index: {}]   ;;  %s11214_s1 = inlined_call_operand.vmem [shape: bf16[1152,128], index: 1, kind: input, shape index: {}]   ;;  %s11215_s2 = inlined_call_operand.vmem [shape: f32[1,128], index: 2, kind: input, shape index: {}]   ;;  %s11216_s3 = inlined_call_operand.vmem [shape: bf16[100,267], index: 3, kind: input, shape index: {}]   ;;  %s11217_s4 = inlined_call_operand.vmem [shape: bf16[1152,128], index: 4, kind: input, shape index: {}]   ;;  %s11218_s5 = inlined_call_operand.vmem [shape: f32[1,128], index: 5, kind: input, shape index: {}]   ;;  %s11219_s6 = inlined_call_operand.vmem [shape: bf16[36,67], index: 6, kind: input, shape index: {}]   ;;  %s11220_s7 = inlined_call_operand.vmem [shape: bf16[1152,128], index: 7, kind: input, shape index: {}]   ;;  %s11221_s8 = inlined_call_operand.vmem [shape: f32[1,128], index: 8, kind: input, shape index: {}]   ;;  %s11222_s9 = inlined_call_operand.vmem [shape: bf16[4,15], index: 9, kind: input, shape index: {}]   ;;  %s11223_s10 = inlined_call_operand.vmem [shape: bf16[512,256], index: 10, kind: input, shape index: {}]   ;;  %s11224_s11 = inlined_call_operand.vmem [shape: f32[1,256], index: 11, kind: input, shape index: {}]   ;;  %s11225_s12 = inlined_call_operand.vmem [shape: bf16[256,128], index: 12, kind: input, shape index: {}]   ;;  %s11226_s13 = inlined_call_operand.vmem [shape: f32[1,128], index: 13, kind: input, shape index: {}]   ;;  %s11227_s14 = inlined_call_operand.vmem [shape: bf16[128,128], index: 14, kind: input, shape index: {}]   ;;  %s11228_s15 = inlined_call_operand.vmem [shape: f32[1,128], index: 15, kind: input, shape index: {}]   ;;  %s11229_s16 = inlined_call_operand.hbm [shape: f32[2,1,128], index: 16, kind: output, shape index: {}]  }
   0x1   :  { %11267 = sst [smem:[#allocation32_spill]] %s11213_s0 }
   0x2   :  { %11268 = sst [smem:[#allocation33_spill]] %s11228_s15 }
   0x3   :  { %21 = vsyncpa [#allocation9], 0 }
   0x4   :  { %23 = vsyncpa [#allocation9 + $0x1], 0  ;;  %s8485_s21 = smov 0   ;;  %s8487_s22 = smov 0  }
   0x5   :  { %s8489_s23 = smov 0   ;;  %s8491_s24 = smov 0  }
   0x6 LB: > { %11269 = sst [smem:[#allocation11_spill]] %s8385_s21  ;;  %s8506_s25 = sadd.s32 4294967295, %s8397_s24   ;;  %s8397_s24 = sphi %s8491_s24, %s11360_s24   ;;  %s8393_s23 = sphi %s8489_s23, %s11362_s23   ;;  %s8389_s22 = sphi %s8487_s22, %s11364_s22   ;;  %s8385_s21 = sphi %s8485_s21, %s11363_s21  }
   0x7   : > { %11270 = sst [smem:[#allocation12_spill]] %s8393_s23  ;;  %s6529_s26 = sadd.s32 4294967294, %s8397_s24  }
   0x8   : > { %11271 = sst [smem:[#allocation13_spill]] %s8397_s24  ;;  %s8510_s27 = sadd.s32 1, %s8397_s24  }
   0x9   : > { %11272 = sst [smem:[#allocation14_spill]] %s8510_s27  ;;  %s377_s28 = sadd.s32 1, %s8393_s23 }
   0xa   : > { %s374_s29 = ssub.s32 %s8397_s24, %s8510_s27  ;;  %p387_p0 = scmp.ne.s32.totalorder %s8393_s23, %s8389_s22 }
   0xb   : > { %p375_p1 = scmp.eq.s32.totalorder %s374_s29, 0  ;;  %p388_p2 = scmp.eq.s32.totalorder %s8506_s25, 1 }
   0xc   : > { %p393_p3 = scmp.ne.s32.totalorder %s8389_s22, %s8385_s21  ;;  %p394_p4 = scmp.eq.s32.totalorder %s6529_s26, 1 }
   0xd   : > { %s8521_s30 = scalar_select %p375_p1, %s8393_s23, %s377_s28  }
   0xe   : > { %p8523_p5 = por %p388_p2, %p387_p0  ;;  %p8527_p6 = por %p394_p4, %p393_p3 }
   0xf   : > { %11273 = sst [smem:[#allocation15_spill]] %s8521_s30  ;;  %p6532_p7 = scmp.ge.s32.totalorder %s8397_s24, 1 }
  0x10   : > { %s11275_s17 = scalar_select %p8527_p6, 1, 0 }
  0x11   : > { %p465_p8 = scmp.lt.s32.totalorder %s8397_s24, 3 }
  0x12   : > { %11276 = sst [smem:[#allocation16_spill]] %s11275_s17 }
  0x13   : > { %p466_p9 = pnand %p6532_p7, %p465_p8 }
  0x15   : > { %469 = sbr.rel (%p466_p9) target bundleno = 2592 (0xa20), region = 84 }
  0x1a   : > { %v7930_v0 = vld [vmem:[%s11214_s1 + $0x38] sm:$0xff]  ;;  %p514_p10 = scmp.lt.s32.totalorder %s8506_s25, 1  ;;  %v7929_v4 = vld [vmem:[%s11214_s1 + $0x30] sm:$0xff]  ;;  %v7928_v8 = vld [vmem:[%s11214_s1 + $0x28] sm:$0xff]  ;;  %s11277_s24 = sld [smem:[#allocation32_spill]]  ;;  %vm845_vm0 = vcmask 1046528  }
  0x1b   : > { %v7946_v1 = vld [vmem:[%s11214_s1 + $0xb8] sm:$0xff]  ;;  %1852 = vmatpush.bf16.msra.mxu0 %v7930_v0  ;;  %v7945_v5 = vld [vmem:[%s11214_s1 + $0xb0] sm:$0xff]  ;;  %v7944_v9 = vld [vmem:[%s11214_s1 + $0xa8] sm:$0xff]  ;;  %vm680_vm1 = vsmask.f32 7424  ;;  %vm1025_vm3 = vcmask 1045504  }
  0x1c   : > { %v7938_v2 = vld [vmem:[%s11214_s1 + $0x78] sm:$0xff]  ;;  %2050 = vmatpush.bf16.msra.mxu2 %v7946_v1  ;;  %v7937_v6 = vld [vmem:[%s11214_s1 + $0x70] sm:$0xff]  ;;  %s515_s30 = scalar_select %p514_p10, %s8506_s25, 1  ;;  %v7936_v10 = vld [vmem:[%s11214_s1 + $0x68] sm:$0xff]  ;;  %vm917_vm2 = vsmask.f32 6400 }
  0x1d   : > { %v7954_v3 = vld [vmem:[%s11214_s1 + $0xf8] sm:$0xff]  ;;  %1951 = vmatpush.bf16.msra.mxu1 %v7938_v2  ;;  %v7953_v7 = vld [vmem:[%s11214_s1 + $0xf0] sm:$0xff]  ;;  %v7952_v11 = vld [vmem:[%s11214_s1 + $0xe8] sm:$0xff]  ;;  %vm1104_vm4 = vsmask.f32 5376  ;;  %vm1216_vm5 = vcmask 1044480  }
  0x1e   : > { %2149 = vmatpush.bf16.msra.mxu3 %v7954_v3  ;;  %s8274_s23 = smul.u32 164, %s515_s30  ;;  %v7927_v12 = vld [vmem:[%s11214_s1 + $0x20] sm:$0xff]  ;;  %v7926_v16 = vld [vmem:[%s11214_s1 + $0x18] sm:$0xff]  ;;  %v7925_v23 = vld [vmem:[%s11214_s1 + $0x10] sm:$0xff]  ;;  %vm3196_vm6 = vcmask 89088   ;;  %vm4755_vm7 = vcmask 1040384  }
  0x1f   : > { %1853 = vmatpush.bf16.msra.mxu0 %v7929_v4  ;;  %v7943_v13 = vld [vmem:[%s11214_s1 + $0xa0] sm:$0xff]  ;;  %v7942_v17 = vld [vmem:[%s11214_s1 + $0x98] sm:$0xff]  ;;  %v7941_v24 = vld [vmem:[%s11214_s1 + $0x90] sm:$0xff]  ;;  %vm4756_vm8 = vcmask 1041408   ;;  %vm4745_vm9 = vcmask 547840   ;;  %vm5699_vm10 = vcmask 1047552  }
  0x20   : > { %2051 = vmatpush.bf16.msra.mxu2 %v7945_v5  ;;  %v7935_v14 = vld [vmem:[%s11214_s1 + $0x60] sm:$0xff]  ;;  %s8586_s15 = scalar_lea.vmem %s11277_s24, %s8274_s23  ;;  %v7934_v18 = vld [vmem:[%s11214_s1 + $0x58] sm:$0xff]  ;;  %v7933_v25 = vld [vmem:[%s11214_s1 + $0x50] sm:$0xff]  ;;  %vm5694_vm11 = vcmask 121856   ;;  %s512_s18 = sand.u32 1, %s8389_s22  }
  0x21   : > { %1952 = vmatpush.bf16.msra.mxu1 %v7937_v6  ;;  %v7951_v15 = vld [vmem:[%s11214_s1 + $0xe0] sm:$0xff]  ;;  %v7950_v19 = vld [vmem:[%s11214_s1 + $0xd8] sm:$0xff]  ;;  %v8602_v21 = vld [vmem:[%s8586_s15 + $0x8] sm:$0xff]   ;;  %s6470_s24 = scalar_lea.hbm %s11229_s16, %s8506_s25  ;;  %s11356_s20 = sld [smem:[#allocation33_spill]] }
  0x22   : > { %2150 = vmatpush.bf16.msra.mxu3 %v7953_v7  ;;  %v8248_v20 = vld [vmem:[%s8586_s15] sm:$0xff]   ;;  %v558_v22 = vld [vmem:[%s8586_s15 + $0x8] sm:$0xe]  ;;  %v7949_v26 = vld [vmem:[%s11214_s1 + $0xd0] sm:$0xff]  ;;  %v11236_v30 = vunpack.c.h.b16 %v8602_v21  ;;  %v689_v39 = vshll.u32 %v8602_v21, 16  ;;  %v847_v45 = vrot.slane %v8602_v21, 1 }
  0x23   : > { %1854 = vmatpush.bf16.msra.mxu0 %v7928_v8  ;;  %v684_v27 = vshll.u32 %v8248_v20, 16  ;;  %v8266_v28 = vld [vmem:[%s8586_s15] sm:$0xf0]  ;;  %v8267_v29 = vld [vmem:[%s8586_s15] sm:$0xe]  ;;  %v902_v31 = vunpack.c.l.b16 %v558_v22  ;;  %v7924_v32 = vld [vmem:[%s11214_s1 + $0x8] sm:$0xff] }
  0x24   : > { %2052 = vmatpush.bf16.msra.mxu2 %v7944_v9  ;;  %v7940_v33 = vld [vmem:[%s11214_s1 + $0x88] sm:$0xff]  ;;  %v8268_v34 = vor.u32 %v8267_v29, %v8266_v28  ;;  %v682_v37 = vshrl.u32 %v8248_v20, 16  ;;  %v8638_v41 = vld [vmem:[%s8586_s15 + $0x10] sm:$0xff]   ;;  %v7923_v42 = vld [vmem:[%s11214_s1] sm:$0xff]  ;;  %v691_v49 = vrot.slane %v689_v39, 1  ;;  %v693_v55 = vshrl.u32 %v8602_v21, 16 }
  0x25   : > { %1953 = vmatpush.bf16.msra.mxu1 %v7936_v10  ;;  %v7932_v35 = vld [vmem:[%s11214_s1 + $0x48] sm:$0xff]  ;;  %v686_v38 = vrot.slane %v684_v27, 1  ;;  %v8635_v40 = vpack.c.b16 %v11236_v30, %v902_v31  ;;  %v7939_v43 = vld [vmem:[%s11214_s1 + $0x80] sm:$0xff]  ;;  %v849_v50 = vrot.slane %v8638_v41, 1  ;;  %v11238_v56 = vshll.u32 %v8638_v41, 16  ;;  %v8661_v57 = vld [vmem:[%s8586_s15 + $0x18] sm:$0xff] }
  0x26   : > { %2151 = vmatpush.bf16.msra.mxu3 %v7952_v11  ;;  %v7948_v36 = vld [vmem:[%s11214_s1 + $0xc8] sm:$0xff]  ;;  %v846_v44 = vrot.slane %v8268_v34, 1  ;;  %v7931_v46 = vld [vmem:[%s11214_s1 + $0x40] sm:$0xff]  ;;  %v695_v58 = vor.u32 %v693_v55, %v691_v49  ;;  %v851_v60 = vrot.slane %v8661_v57, 1  ;;  %v11237_v0 = vshrl.u32 %v8638_v41, 16  ;;  %v7911_v27 = vld [vmem:[%s8586_s15 + $0x38] sm:$0xff] }
  0x27   : > { %1855 = vmatpush.bf16.msra.mxu0 %v7927_v12  ;;  %v7947_v47 = vld [vmem:[%s11214_s1 + $0xc0] sm:$0xff]  ;;  %v687_v48 = vor.u32 %v686_v38, %v682_v37  ;;  %v907_v51 = vrot.slane %v8635_v40, 1  ;;  %v699_v59 = vrot.slane %v11238_v56, 1  ;;  %v850_v61 = vsel %vm845_vm0, %v847_v45, %v849_v50  ;;  %v8691_v10 = vld [vmem:[%s8586_s15 + $0x28] sm:$0xff]  ;;  %s513_s26 = scalar_lea.vmem [#allocation8], %s512_s18  ;;  %s6474_s28 = sshll.u32 %s6470_s24, 4  ;;  %s6475_s28 = int_to_ptr.hbm [resolvable:$true] %s6474_s28 }
  0x28   : > { %2053 = vmatpush.bf16.msra.mxu2 %v7943_v13  ;;  %v848_v52 = vsel %vm845_vm0, %v846_v44, %v847_v45  ;;  %v852_v63 = vsel %vm845_vm0, %v849_v50, %v851_v60  ;;  %v8672_v1 = vshll.u32 %v8661_v57, 16  ;;  %v8675_v2 = vld [vmem:[%s8586_s15 + $0x20] sm:$0xff]  ;;  %v8685_v8 = vshrl.u32 %v8661_v57, 16  ;;  %s6472_s30 = sshll.u32 %s513_s26, 4  ;;  %s6462_s21 = scalar_lea.sflag [#allocation9], %s512_s18  ;;  %s6473_s30 = int_to_ptr.vmem [resolvable:$true] %s6472_s30 }
  0x29   : > { %1954 = vmatpush.bf16.msra.mxu1 %v7935_v14  ;;  %v692_v53 = vsel %vm680_vm1, %v687_v48, %v691_v49  ;;  %v908_v54 = vsel %vm845_vm0, %v907_v51, %v849_v50  ;;  %v700_v62 = vsel %vm680_vm1, %v695_v58, %v699_v59  ;;  %v703_v3 = vor.u32 %v11237_v0, %v699_v59  ;;  %v8756_v55 = vld [vmem:[%s11215_s2] ss:$0 sm:$0xff]  ;;  %s8349_s29 = sshra.s32 %s6475_s28, 4  ;;  %s8355_s19 = scalar_lea.hbm %s11229_s16, 2  ;;  %s8350_s29 = int_to_ptr.hbm [resolvable:$true] %s8349_s29 }
  0x2a   : > { %2152 = vmatpush.bf16.msra.mxu3 %v7951_v15  ;;  %v707_v4 = vrot.slane %v8672_v1, 1  ;;  %v853_v5 = vrot.slane %v8675_v2, 1  ;;  %v8688_v9 = vshll.u32 %v8675_v2, 16  ;;  %v855_v13 = vrot.slane %v8691_v10, 1  ;;  %s8351_s27 = scalar_lea.hbm %s8350_s29, 1  ;;  %p8356_p0 = scmp.lt.s32.totalorder %s8350_s29, %s11229_s16 }
  0x2b   : > { %1856 = vmatpush.bf16.msra.mxu0 %v7926_v16  ;;  %v8700_v16 = vshrl.u32 %v8675_v2, 16  ;;  %v859_v31 = vrot.slane %v7911_v27, 1  ;;  %v8737_v44 = vshrl.u32 %v7911_v27, 16  ;;  %p8352_p11 = scmp.ne.s32.totalorder %s8350_s29, %s8351_s27  ;;  %p8357_p1 = scmp.lt.s32.totalorder %s8355_s19, %s8351_s27 }
  0x2c   : > { %2054 = vmatpush.bf16.msra.mxu2 %v7942_v17  ;;  %v708_v6 = vsel %vm680_vm1, %v703_v3, %v707_v4  ;;  %v854_v7 = vsel %vm845_vm0, %v851_v60, %v853_v5  ;;  %v711_v11 = vor.u32 %v8685_v8, %v707_v4  ;;  %v715_v12 = vrot.slane %v8688_v9, 1 }
  0x2d   : > { %1955 = vmatpush.bf16.msra.mxu1 %v7934_v18  ;;  %v856_v15 = vsel %vm845_vm0, %v853_v5, %v855_v13  ;;  %v8703_v17 = vshll.u32 %v8691_v10, 16  ;;  %v8706_v18 = vld [vmem:[%s8586_s15 + $0x30] sm:$0xff]  ;;  %p8353_p12 = pnand %p8352_p11, %p8523_p5  ;;  %p8358_p2 = por %p8357_p1, %p8356_p0 }
  0x2e   : > { %2153 = vmatpush.bf16.msra.mxu3 %v7950_v19  ;;  %v716_v14 = vsel %vm680_vm1, %v711_v11, %v715_v12  ;;  %v719_v19 = vor.u32 %v8700_v16, %v715_v12  ;;  %v857_v22 = vrot.slane %v8706_v18, 1  ;;  %v8727_v34 = vshrl.u32 %v8706_v18, 16 }
  0x2f   : > { %1857 = vmatpush.bf16.msra.mxu0 %v7925_v23  ;;  %p8354_p13 = pneg %p8353_p12 }
  0x30   : > { %2055 = vmatpush.bf16.msra.mxu2 %v7941_v24  ;;  %v858_v24 = vsel %vm845_vm0, %v855_v13, %v857_v22 }
  0x31   : > { %1956 = vmatpush.bf16.msra.mxu1 %v7933_v25  ;;  %v8715_v25 = vshrl.u32 %v8691_v10, 16  ;;  %p8359_p3 = pnand %p8358_p2, %p8354_p13 }
  0x32   : > { %2154 = vmatpush.bf16.msra.mxu3 %v7949_v26  ;;  %v8718_v26 = vshll.u32 %v8706_v18, 16 }
  0x33   : > { %1858 = vmatpush.bf16.msra.mxu0 %v7924_v32 }
  0x34   : > { %2056 = vmatpush.bf16.msra.mxu2 %v7940_v33  ;;  %v731_v29 = vrot.slane %v8718_v26, 1  ;;  %v860_v33 = vsel %vm845_vm0, %v857_v22, %v859_v31  ;;  %v8773_v22 = vld [vmem:[%s8586_s15 + $0x58] sm:$0xff] }
  0x35   : > { %1957 = vmatpush.bf16.msra.mxu1 %v7932_v35  ;;  %v8729_v35 = vshll.u32 %v7911_v27, 16 }
  0x36   : > { %2155 = vmatpush.bf16.msra.mxu3 %v7948_v36  ;;  %v7912_v36 = vld [vmem:[%s8586_s15 + $0x40] sm:$0xff]  ;;  %v735_v37 = vor.u32 %v8727_v34, %v731_v29 }
  0x37   : > { %1859 = vmatpush.bf16.msra.mxu0 %v7923_v42  ;;  %v739_v38 = vrot.slane %v8729_v35, 1  ;;  %v861_v39 = vrot.slane %v7912_v36, 1  ;;  %v8739_v45 = vshll.u32 %v7912_v36, 16 }
  0x38   : > { %2057 = vmatpush.bf16.msra.mxu2 %v7939_v43 }
  0x39   : > { %1958 = vmatpush.bf16.msra.mxu1 %v7931_v46  ;;  %v740_v42 = vsel %vm680_vm1, %v735_v37, %v739_v38  ;;  %v862_v43 = vsel %vm845_vm0, %v859_v31, %v861_v39  ;;  %v7913_v46 = vld [vmem:[%s8586_s15 + $0x48] sm:$0xff]  ;;  %v747_v48 = vrot.slane %v8739_v45, 1 }
  0x3a   : > { %2156 = vmatpush.bf16.msra.mxu3 %v7947_v47  ;;  %1860 = vmatmul.bf16.vlgmr.msra.gmra.mxu0 %v8248_v20  ;;  %v723_v20 = vrot.slane %v8703_v17, 1  ;;  %v743_v47 = vor.u32 %v8737_v44, %v739_v38  ;;  %v863_v49 = vrot.slane %v7913_v46, 1 }
  0x3b   : > { %2058 = vmatmul.bf16.vlgmr.msra.gmra.mxu2 %v848_v52  ;;  %v8746_v52 = vshrl.u32 %v7912_v36, 16 }
  0x3c   : > { %1959 = vmatmul.bf16.vlgmr.msra.gmra.mxu1 %v692_v53  ;;  %v724_v23 = vsel %vm680_vm1, %v719_v19, %v723_v20  ;;  %v727_v28 = vor.u32 %v8715_v25, %v723_v20  ;;  %v748_v50 = vsel %vm680_vm1, %v743_v47, %v747_v48  ;;  %v864_v51 = vsel %vm845_vm0, %v861_v39, %v863_v49 }
  0x3d   : > { %2157 = vmatmul.bf16.vlgmr.msra.gmra.mxu3 %v908_v54  ;;  %v8748_v53 = vshll.u32 %v7913_v46, 16  ;;  %v8751_v54 = vld [vmem:[%s8586_s15 + $0x50] sm:$0xff]  ;;  %v751_v58 = vor.u32 %v8746_v52, %v747_v48  ;;  %v8767_v19 = vshrl.u32 %v7913_v46, 16 }
  0x3e   : > { %v732_v32 = vsel %vm680_vm1, %v727_v28, %v731_v29  ;;  %v865_v60 = vrot.slane %v8751_v54, 1  ;;  %v8770_v20 = vshll.u32 %v8751_v54, 16  ;;  %v867_v28 = vrot.slane %v8773_v22, 1 }
  0x3f   : > { %v755_v59 = vrot.slane %v8748_v53, 1 }
  0x40   : > { %v866_v4 = vsel %vm845_vm0, %v863_v49, %v865_v60 }
  0x41   : > { %v756_v3 = vsel %vm680_vm1, %v751_v58, %v755_v59 }
  0x4a   : > { %1865 = vmatmul.bf16.gmra.mxu0 %v8602_v21 }
  0x4b   : > { %2063 = vmatmul.bf16.gmra.mxu2 %v850_v61 }
  0x4c   : > { %1964 = vmatmul.bf16.gmra.mxu1 %v700_v62 }
  0x4d   : > { %2162 = vmatmul.bf16.gmra.mxu3 %v852_v63 }
  0x5a   : > { %1870 = vmatmul.bf16.gmra.mxu0 %v8638_v41 }
  0x5b   : > { %2068 = vmatmul.bf16.gmra.mxu2 %v852_v63 }
  0x5c   : > { %1969 = vmatmul.bf16.gmra.mxu1 %v708_v6 }
  0x5d   : > { %2167 = vmatmul.bf16.gmra.mxu3 %v854_v7 }
  0x6a   : > { %1875 = vmatmul.bf16.gmra.mxu0 %v8661_v57 }
  0x6b   : > { %2073 = vmatmul.bf16.gmra.mxu2 %v854_v7 }
  0x6c   : > { %1974 = vmatmul.bf16.gmra.mxu1 %v716_v14 }
  0x6d   : > { %2172 = vmatmul.bf16.gmra.mxu3 %v856_v15 }
  0x7a   : > { %1880 = vmatmul.bf16.gmra.mxu0 %v8675_v2 }
  0x7b   : > { %2078 = vmatmul.bf16.gmra.mxu2 %v856_v15 }
  0x7c   : > { %1979 = vmatmul.bf16.gmra.mxu1 %v724_v23 }
  0x7d   : > { %2177 = vmatmul.bf16.gmra.mxu3 %v858_v24 }
  0x8a   : > { %1885 = vmatmul.bf16.gmra.mxu0 %v8691_v10 }
  0x8b   : > { %2083 = vmatmul.bf16.gmra.mxu2 %v858_v24  ;;  %v759_v24 = vor.u32 %v8767_v19, %v755_v59 }
  0x8c   : > { %1984 = vmatmul.bf16.gmra.mxu1 %v732_v32 }
  0x8d   : > { %2182 = vmatmul.bf16.gmra.mxu3 %v860_v33 }
  0x9a   : > { %1890 = vmatmul.bf16.gmra.mxu0 %v8706_v18 }
  0x9b   : > { %2088 = vmatmul.bf16.gmra.mxu2 %v860_v33 }
  0x9c   : > { %1989 = vmatmul.bf16.gmra.mxu1 %v740_v42  ;;  %v868_v42 = vsel %vm845_vm0, %v865_v60, %v867_v28  ;;  %v8793_v60 = vld [vmem:[%s8586_s15 + $0x60] sm:$0xff] }
  0x9d   : > { %2187 = vmatmul.bf16.gmra.mxu3 %v862_v43 }
  0xaa   : > { %1895 = vmatmul.bf16.gmra.mxu0 %v7911_v27  ;;  %v763_v27 = vrot.slane %v8770_v20, 1 }
  0xab   : > { %2093 = vmatmul.bf16.gmra.mxu2 %v862_v43 }
  0xac   : > { %1994 = vmatmul.bf16.gmra.mxu1 %v748_v50  ;;  %v764_v39 = vsel %vm680_vm1, %v759_v24, %v763_v27 }
  0xad   : > { %2192 = vmatmul.bf16.gmra.mxu3 %v864_v51 }
  0xb7   : > { %v1861_v61 = vpop.f32.mrf.mxu0 }
  0xb8   : > { %v1862_v62 = vadd.f32 %v8756_v55, %v1861_v61  ;;  %v8787_v61 = vshrl.u32 %v8751_v54, 16 }
  0xb9   : > { %v1960_v63 = vpop.f32.mrf.mxu1 }
  0xba   : > { %v1961_v5 = vadd.f32 %v1960_v63, %v1862_v62  ;;  %1900 = vmatmul.bf16.gmra.mxu0 %v7912_v36  ;;  %v8790_v62 = vshll.u32 %v8773_v22, 16  ;;  %v767_v63 = vor.u32 %v8787_v61, %v763_v27 }
  0xbb   : > { %2098 = vmatmul.bf16.gmra.mxu2 %v864_v51 }
  0xbc   : > { %1999 = vmatmul.bf16.gmra.mxu1 %v756_v3  ;;  %v771_v3 = vrot.slane %v8790_v62, 1 }
  0xbd   : > { %2197 = vmatmul.bf16.gmra.mxu3 %v866_v4 }
  0xbe   : > { %v2059_v6 = vpop.f32.mrf.mxu2 }
  0xbf   : > { %v2060_v7 = vadd.f32 %v2059_v6, %v1961_v5  ;;  %v1863_v12 = vpop.f32.mrf.mxu0 }
  0xc0   : > { %v2158_v11 = vpop.f32.mrf.mxu3  ;;  %v1864_v13 = vadd.f32 %v8756_v55, %v1863_v12 }
  0xc1   : > { %v8765_v14 = vadd.f32 %v2158_v11, %v2060_v7  ;;  %v1962_v15 = vpop.f32.mrf.mxu1 }
  0xc2   : > { %v1963_v23 = vadd.f32 %v1962_v15, %v1864_v13 }
  0xc6   : > { %v2061_v29 = vpop.f32.mrf.mxu2 }
  0xc7   : > { %v2062_v31 = vadd.f32 %v2061_v29, %v1963_v23  ;;  %v1866_v33 = vpop.f32.mrf.mxu0  ;;  %v772_v23 = vsel %vm680_vm1, %v767_v63, %v771_v3 }
  0xc8   : > { %v2160_v32 = vpop.f32.mrf.mxu3  ;;  %v1867_v36 = vadd.f32 %v8756_v55, %v1866_v33 }
  0xc9   : > { %v8779_v37 = vadd.f32 %v2160_v32, %v2062_v31  ;;  %v1965_v38 = vpop.f32.mrf.mxu1 }
  0xca   : > { %v1966_v43 = vadd.f32 %v1965_v38, %v1867_v36  ;;  %1905 = vmatmul.bf16.gmra.mxu0 %v7913_v46 }
  0xcb   : > { %2103 = vmatmul.bf16.gmra.mxu2 %v866_v4  ;;  %v869_v4 = vrot.slane %v8793_v60, 1 }
  0xcc   : > { %2004 = vmatmul.bf16.gmra.mxu1 %v764_v39 }
  0xcd   : > { %2202 = vmatmul.bf16.gmra.mxu3 %v868_v42  ;;  %v870_v24 = vsel %vm845_vm0, %v867_v28, %v869_v4  ;;  %v8811_v28 = vshll.u32 %v8793_v60, 16 }
  0xce   : > { %v2064_v47 = vpop.f32.mrf.mxu2 }
  0xcf   : > { %v2065_v48 = vadd.f32 %v2064_v47, %v1966_v43  ;;  %v1868_v50 = vpop.f32.mrf.mxu0  ;;  %v8808_v43 = vshrl.u32 %v8773_v22, 16  ;;  %v8814_v47 = vld [vmem:[%s8586_s15 + $0x68] sm:$0xff] }
  0xd0   : > { %v2163_v49 = vpop.f32.mrf.mxu3  ;;  %v1869_v51 = vadd.f32 %v8756_v55, %v1868_v50 }
  0xd1   : > { %v8784_v58 = vadd.f32 %v2163_v49, %v2065_v48  ;;  %v1967_v59 = vpop.f32.mrf.mxu1  ;;  %v779_v48 = vrot.slane %v8811_v28, 1  ;;  %v871_v49 = vrot.slane %v8814_v47, 1 }
  0xd2   : > { %v1968_v46 = vadd.f32 %v1967_v59, %v1869_v51 }
  0xd6   : > { %v2066_v5 = vpop.f32.mrf.mxu2 }
  0xd7   : > { %v2067_v6 = vadd.f32 %v2066_v5, %v1968_v46  ;;  %v1871_v11 = vpop.f32.mrf.mxu0 }
  0xd8   : > { %v2165_v7 = vpop.f32.mrf.mxu3  ;;  %v1872_v12 = vadd.f32 %v8756_v55, %v1871_v11  ;;  %v872_v11 = vsel %vm845_vm0, %v869_v4, %v871_v49  ;;  %v8832_v4 = vshll.u32 %v8814_v47, 16 }
  0xd9   : > { %v8799_v13 = vadd.f32 %v2165_v7, %v2067_v6  ;;  %v1970_v15 = vpop.f32.mrf.mxu1 }
  0xda   : > { %v1971_v29 = vadd.f32 %v1970_v15, %v1872_v12  ;;  %1910 = vmatmul.bf16.gmra.mxu0 %v8751_v54 }
  0xdb   : > { %2108 = vmatmul.bf16.gmra.mxu2 %v868_v42  ;;  %v775_v42 = vor.u32 %v8808_v43, %v771_v3 }
  0xdc   : > { %2009 = vmatmul.bf16.gmra.mxu1 %v772_v23 }
  0xdd   : > { %2207 = vmatmul.bf16.gmra.mxu3 %v870_v24  ;;  %v780_v7 = vsel %vm680_vm1, %v775_v42, %v779_v48 }
  0xde   : > { %v2069_v27 = vpop.f32.mrf.mxu2 }
  0xdf   : > { %v2070_v31 = vadd.f32 %v2069_v27, %v1971_v29  ;;  %v1873_v33 = vpop.f32.mrf.mxu0 }
  0xe0   : > { %v2168_v32 = vpop.f32.mrf.mxu3  ;;  %v1874_v36 = vadd.f32 %v8756_v55, %v1873_v33  ;;  %v8829_v33 = vshrl.u32 %v8793_v60, 16 }
  0xe1   : > { %v8805_v38 = vadd.f32 %v2168_v32, %v2070_v31  ;;  %v1972_v39 = vpop.f32.mrf.mxu1 }
  0xe2   : > { %v1973_v54 = vadd.f32 %v1972_v39, %v1874_v36  ;;  %v8835_v36 = vld [vmem:[%s8586_s15 + $0x70] sm:$0xff]  ;;  %v787_v39 = vrot.slane %v8832_v4, 1 }
  0xe6   : > { %v2071_v50 = vpop.f32.mrf.mxu2 }
  0xe7   : > { %v2072_v51 = vadd.f32 %v2071_v50, %v1973_v54  ;;  %v1876_v46 = vpop.f32.mrf.mxu0  ;;  %v873_v54 = vrot.slane %v8835_v36, 1 }
  0xe8   : > { %v2170_v59 = vpop.f32.mrf.mxu3  ;;  %v1877_v63 = vadd.f32 %v8756_v55, %v1876_v46 }
  0xe9   : > { %v8820_v5 = vadd.f32 %v2170_v59, %v2072_v51  ;;  %v1975_v6 = vpop.f32.mrf.mxu1 }
  0xea   : > { %v1976_v12 = vadd.f32 %v1975_v6, %v1877_v63  ;;  %1915 = vmatmul.bf16.gmra.mxu0 %v8773_v22 }
  0xeb   : > { %2113 = vmatmul.bf16.gmra.mxu2 %v870_v24  ;;  %v783_v24 = vor.u32 %v8829_v33, %v779_v48 }
  0xec   : > { %2014 = vmatmul.bf16.gmra.mxu1 %v780_v7 }
  0xed   : > { %2212 = vmatmul.bf16.gmra.mxu3 %v872_v11  ;;  %v788_v7 = vsel %vm680_vm1, %v783_v24, %v787_v39  ;;  %v8850_v24 = vshrl.u32 %v8814_v47, 16 }
  0xee   : > { %v2074_v3 = vpop.f32.mrf.mxu2 }
  0xef   : > { %v2075_v15 = vadd.f32 %v2074_v3, %v1976_v12  ;;  %v1878_v29 = vpop.f32.mrf.mxu0  ;;  %v874_v12 = vsel %vm845_vm0, %v871_v49, %v873_v54  ;;  %v8853_v49 = vshll.u32 %v8835_v36, 16 }
  0xf0   : > { %v2173_v23 = vpop.f32.mrf.mxu3  ;;  %v1879_v27 = vadd.f32 %v8756_v55, %v1878_v29 }
  0xf1   : > { %v8826_v31 = vadd.f32 %v2173_v23, %v2075_v15  ;;  %v1977_v32 = vpop.f32.mrf.mxu1 }
  0xf2   : > { %v1978_v22 = vadd.f32 %v1977_v32, %v1879_v27 }
  0xf6   : > { %v2076_v42 = vpop.f32.mrf.mxu2 }
  0xf7   : > { %v2077_v50 = vadd.f32 %v2076_v42, %v1978_v22  ;;  %v1881_v59 = vpop.f32.mrf.mxu0  ;;  %v8856_v42 = vld [vmem:[%s8586_s15 + $0x78] sm:$0xff] }
  0xf8   : > { %v2175_v51 = vpop.f32.mrf.mxu3  ;;  %v1882_v46 = vadd.f32 %v8756_v55, %v1881_v59 }
  0xf9   : > { %v8841_v63 = vadd.f32 %v2175_v51, %v2077_v50  ;;  %v1980_v6 = vpop.f32.mrf.mxu1  ;;  %v795_v50 = vrot.slane %v8853_v49, 1  ;;  %v875_v51 = vrot.slane %v8856_v42, 1 }
  0xfa   : > { %v1981_v3 = vadd.f32 %v1980_v6, %v1882_v46  ;;  %1920 = vmatmul.bf16.gmra.mxu0 %v8793_v60 }
  0xfb   : > { %2118 = vmatmul.bf16.gmra.mxu2 %v872_v11  ;;  %v791_v11 = vor.u32 %v8850_v24, %v787_v39 }
  0xfc   : > { %2019 = vmatmul.bf16.gmra.mxu1 %v788_v7 }
  0xfd   : > { %2217 = vmatmul.bf16.gmra.mxu3 %v874_v12 }
  0xfe   : > { %v2079_v48 = vpop.f32.mrf.mxu2 }
  0xff   : > { %v2080_v15 = vadd.f32 %v2079_v48, %v1981_v3  ;;  %v1883_v29 = vpop.f32.mrf.mxu0 }
 0x100   : > { %v2178_v23 = vpop.f32.mrf.mxu3  ;;  %v1884_v27 = vadd.f32 %v8756_v55, %v1883_v29  ;;  %v876_v29 = vsel %vm845_vm0, %v873_v54, %v875_v51  ;;  %v8874_v54 = vshll.u32 %v8856_v42, 16 }
 0x101   : > { %v8847_v32 = vadd.f32 %v2178_v23, %v2080_v15  ;;  %v1982_v22 = vpop.f32.mrf.mxu1  ;;  %v796_v23 = vsel %vm680_vm1, %v791_v11, %v795_v50  ;;  %v8871_v11 = vshrl.u32 %v8835_v36, 16 }
 0x102   : > { %v1983_v60 = vadd.f32 %v1982_v22, %v1884_v27  ;;  %11281 = vst [vmem:[#allocation20_spill] sm:$0xff] %v8874_v54 }
 0x103   : > { %11278 = vst [vmem:[#allocation17_spill] sm:$0xff] %v8847_v32 }
 0x106   : > { %v2081_v59 = vpop.f32.mrf.mxu2 }
 0x107   : > { %v2082_v46 = vadd.f32 %v2081_v59, %v1983_v60  ;;  %v1886_v7 = vpop.f32.mrf.mxu0 }
 0x108   : > { %v2180_v6 = vpop.f32.mrf.mxu3  ;;  %v1887_v3 = vadd.f32 %v8756_v55, %v1886_v7 }
 0x109   : > { %v8862_v48 = vadd.f32 %v2180_v6, %v2082_v46  ;;  %v1985_v15 = vpop.f32.mrf.mxu1 }
 0x10a   : > { %v1986_v27 = vadd.f32 %v1985_v15, %v1887_v3  ;;  %1925 = vmatmul.bf16.gmra.mxu0 %v8814_v47  ;;  %v8877_v3 = vld [vmem:[%s8586_s15 + $0x80] sm:$0xff]  ;;  %v803_v15 = vrot.slane %v8874_v54, 1 }
 0x10b   : > { %11279 = vst [vmem:[#allocation18_spill] sm:$0xff] %v8862_v48  ;;  %2123 = vmatmul.bf16.gmra.mxu2 %v874_v12  ;;  %v799_v12 = vor.u32 %v8871_v11, %v795_v50  ;;  %v7962_v50 = vld [vmem:[%s11214_s1 + $0x138] sm:$0xff] }
 0x10c   : > { %2024 = vmatmul.bf16.gmra.mxu1 %v796_v23  ;;  %v11239_v23 = vrot.slane %v8877_v3, 1  ;;  %2248 = vmatpush.bf16.msrb.mxu0 %v7962_v50  ;;  %v7985_v50 = vld [vmem:[%s11214_s1 + $0x1f0] sm:$0xff] }
 0x10d   : > { %2222 = vmatmul.bf16.gmra.mxu3 %v876_v29  ;;  %v804_v56 = vsel %vm680_vm1, %v799_v12, %v803_v15  ;;  %v7986_v12 = vld [vmem:[%s11214_s1 + $0x1f8] sm:$0xff] }
 0x10e   : > { %v2084_v39 = vpop.f32.mrf.mxu2  ;;  %2545 = vmatpush.bf16.msrb.mxu3 %v7986_v12  ;;  %v8927_v12 = vld [vmem:[%s8586_s15 + $0x88] sm:$0xff]  }
 0x10f   : > { %v2085_v22 = vadd.f32 %v2084_v39, %v1986_v27  ;;  %v1888_v59 = vpop.f32.mrf.mxu0 }
 0x110   : > { %v2183_v60 = vpop.f32.mrf.mxu3  ;;  %v1889_v7 = vadd.f32 %v8756_v55, %v1888_v59 }
 0x111   : > { %v8868_v46 = vadd.f32 %v2183_v60, %v2085_v22  ;;  %v1987_v6 = vpop.f32.mrf.mxu1 }
 0x112   : > { %v1988_v47 = vadd.f32 %v1987_v6, %v1889_v7  ;;  %v8889_v7 = vsel %vm845_vm0, %v875_v51, %v11239_v23  ;;  %v7978_v6 = vld [vmem:[%s11214_s1 + $0x1b8] sm:$0xff]  ;;  %2546 = vmatpush.bf16.msrb.mxu3 %v7985_v50  ;;  %v7976_v23 = vld [vmem:[%s11214_s1 + $0x1a8] sm:$0xff]  ;;  %v7975_v50 = vld [vmem:[%s11214_s1 + $0x1a0] sm:$0xff] }
 0x113   : > { %11280 = vst [vmem:[#allocation19_spill] sm:$0xff] %v8868_v46  ;;  %v7970_v51 = vld [vmem:[%s11214_s1 + $0x178] sm:$0xff]  ;;  %2446 = vmatpush.bf16.msrb.mxu2 %v7978_v6 }
 0x114   : > { %2347 = vmatpush.bf16.msrb.mxu1 %v7970_v51 }
 0x116   : > { %v2086_v27 = vpop.f32.mrf.mxu2 }
 0x117   : > { %v2087_v39 = vadd.f32 %v2086_v27, %v1988_v47  ;;  %v1891_v60 = vpop.f32.mrf.mxu0 }
 0x118   : > { %v2185_v22 = vpop.f32.mrf.mxu3  ;;  %v1892_v59 = vadd.f32 %v8756_v55, %v1891_v60  ;;  %v8915_v60 = vshll.u32 %v8877_v3, 16 }
 0x119   : > { %v8883_v30 = vadd.f32 %v2185_v22, %v2087_v39  ;;  %v1990_v0 = vpop.f32.mrf.mxu1  ;;  %v8912_v22 = vshrl.u32 %v8856_v42, 16 }
 0x11a   : > { %v1991_v47 = vadd.f32 %v1990_v0, %v1892_v59  ;;  %1930 = vmatmul.bf16.gmra.mxu0 %v8835_v36  ;;  %v7977_v0 = vld [vmem:[%s11214_s1 + $0x1b0] sm:$0xff]  ;;  %11283 = vst [vmem:[#allocation22_spill] sm:$0xff] %v8915_v60 }
 0x11b   : > { %11282 = vst [vmem:[#allocation21_spill] sm:$0xff] %v8883_v30  ;;  %2128 = vmatmul.bf16.gmra.mxu2 %v876_v29  ;;  %v7969_v59 = vld [vmem:[%s11214_s1 + $0x170] sm:$0xff] }
 0x11c   : > { %2029 = vmatmul.bf16.gmra.mxu1 %v804_v56  ;;  %v7961_v56 = vld [vmem:[%s11214_s1 + $0x130] sm:$0xff]  ;;  %2447 = vmatpush.bf16.msrb.mxu2 %v7977_v0  ;;  %v7984_v0 = vld [vmem:[%s11214_s1 + $0x1e8] sm:$0xff] }
 0x11d   : > { %2227 = vmatmul.bf16.gmra.mxu3 %v8889_v7  ;;  %2249 = vmatpush.bf16.msrb.mxu0 %v7961_v56  ;;  %v7968_v56 = vld [vmem:[%s11214_s1 + $0x168] sm:$0xff] }
 0x11e   : > { %v2089_v27 = vpop.f32.mrf.mxu2  ;;  %2348 = vmatpush.bf16.msrb.mxu1 %v7969_v59  ;;  %2547 = vmatpush.bf16.msrb.mxu3 %v7984_v0 }
 0x11f   : > { %v2090_v36 = vadd.f32 %v2089_v27, %v1991_v47  ;;  %v1893_v39 = vpop.f32.mrf.mxu0  ;;  %v7960_v27 = vld [vmem:[%s11214_s1 + $0x128] sm:$0xff] }
 0x120   : > { %v2188_v29 = vpop.f32.mrf.mxu3  ;;  %v1894_v6 = vadd.f32 %v8756_v55, %v1893_v39  ;;  %v807_v39 = vor.u32 %v8912_v22, %v803_v15  ;;  %2448 = vmatpush.bf16.msrb.mxu2 %v7976_v23  ;;  %v7959_v15 = vld [vmem:[%s11214_s1 + $0x120] sm:$0xff] }
 0x121   : > { %v8924_v51 = vadd.f32 %v2188_v29, %v2090_v36  ;;  %v1992_v47 = vpop.f32.mrf.mxu1  ;;  %v811_v36 = vrot.slane %v8915_v60, 1  ;;  %v8944_v29 = vrot.slane %v8927_v12, 1  ;;  %2250 = vmatpush.bf16.msrb.mxu0 %v7960_v27  ;;  %v7967_v23 = vld [vmem:[%s11214_s1 + $0x160] sm:$0xff] }
 0x122   : > { %v1993_v30 = vadd.f32 %v1992_v47, %v1894_v6  ;;  %2349 = vmatpush.bf16.msrb.mxu1 %v7968_v56  ;;  %v7983_v27 = vld [vmem:[%s11214_s1 + $0x1e0] sm:$0xff] }
 0x123   : > { %11284 = vst [vmem:[#allocation23_spill] sm:$0xff] %v8924_v51  ;;  %v812_v46 = vsel %vm680_vm1, %v807_v39, %v811_v36  ;;  %2548 = vmatpush.bf16.msrb.mxu3 %v7983_v27  ;;  %v7958_v39 = vld [vmem:[%s11214_s1 + $0x118] sm:$0xff]  ;;  %v8990_v27 = vshrl.u32 %v8877_v3, 16 }
 0x124   : > { %2449 = vmatpush.bf16.msrb.mxu2 %v7975_v50  ;;  %v7982_v50 = vld [vmem:[%s11214_s1 + $0x1d8] sm:$0xff] }
 0x125   : > { %2251 = vmatpush.bf16.msrb.mxu0 %v7959_v15  ;;  %v7966_v15 = vld [vmem:[%s11214_s1 + $0x158] sm:$0xff]  ;;  %11287 = vst [vmem:[#allocation25_spill] sm:$0xff] %v8990_v27 }
 0x126   : > { %v2091_v59 = vpop.f32.mrf.mxu2  ;;  %2350 = vmatpush.bf16.msrb.mxu1 %v7967_v23 }
 0x127   : > { %v2092_v6 = vadd.f32 %v2091_v59, %v1993_v30  ;;  %v1896_v51 = vpop.f32.mrf.mxu0  ;;  %v11286_v30 = vrot.slane %v8877_v3, 1  ;;  %2549 = vmatpush.bf16.msrb.mxu3 %v7982_v50  ;;  %v9005_v50 = vld [vmem:[%s8586_s15 + $0x90] sm:$0xff] }
 0x128   : > { %v2190_v47 = vpop.f32.mrf.mxu3  ;;  %v1897_v56 = vadd.f32 %v8756_v55, %v1896_v51  ;;  %v7974_v51 = vld [vmem:[%s11214_s1 + $0x198] sm:$0xff] }
 0x129   : > { %v8960_v0 = vadd.f32 %v2190_v47, %v2092_v6  ;;  %v1995_v60 = vpop.f32.mrf.mxu1  ;;  %v8966_v59 = vsel %vm845_vm0, %v11286_v30, %v8944_v29  ;;  %2252 = vmatpush.bf16.msrb.mxu0 %v7958_v39  ;;  %2450 = vmatpush.bf16.msrb.mxu2 %v7974_v51  ;;  %v7965_v30 = vld [vmem:[%s11214_s1 + $0x150] sm:$0xff] }
 0x12a   : > { %v1996_v6 = vadd.f32 %v1995_v60, %v1897_v56  ;;  %1935 = vmatmul.bf16.gmra.mxu0 %v8856_v42  ;;  %2351 = vmatpush.bf16.msrb.mxu1 %v7966_v15  ;;  %v7957_v42 = vld [vmem:[%s11214_s1 + $0x110] sm:$0xff]  ;;  %v8993_v56 = vshll.u32 %v8927_v12, 16 }
 0x12b   : > { %11285 = vst [vmem:[#allocation24_spill] sm:$0xff] %v8960_v0  ;;  %2133 = vmatmul.bf16.gmra.mxu2 %v8889_v7  ;;  %v7981_v39 = vld [vmem:[%s11214_s1 + $0x1d0] sm:$0xff]  ;;  %v7972_v0 = vld [vmem:[%s11214_s1 + $0x188] sm:$0xff] }
 0x12c   : > { %2034 = vmatmul.bf16.gmra.mxu1 %v812_v46  ;;  %v7973_v46 = vld [vmem:[%s11214_s1 + $0x190] sm:$0xff]  ;;  %11288 = vst [vmem:[#allocation26_spill] sm:$0xff] %v8993_v56  ;;  %2550 = vmatpush.bf16.msrb.mxu3 %v7981_v39  ;;  %v7980_v39 = vld [vmem:[%s11214_s1 + $0x1c8] sm:$0xff] }
 0x12d   : > { %2232 = vmatmul.bf16.gmra.mxu3 %v8966_v59  ;;  %2253 = vmatpush.bf16.msrb.mxu0 %v7957_v42  ;;  %v815_v42 = vor.u32 %v8990_v27, %v811_v36  ;;  %v7955_v36 = vld [vmem:[%s11214_s1 + $0x100] sm:$0xff] }
 0x12e   : > { %v2094_v47 = vpop.f32.mrf.mxu2  ;;  %2451 = vmatpush.bf16.msrb.mxu2 %v7973_v46  ;;  %2352 = vmatpush.bf16.msrb.mxu1 %v7965_v30  ;;  %v819_v46 = vrot.slane %v8993_v56, 1  ;;  %v7964_v30 = vld [vmem:[%s11214_s1 + $0x148] sm:$0xff] }
 0x12f   : > { %v2095_v7 = vadd.f32 %v2094_v47, %v1996_v6  ;;  %v1898_v23 = vpop.f32.mrf.mxu0  ;;  %v7956_v47 = vld [vmem:[%s11214_s1 + $0x108] sm:$0xff] }
 0x130   : > { %v2193_v60 = vpop.f32.mrf.mxu3  ;;  %v1899_v51 = vadd.f32 %v8756_v55, %v1898_v23  ;;  %v11290_v23 = vshll.u32 %v8638_v41, 16  ;;  %2551 = vmatpush.bf16.msrb.mxu3 %v7980_v39  ;;  %v820_v32 = vsel %vm680_vm1, %v815_v42, %v819_v46 }
 0x131   : > { %v9002_v15 = vadd.f32 %v2193_v60, %v2095_v7  ;;  %v1997_v6 = vpop.f32.mrf.mxu1  ;;  %v11291_v60 = vshrl.u32 %v8638_v41, 16  ;;  %2254 = vmatpush.bf16.msrb.mxu0 %v7956_v47 }
 0x132   : > { %v1998_v48 = vadd.f32 %v1997_v6, %v1899_v51  ;;  %v927_v7 = vrot.slane %v11290_v23, 2  ;;  %v909_v51 = vrot.slane %v9005_v50, 1  ;;  %2452 = vmatpush.bf16.msrb.mxu2 %v7972_v0  ;;  %2353 = vmatpush.bf16.msrb.mxu1 %v7964_v30  ;;  %v7971_v23 = vld [vmem:[%s11214_s1 + $0x180] sm:$0xff] }
 0x133   : > { %11289 = vst [vmem:[#allocation27_spill] sm:$0xff] %v9002_v15  ;;  %v926_v15 = vrot.slane %v11291_v60, 1  ;;  %v7963_v0 = vld [vmem:[%s11214_s1 + $0x140] sm:$0xff] }
 0x134   : > { %v7979_v50 = vld [vmem:[%s11214_s1 + $0x1c0] sm:$0xff] }
 0x135   : > { %v9039_v47 = vor.u32 %v927_v7, %v926_v15  ;;  %2255 = vmatpush.bf16.msrb.mxu0 %v7955_v36  ;;  %2552 = vmatpush.bf16.msrb.mxu3 %v7979_v50  ;;  %v8271_v50 = vld [vmem:[%s8586_s15 + $0x88] sm:$0xf]  }
 0x136   : > { %v2096_v6 = vpop.f32.mrf.mxu2  ;;  %2453 = vmatpush.bf16.msrb.mxu2 %v7971_v23  ;;  %2354 = vmatpush.bf16.msrb.mxu1 %v7963_v0 }
 0x137   : > { %v2097_v60 = vadd.f32 %v2096_v6, %v1998_v48  ;;  %v1901_v27 = vpop.f32.mrf.mxu0  ;;  %v910_v48 = vsel %vm845_vm0, %v8944_v29, %v909_v51 }
 0x138   : > { %v2195_v56 = vpop.f32.mrf.mxu3  ;;  %v1902_v30 = vadd.f32 %v8756_v55, %v1901_v27 }
 0x139   : > { %v9042_v39 = vadd.f32 %v2195_v56, %v2097_v60  ;;  %v2000_v54 = vpop.f32.mrf.mxu1  ;;  %v563_v60 = vld [vmem:[%s8586_s15 + $0x10] sm:$0xc] }
 0x13a   : > { %v2001_v42 = vadd.f32 %v2000_v54, %v1902_v30  ;;  %1940 = vmatmul.bf16.gmra.mxu0 %v8877_v3  ;;  %v8273_v54 = vld [vmem:[%s8586_s15 + $0x88] sm:$0x70]  ;;  %v9055_v3 = vshrl.u32 %v8927_v12, 16  ;;  %v562_v12 = vld [vmem:[%s8586_s15 + $0x8] sm:$0xc] }
 0x13b   : > { %11292 = vst [vmem:[#allocation28_spill] sm:$0xff] %v9042_v39  ;;  %2138 = vmatmul.bf16.gmra.mxu2 %v8966_v59  ;;  %v1085_v59 = vunpack.c.l.b16 %v563_v60  ;;  %v919_v60 = vshrl.u32 %v8635_v40, 16 }
 0x13c   : > { %2039 = vmatmul.bf16.gmra.mxu1 %v820_v32  ;;  %11294 = vst [vmem:[#allocation30_spill] sm:$0xff] %v9055_v3  ;;  %v11248_v32 = vunpack.c.h.b16 %v8638_v41 }
 0x13d   : > { %2237 = vmatmul.bf16.gmra.mxu3 %v910_v48 }
 0x13e   : > { %v2099_v27 = vpop.f32.mrf.mxu2 }
 0x13f   : > { %v2100_v56 = vadd.f32 %v2099_v27, %v2001_v42  ;;  %v1903_v7 = vpop.f32.mrf.mxu0  ;;  %v8272_v27 = vor.u32 %v8273_v54, %v8271_v50 }
 0x140   : > { %v2198_v15 = vpop.f32.mrf.mxu3  ;;  %v1904_v6 = vadd.f32 %v8756_v55, %v1903_v7 }
 0x141   : > { %v9049_v36 = vadd.f32 %v2198_v15, %v2100_v56  ;;  %v2002_v23 = vpop.f32.mrf.mxu1  ;;  %v823_v56 = vor.u32 %v9055_v3, %v819_v46  ;;  %v1089_v15 = vpack.c.b16 %v11248_v32, %v1085_v59  ;;  %v1023_v46 = vunpack.c.l.b16 %v562_v12 }
 0x142   : > { %v2003_v0 = vadd.f32 %v2002_v23, %v1904_v6 }
 0x143   : > { %11293 = vst [vmem:[#allocation29_spill] sm:$0xff] %v9049_v36  ;;  %v1106_v50 = vshrl.u32 %v1089_v15, 16  ;;  %v1109_v54 = vshll.u32 %v1089_v15, 16 }
 0x146   : > { %v2101_v30 = vpop.f32.mrf.mxu2 }
 0x147   : > { %v2102_v48 = vadd.f32 %v2101_v30, %v2003_v0  ;;  %v1906_v39 = vpop.f32.mrf.mxu0  ;;  %v922_v0 = vshll.u32 %v8635_v40, 16 }
 0x148   : > { %v2200_v42 = vpop.f32.mrf.mxu3  ;;  %v1907_v7 = vadd.f32 %v8756_v55, %v1906_v39 }
 0x149   : > { %v9062_v6 = vadd.f32 %v2200_v42, %v2102_v48  ;;  %v2005_v23 = vpop.f32.mrf.mxu1  ;;  %v921_v48 = vrot.slane %v919_v60, 1  ;;  %v924_v42 = vrot.slane %v922_v0, 2  ;;  %v1029_v60 = vrot.slane %v8661_v57, 2 }
 0x14a   : > { %v2006_v36 = vadd.f32 %v2005_v23, %v1907_v7  ;;  %1945 = vmatmul.bf16.gmra.mxu0 %v8272_v27  ;;  %v11296_v7 = vunpack.c.h.b16 %v8602_v21  ;;  %v1108_v23 = vrot.slane %v1106_v50, 2  ;;  %v1092_v0 = vrot.slane %v1089_v15, 2 }
 0x14b   : > { %11295 = vst [vmem:[#allocation31_spill] sm:$0xff] %v9062_v6  ;;  %2143 = vmatmul.bf16.gmra.mxu2 %v8944_v29  ;;  %v1111_v29 = vrot.slane %v1109_v54, 3 }
 0x14c   : > { %2044 = vmatmul.bf16.gmra.mxu1 %v823_v56  ;;  %v1024_v27 = vpack.c.b16 %v11296_v7, %v1023_v46  ;;  %v1114_v56 = vrot.slane %v8672_v1, 3  ;;  %v1027_v46 = vrot.slane %v8638_v41, 2 }
 0x14d   : > { %2242 = vmatmul.bf16.gmra.mxu3 %v909_v51  ;;  %v1113_v51 = vrot.slane %v8685_v8, 2  ;;  %v1112_v50 = vor.u32 %v1111_v29, %v1108_v23 }
 0x14e   : > { %v2104_v59 = vpop.f32.mrf.mxu2  ;;  %v1026_v21 = vrot.slane %v1024_v27, 2 }
 0x14f   : > { %v2105_v30 = vadd.f32 %v2104_v59, %v2006_v36  ;;  %v1908_v32 = vpop.f32.mrf.mxu0  ;;  %v925_v36 = vor.u32 %v924_v42, %v921_v48  ;;  %v1115_v54 = vor.u32 %v1114_v56, %v1113_v51 }
 0x150   : > { %v2203_v39 = vpop.f32.mrf.mxu3  ;;  %v1909_v6 = vadd.f32 %v8756_v55, %v1908_v32  ;;  %v1028_v15 = vsel %vm1025_vm3, %v1026_v21, %v1027_v46 }
 0x151   : > { %v9071_v3 = vadd.f32 %v2203_v39, %v2105_v30  ;;  %v2007_v40 = vpop.f32.mrf.mxu1  ;;  %v929_v7 = vsel %vm917_vm2, %v925_v36, %v9039_v47  ;;  %v1116_v27 = vsel %vm1104_vm4, %v1112_v50, %v1115_v54  ;;  %v931_v36 = vrot.slane %v8672_v1, 2 }
 0x152   : > { %v2008_v12 = vadd.f32 %v2007_v40, %v1909_v6  ;;  %v1093_v6 = vsel %vm1025_vm3, %v1092_v0, %v1029_v60  ;;  %v1117_v50 = vrot.slane %v8700_v16, 2 }
 0x156   : > { %v2106_v32 = vpop.f32.mrf.mxu2 }
 0x157   : > { %v2107_v59 = vadd.f32 %v2106_v32, %v2008_v12  ;;  %v1911_v39 = vpop.f32.mrf.mxu0  ;;  %v930_v12 = vrot.slane %v8685_v8, 1 }
 0x158   : > { %v2205_v30 = vpop.f32.mrf.mxu3  ;;  %v1912_v48 = vadd.f32 %v8756_v55, %v1911_v39 }
 0x159   : > { %v9081_v42 = vadd.f32 %v2205_v30, %v2107_v59  ;;  %v2010_v57 = vpop.f32.mrf.mxu1  ;;  %v1118_v59 = vrot.slane %v8688_v9, 3  ;;  %v932_v39 = vor.u32 %v931_v36, %v930_v12 }
 0x15a   : > { %v2011_v23 = vadd.f32 %v2010_v57, %v1912_v48  ;;  %2256 = vmatmul.bf16.vlgmr.msrb.gmra.mxu0 %v929_v7  ;;  %v1031_v7 = vrot.slane %v8675_v2, 2 }
 0x15b   : > { %2454 = vmatmul.bf16.vlgmr.msrb.gmra.mxu2 %v1093_v6  ;;  %v1119_v6 = vor.u32 %v1118_v59, %v1117_v50  ;;  %v933_v1 = vsel %vm917_vm2, %v9039_v47, %v932_v39  ;;  %v935_v50 = vrot.slane %v8688_v9, 2 }
 0x15c   : > { %2355 = vmatmul.bf16.vlgmr.msrb.gmra.mxu1 %v1028_v15 }
 0x15d   : > { %2553 = vmatmul.bf16.vlgmr.msrb.gmra.mxu3 %v1116_v27  ;;  %v1032_v27 = vsel %vm1025_vm3, %v1029_v60, %v1031_v7 }
 0x15e   : > { %v2109_v29 = vpop.f32.mrf.mxu2 }
 0x15f   : > { %v2110_v40 = vadd.f32 %v2109_v29, %v2011_v23  ;;  %v1913_v56 = vpop.f32.mrf.mxu0 }
 0x160   : > { %v2208_v51 = vpop.f32.mrf.mxu3  ;;  %v1914_v0 = vadd.f32 %v8756_v55, %v1913_v56  ;;  %v1120_v56 = vsel %vm1104_vm4, %v1115_v54, %v1119_v6  ;;  %v1122_v54 = vrot.slane %v8703_v17, 3 }
 0x161   : > { %v9088_v32 = vadd.f32 %v2208_v51, %v2110_v40  ;;  %v2012_v21 = vpop.f32.mrf.mxu1  ;;  %v1030_v51 = vsel %vm1025_vm3, %v1027_v46, %v1029_v60  ;;  %v1121_v46 = vrot.slane %v8715_v25, 2 }
 0x162   : > { %v2013_v30 = vadd.f32 %v2012_v21, %v1914_v0  ;;  %v934_v21 = vrot.slane %v8700_v16, 1 }
 0x166   : > { %v2111_v48 = vpop.f32.mrf.mxu2 }
 0x167   : > { %v2112_v57 = vadd.f32 %v2111_v48, %v2013_v30  ;;  %v1916_v8 = vpop.f32.mrf.mxu0 }
 0x168   : > { %v2210_v15 = vpop.f32.mrf.mxu3  ;;  %v1917_v23 = vadd.f32 %v8756_v55, %v1916_v8  ;;  %v1123_v8 = vor.u32 %v1122_v54, %v1121_v46  ;;  %v1126_v54 = vrot.slane %v8718_v26, 3 }
 0x169   : > { %v9097_v29 = vadd.f32 %v2210_v15, %v2112_v57  ;;  %v2015_v40 = vpop.f32.mrf.mxu1  ;;  %v936_v57 = vor.u32 %v935_v50, %v934_v21  ;;  %v1033_v15 = vrot.slane %v8691_v10, 2 }
 0x16a   : > { %v2016_v2 = vadd.f32 %v2015_v40, %v1917_v23  ;;  %2261 = vmatmul.bf16.gmra.mxu0 %v933_v1 }
 0x16b   : > { %2459 = vmatmul.bf16.gmra.mxu2 %v1032_v27  ;;  %v937_v9 = vsel %vm917_vm2, %v932_v39, %v936_v57  ;;  %v938_v39 = vrot.slane %v8715_v25, 1 }
 0x16c   : > { %2360 = vmatmul.bf16.gmra.mxu1 %v1030_v51  ;;  %v1034_v51 = vsel %vm1025_vm3, %v1031_v7, %v1033_v15  ;;  %v939_v7 = vrot.slane %v8703_v17, 2 }
 0x16d   : > { %2558 = vmatmul.bf16.gmra.mxu3 %v1120_v56 }
 0x16e   : > { %v2114_v12 = vpop.f32.mrf.mxu2 }
 0x16f   : > { %v2115_v36 = vadd.f32 %v2114_v12, %v2016_v2  ;;  %v1918_v47 = vpop.f32.mrf.mxu0 }
 0x170   : > { %v2213_v0 = vpop.f32.mrf.mxu3  ;;  %v1919_v59 = vadd.f32 %v8756_v55, %v1918_v47 }
 0x171   : > { %v9104_v30 = vadd.f32 %v2213_v0, %v2115_v36  ;;  %v2017_v60 = vpop.f32.mrf.mxu1  ;;  %v1124_v36 = vsel %vm1104_vm4, %v1119_v6, %v1123_v8  ;;  %v1125_v6 = vrot.slane %v8727_v34, 2 }
 0x172   : > { %v2018_v48 = vadd.f32 %v2017_v60, %v1919_v59 }
 0x176   : > { %v2116_v1 = vpop.f32.mrf.mxu2 }
 0x177   : > { %v2117_v23 = vadd.f32 %v2116_v1, %v2018_v48  ;;  %v1921_v16 = vpop.f32.mrf.mxu0  ;;  %v1035_v1 = vrot.slane %v8706_v18, 2 }
 0x178   : > { %v2215_v40 = vpop.f32.mrf.mxu3  ;;  %v1922_v56 = vadd.f32 %v8756_v55, %v1921_v16 }
 0x179   : > { %v9112_v2 = vadd.f32 %v2215_v40, %v2117_v23  ;;  %v2020_v12 = vpop.f32.mrf.mxu1  ;;  %v1127_v23 = vor.u32 %v1126_v54, %v1125_v6  ;;  %v1130_v6 = vrot.slane %v8729_v35, 3 }
 0x17a   : > { %v2021_v0 = vadd.f32 %v2020_v12, %v1922_v56  ;;  %2266 = vmatmul.bf16.gmra.mxu0 %v937_v9  ;;  %v1036_v56 = vsel %vm1025_vm3, %v1033_v15, %v1035_v1  ;;  %v943_v15 = vrot.slane %v8718_v26, 2 }
 0x17b   : > { %2464 = vmatmul.bf16.gmra.mxu2 %v1034_v51 }
 0x17c   : > { %2365 = vmatmul.bf16.gmra.mxu1 %v1032_v27  ;;  %v940_v27 = vor.u32 %v939_v7, %v938_v39 }
 0x17d   : > { %2563 = vmatmul.bf16.gmra.mxu3 %v1124_v36 }
 0x17e   : > { %v2119_v10 = vpop.f32.mrf.mxu2  ;;  %v941_v17 = vsel %vm917_vm2, %v936_v57, %v940_v27  ;;  %v942_v57 = vrot.slane %v8727_v34, 1 }
 0x17f   : > { %v2120_v47 = vadd.f32 %v2119_v10, %v2021_v0  ;;  %v1923_v50 = vpop.f32.mrf.mxu0  ;;  %v1128_v10 = vsel %vm1104_vm4, %v1123_v8, %v1127_v23  ;;  %v1129_v8 = vrot.slane %v8737_v44, 2 }
 0x180   : > { %v2218_v21 = vpop.f32.mrf.mxu3  ;;  %v1924_v59 = vadd.f32 %v8756_v55, %v1923_v50 }
 0x181   : > { %v9118_v60 = vadd.f32 %v2218_v21, %v2120_v47  ;;  %v2022_v46 = vpop.f32.mrf.mxu1 }
 0x182   : > { %v2023_v48 = vadd.f32 %v2022_v46, %v1924_v59 }
 0x186   : > { %v2121_v40 = vpop.f32.mrf.mxu2 }
 0x187   : > { %v2122_v16 = vadd.f32 %v2121_v40, %v2023_v48  ;;  %v1926_v25 = vpop.f32.mrf.mxu0  ;;  %v9137_v48 = vld [vmem:[%s8586_s15 + $0x38] sm:$0xff] }
 0x188   : > { %v2220_v9 = vpop.f32.mrf.mxu3  ;;  %v1927_v12 = vadd.f32 %v8756_v55, %v1926_v25  ;;  %v1037_v40 = vrot.slane %v9137_v48, 2 }
 0x189   : > { %v9126_v36 = vadd.f32 %v2220_v9, %v2122_v16  ;;  %v2025_v0 = vpop.f32.mrf.mxu1  ;;  %v1131_v16 = vor.u32 %v1130_v6, %v1129_v8  ;;  %v1134_v6 = vrot.slane %v8739_v45, 3 }
 0x18a   : > { %v2026_v47 = vadd.f32 %v2025_v0, %v1927_v12  ;;  %2271 = vmatmul.bf16.gmra.mxu0 %v941_v17  ;;  %v1038_v12 = vsel %vm1025_vm3, %v1035_v1, %v1037_v40  ;;  %v947_v1 = vrot.slane %v8729_v35, 2 }
 0x18b   : > { %2469 = vmatmul.bf16.gmra.mxu2 %v1036_v56 }
 0x18c   : > { %2370 = vmatmul.bf16.gmra.mxu1 %v1034_v51  ;;  %v944_v51 = vor.u32 %v943_v15, %v942_v57 }
 0x18d   : > { %2568 = vmatmul.bf16.gmra.mxu3 %v1128_v10 }
 0x18e   : > { %v2124_v18 = vpop.f32.mrf.mxu2  ;;  %v945_v17 = vsel %vm917_vm2, %v940_v27, %v944_v51  ;;  %v946_v27 = vrot.slane %v8737_v44, 1 }
 0x18f   : > { %v2125_v21 = vadd.f32 %v2124_v18, %v2026_v47  ;;  %v1928_v39 = vpop.f32.mrf.mxu0  ;;  %v1132_v18 = vsel %vm1104_vm4, %v1127_v23, %v1131_v16  ;;  %v1133_v23 = vrot.slane %v8746_v52, 2 }
 0x190   : > { %v2223_v50 = vpop.f32.mrf.mxu3  ;;  %v1929_v7 = vadd.f32 %v8756_v55, %v1928_v39 }
 0x191   : > { %v9132_v59 = vadd.f32 %v2223_v50, %v2125_v21  ;;  %v2027_v46 = vpop.f32.mrf.mxu1 }
 0x192   : > { %v2028_v54 = vadd.f32 %v2027_v46, %v1929_v7 }
 0x196   : > { %v2126_v9 = vpop.f32.mrf.mxu2 }
 0x197   : > { %v2127_v34 = vadd.f32 %v2126_v9, %v2028_v54  ;;  %v1931_v26 = vpop.f32.mrf.mxu0  ;;  %v9154_v9 = vld [vmem:[%s8586_s15 + $0x40] sm:$0xff] }
 0x198   : > { %v2225_v25 = vpop.f32.mrf.mxu3  ;;  %v1932_v0 = vadd.f32 %v8756_v55, %v1931_v26 }
 0x199   : > { %v9143_v10 = vadd.f32 %v2225_v25, %v2127_v34  ;;  %v2030_v47 = vpop.f32.mrf.mxu1  ;;  %v1039_v34 = vrot.slane %v9154_v9, 2  ;;  %v1135_v25 = vor.u32 %v1134_v6, %v1133_v23 }
 0x19a   : > { %v2031_v21 = vadd.f32 %v2030_v47, %v1932_v0  ;;  %2276 = vmatmul.bf16.gmra.mxu0 %v945_v17  ;;  %v9162_v47 = vld [vmem:[%s11215_s2] ss:$0 sm:$0xff] }
 0x19b   : > { %2474 = vmatmul.bf16.gmra.mxu2 %v1038_v12  ;;  %v1040_v0 = vsel %vm1025_vm3, %v1037_v40, %v1039_v34 }
 0x19c   : > { %2375 = vmatmul.bf16.gmra.mxu1 %v1036_v56  ;;  %v948_v56 = vor.u32 %v947_v1, %v946_v27  ;;  %v950_v1 = vrot.slane %v8746_v52, 1 }
 0x19d   : > { %2573 = vmatmul.bf16.gmra.mxu3 %v1132_v18 }
 0x19e   : > { %v2129_v50 = vpop.f32.mrf.mxu2 }
 0x19f   : > { %v2130_v39 = vadd.f32 %v2129_v50, %v2031_v21  ;;  %v1933_v15 = vpop.f32.mrf.mxu0 }
 0x1a0   : > { %v2228_v57 = vpop.f32.mrf.mxu3  ;;  %v1934_v7 = vadd.f32 %v8756_v55, %v1933_v15  ;;  %v949_v55 = vsel %vm917_vm2, %v944_v51, %v948_v56 }
 0x1a1   : > { %v9149_v46 = vadd.f32 %v2228_v57, %v2130_v39  ;;  %v2032_v8 = vpop.f32.mrf.mxu1  ;;  %v1136_v39 = vsel %vm1104_vm4, %v1131_v16, %v1135_v25  ;;  %v1137_v16 = vrot.slane %v8767_v19, 2 }
 0x1a2   : > { %v2033_v54 = vadd.f32 %v2032_v8, %v1934_v7  ;;  %v951_v7 = vrot.slane %v8739_v45, 2 }
 0x1a6   : > { %v2131_v26 = vpop.f32.mrf.mxu2 }
 0x1a7   : > { %v2132_v44 = vadd.f32 %v2131_v26, %v2033_v54  ;;  %v1936_v35 = vpop.f32.mrf.mxu0  ;;  %v1138_v54 = vrot.slane %v8748_v53, 3 }
 0x1a8   : > { %v2230_v17 = vpop.f32.mrf.mxu3  ;;  %v1937_v18 = vadd.f32 %v9162_v47, %v1936_v35 }
 0x1a9   : > { %v9165_v21 = vadd.f32 %v2230_v17, %v2132_v44  ;;  %v2035_v50 = vpop.f32.mrf.mxu1  ;;  %v9176_v44 = vld [vmem:[%s8586_s15 + $0x48] sm:$0xff]  ;;  %v1139_v35 = vor.u32 %v1138_v54, %v1137_v16 }
 0x1aa   : > { %v2036_v57 = vadd.f32 %v2035_v50, %v1937_v18  ;;  %2281 = vmatmul.bf16.gmra.mxu0 %v949_v55  ;;  %v1041_v17 = vrot.slane %v9176_v44, 2 }
 0x1ab   : > { %2479 = vmatmul.bf16.gmra.mxu2 %v1040_v0 }
 0x1ac   : > { %2380 = vmatmul.bf16.gmra.mxu1 %v1038_v12  ;;  %v952_v12 = vor.u32 %v951_v7, %v950_v1 }
 0x1ad   : > { %2578 = vmatmul.bf16.gmra.mxu3 %v1136_v39  ;;  %v1042_v39 = vsel %vm1025_vm3, %v1039_v34, %v1041_v17  ;;  %v955_v34 = vrot.slane %v8748_v53, 2 }
 0x1ae   : > { %v2134_v51 = vpop.f32.mrf.mxu2  ;;  %v953_v50 = vsel %vm917_vm2, %v948_v56, %v952_v12  ;;  %v954_v56 = vrot.slane %v8767_v19, 1 }
 0x1af   : > { %v2135_v40 = vadd.f32 %v2134_v51, %v2036_v57  ;;  %v1938_v27 = vpop.f32.mrf.mxu0 }
 0x1b0   : > { %v2233_v15 = vpop.f32.mrf.mxu3  ;;  %v1939_v8 = vadd.f32 %v9162_v47, %v1938_v27 }
 0x1b1   : > { %v9171_v23 = vadd.f32 %v2233_v15, %v2135_v40  ;;  %v2037_v6 = vpop.f32.mrf.mxu1  ;;  %v1140_v15 = vsel %vm1104_vm4, %v1135_v25, %v1139_v35  ;;  %v1141_v25 = vrot.slane %v8787_v61, 2 }
 0x1b2   : > { %v2038_v26 = vadd.f32 %v2037_v6, %v1939_v8 }
 0x1b6   : > { %v2136_v55 = vpop.f32.mrf.mxu2 }
 0x1b7   : > { %v2137_v52 = vadd.f32 %v2136_v55, %v2038_v26  ;;  %v1941_v45 = vpop.f32.mrf.mxu0  ;;  %v1142_v55 = vrot.slane %v8770_v20, 3 }
 0x1b8   : > { %v2235_v18 = vpop.f32.mrf.mxu3  ;;  %v1942_v57 = vadd.f32 %v9162_v47, %v1941_v45 }
 0x1b9   : > { %v9182_v51 = vadd.f32 %v2235_v18, %v2137_v52  ;;  %v2040_v40 = vpop.f32.mrf.mxu1  ;;  %v9193_v18 = vld [vmem:[%s8586_s15 + $0x50] sm:$0xff] }
 0x1ba   : > { %v2041_v27 = vadd.f32 %v2040_v40, %v1942_v57  ;;  %2286 = vmatmul.bf16.gmra.mxu0 %v953_v50  ;;  %v1043_v45 = vrot.slane %v9193_v18, 2  ;;  %v1143_v50 = vor.u32 %v1142_v55, %v1141_v25 }
 0x1bb   : > { %2484 = vmatmul.bf16.gmra.mxu2 %v1042_v39 }
 0x1bc   : > { %2385 = vmatmul.bf16.gmra.mxu1 %v1040_v0  ;;  %v956_v0 = vor.u32 %v955_v34, %v954_v56 }
 0x1bd   : > { %2583 = vmatmul.bf16.gmra.mxu3 %v1140_v15 }
 0x1be   : > { %v2139_v1 = vpop.f32.mrf.mxu2  ;;  %v957_v15 = vsel %vm917_vm2, %v952_v12, %v956_v0  ;;  %v958_v12 = vrot.slane %v8787_v61, 1 }
 0x1bf   : > { %v2140_v7 = vadd.f32 %v2139_v1, %v2041_v27  ;;  %v1943_v6 = vpop.f32.mrf.mxu0  ;;  %v1044_v27 = vsel %vm1025_vm3, %v1041_v17, %v1043_v45  ;;  %v959_v17 = vrot.slane %v8770_v20, 2 }
 0x1c0   : > { %v2238_v8 = vpop.f32.mrf.mxu3  ;;  %v1944_v16 = vadd.f32 %v9162_v47, %v1943_v6  ;;  %v1144_v6 = vsel %vm1104_vm4, %v1139_v35, %v1143_v50  ;;  %v1145_v35 = vrot.slane %v8808_v43, 2 }
 0x1c1   : > { %v9188_v54 = vadd.f32 %v2238_v8, %v2140_v7  ;;  %v2042_v26 = vpop.f32.mrf.mxu1 }
 0x1c2   : > { %v2043_v52 = vadd.f32 %v2042_v26, %v1944_v16 }
 0x1c6   : > { %v2141_v57 = vpop.f32.mrf.mxu2 }
 0x1c7   : > { %v2142_v19 = vadd.f32 %v2141_v57, %v2043_v52  ;;  %v1946_v53 = vpop.f32.mrf.mxu0 }
 0x1c8   : > { %v2240_v40 = vpop.f32.mrf.mxu3  ;;  %v1947_v1 = vadd.f32 %v9162_v47, %v1946_v53  ;;  %v9210_v53 = vld [vmem:[%s8586_s15 + $0x58] sm:$0xff] }
 0x1c9   : > { %v9199_v7 = vadd.f32 %v2240_v40, %v2142_v19  ;;  %v2045_v8 = vpop.f32.mrf.mxu1  ;;  %v1146_v19 = vrot.slane %v8790_v62, 3 }
 0x1ca   : > { %v2046_v56 = vadd.f32 %v2045_v8, %v1947_v1  ;;  %2291 = vmatmul.bf16.gmra.mxu0 %v957_v15  ;;  %v1045_v15 = vrot.slane %v9210_v53, 2 }
 0x1cb   : > { %2489 = vmatmul.bf16.gmra.mxu2 %v1044_v27  ;;  %v1147_v1 = vor.u32 %v1146_v19, %v1145_v35 }
 0x1cc   : > { %2390 = vmatmul.bf16.gmra.mxu1 %v1042_v39  ;;  %v960_v39 = vor.u32 %v959_v17, %v958_v12 }
 0x1cd   : > { %2588 = vmatmul.bf16.gmra.mxu3 %v1144_v6 }
 0x1ce   : > { %v2144_v34 = vpop.f32.mrf.mxu2 }
 0x1cf   : > { %v2145_v16 = vadd.f32 %v2144_v34, %v2046_v56  ;;  %v1948_v25 = vpop.f32.mrf.mxu0  ;;  %v1046_v56 = vsel %vm1025_vm3, %v1043_v45, %v1045_v15  ;;  %v963_v45 = vrot.slane %v8790_v62, 2 }
 0x1d0   : > { %v2243_v26 = vpop.f32.mrf.mxu3  ;;  %v1949_v55 = vadd.f32 %v9162_v47, %v1948_v25  ;;  %v961_v47 = vsel %vm917_vm2, %v956_v0, %v960_v39  ;;  %v1148_v25 = vsel %vm1104_vm4, %v1143_v50, %v1147_v1  ;;  %v962_v0 = vrot.slane %v8808_v43, 1 }
 0x1d1   : > { %v9205_v52 = vadd.f32 %v2243_v26, %v2145_v16  ;;  %v2047_v57 = vpop.f32.mrf.mxu1  ;;  %v1149_v50 = vrot.slane %v8829_v33, 2 }
 0x1d2   : > { %v2048_v40 = vadd.f32 %v2047_v57, %v1949_v55 }
 0x1d6   : > { %v2146_v8 = vpop.f32.mrf.mxu2 }
 0x1d7   : > { %v2147_v61 = vadd.f32 %v2146_v8, %v2048_v40  ;;  %v2257_v20 = vpop.f32.mrf.mxu0  ;;  %v1150_v8 = vrot.slane %v8811_v28, 3 }
 0x1d8   : > { %v2245_v6 = vpop.f32.mrf.mxu3  ;;  %v2258_v16 = vadd.f32 %v2257_v20, %v8765_v14 }
 0x1d9   : > { %v9215_v34 = vadd.f32 %v2245_v6, %v2147_v61  ;;  %v2356_v26 = vpop.f32.mrf.mxu1  ;;  %v9227_v6 = vld [vmem:[%s8586_s15 + $0x60] sm:$0xff] }
 0x1da   : > { %v2357_v12 = vadd.f32 %v2356_v26, %v2258_v16  ;;  %2296 = vmatmul.bf16.gmra.mxu0 %v961_v47  ;;  %v1047_v20 = vrot.slane %v9227_v6, 2  ;;  %v1151_v47 = vor.u32 %v1150_v8, %v1149_v50 }
 0x1db   : > { %2494 = vmatmul.bf16.gmra.mxu2 %v1046_v56 }
 0x1dc   : > { %2395 = vmatmul.bf16.gmra.mxu1 %v1044_v27  ;;  %v964_v27 = vor.u32 %v963_v45, %v962_v0 }
 0x1dd   : > { %2593 = vmatmul.bf16.gmra.mxu3 %v1148_v25  ;;  %v1048_v25 = vsel %vm1025_vm3, %v1045_v15, %v1047_v20  ;;  %v967_v15 = vrot.slane %v8811_v28, 2 }
 0x1de   : > { %v2455_v17 = vpop.f32.mrf.mxu2 }
 0x1df   : > { %v2456_v55 = vadd.f32 %v2455_v17, %v2357_v12  ;;  %v2259_v35 = vpop.f32.mrf.mxu0 }
 0x1e0   : > { %v2554_v57 = vpop.f32.mrf.mxu3  ;;  %v2260_v19 = vadd.f32 %v2259_v35, %v8779_v37  ;;  %v965_v37 = vsel %vm917_vm2, %v960_v39, %v964_v27  ;;  %v966_v39 = vrot.slane %v8829_v33, 1 }
 0x1e1   : > { %v9222_v14 = vadd.f32 %v2554_v57, %v2456_v55  ;;  %v2358_v40 = vpop.f32.mrf.mxu1  ;;  %v1152_v57 = vsel %vm1104_vm4, %v1147_v1, %v1151_v47  ;;  %v1153_v1 = vrot.slane %v8850_v24, 2 }
 0x1e2   : > { %v2359_v61 = vadd.f32 %v2358_v40, %v2260_v19 }
 0x1e6   : > { %v2457_v16 = vpop.f32.mrf.mxu2 }
 0x1e7   : > { %v2458_v43 = vadd.f32 %v2457_v16, %v2359_v61  ;;  %v2262_v62 = vpop.f32.mrf.mxu0  ;;  %v1154_v61 = vrot.slane %v8832_v4, 3 }
 0x1e8   : > { %v2556_v26 = vpop.f32.mrf.mxu3  ;;  %v2263_v12 = vadd.f32 %v2262_v62, %v8784_v58 }
 0x1e9   : > { %v9233_v17 = vadd.f32 %v2556_v26, %v2458_v43  ;;  %v2361_v55 = vpop.f32.mrf.mxu1  ;;  %v9244_v43 = vld [vmem:[%s8586_s15 + $0x68] sm:$0xff]  ;;  %v1155_v62 = vor.u32 %v1154_v61, %v1153_v1  ;;  %v1158_v61 = vrot.slane %v8853_v49, 3 }
 0x1ea   : > { %v2362_v35 = vadd.f32 %v2361_v55, %v2263_v12  ;;  %2301 = vmatmul.bf16.gmra.mxu0 %v965_v37  ;;  %v1049_v26 = vrot.slane %v9244_v43, 2 }
 0x1eb   : > { %2499 = vmatmul.bf16.gmra.mxu2 %v1048_v25 }
 0x1ec   : > { %2400 = vmatmul.bf16.gmra.mxu1 %v1046_v56  ;;  %v968_v56 = vor.u32 %v967_v15, %v966_v39  ;;  %v1050_v55 = vsel %vm1025_vm3, %v1047_v20, %v1049_v26  ;;  %v971_v20 = vrot.slane %v8832_v4, 2 }
 0x1ed   : > { %2598 = vmatmul.bf16.gmra.mxu3 %v1152_v57 }
 0x1ee   : > { %v2460_v0 = vpop.f32.mrf.mxu2 }
 0x1ef   : > { %v2461_v45 = vadd.f32 %v2460_v0, %v2362_v35  ;;  %v2264_v40 = vpop.f32.mrf.mxu0 }
 0x1f0   : > { %v2559_v19 = vpop.f32.mrf.mxu3  ;;  %v2265_v58 = vadd.f32 %v2264_v40, %v8799_v13  ;;  %v969_v13 = vsel %vm917_vm2, %v964_v27, %v968_v56  ;;  %v970_v27 = vrot.slane %v8850_v24, 1 }
 0x1f1   : > { %v9239_v50 = vadd.f32 %v2559_v19, %v2461_v45  ;;  %v2363_v8 = vpop.f32.mrf.mxu1  ;;  %v1156_v45 = vsel %vm1104_vm4, %v1151_v47, %v1155_v62  ;;  %v1157_v47 = vrot.slane %v8871_v11, 2 }
 0x1f2   : > { %v2364_v16 = vadd.f32 %v2363_v8, %v2265_v58 }
 0x1f6   : > { %v2462_v37 = vpop.f32.mrf.mxu2 }
 0x1f7   : > { %v2463_v33 = vadd.f32 %v2462_v37, %v2364_v16  ;;  %v2267_v28 = vpop.f32.mrf.mxu0  ;;  %v9261_v37 = vld [vmem:[%s8586_s15 + $0x70] sm:$0xff] }
 0x1f8   : > { %v2561_v12 = vpop.f32.mrf.mxu3  ;;  %v2268_v57 = vadd.f32 %v2267_v28, %v8805_v38 }
 0x1f9   : > { %v9250_v35 = vadd.f32 %v2561_v12, %v2463_v33  ;;  %v2366_v0 = vpop.f32.mrf.mxu1  ;;  %v1051_v33 = vrot.slane %v9261_v37, 2  ;;  %v1159_v12 = vor.u32 %v1158_v61, %v1157_v47  ;;  %v11297_v47 = vld [vmem:[#allocation20_spill] sm:$0xff] }
 0x1fa   : > { %v2367_v19 = vadd.f32 %v2366_v0, %v2268_v57  ;;  %2306 = vmatmul.bf16.gmra.mxu0 %v969_v13  ;;  %v1162_v61 = vrot.slane %v11297_v47, 3 }
 0x1fb   : > { %2504 = vmatmul.bf16.gmra.mxu2 %v1050_v55  ;;  %v1052_v57 = vsel %vm1025_vm3, %v1049_v26, %v1051_v33  ;;  %v975_v26 = vrot.slane %v8853_v49, 2 }
 0x1fc   : > { %2405 = vmatmul.bf16.gmra.mxu1 %v1048_v25  ;;  %v972_v25 = vor.u32 %v971_v20, %v970_v27 }
 0x1fd   : > { %2603 = vmatmul.bf16.gmra.mxu3 %v1156_v45 }
 0x1fe   : > { %v2465_v40 = vpop.f32.mrf.mxu2 }
 0x1ff   : > { %v2466_v39 = vadd.f32 %v2465_v40, %v2367_v19  ;;  %v2269_v58 = vpop.f32.mrf.mxu0  ;;  %v1160_v40 = vsel %vm1104_vm4, %v1155_v62, %v1159_v12  ;;  %v1161_v62 = vrot.slane %v8912_v22, 2 }
 0x200   : > { %v2564_v15 = vpop.f32.mrf.mxu3  ;;  %v2270_v38 = vadd.f32 %v2269_v58, %v8820_v5  ;;  %v973_v5 = vsel %vm917_vm2, %v968_v56, %v972_v25  ;;  %v974_v56 = vrot.slane %v8871_v11, 1 }
 0x201   : > { %v9256_v8 = vadd.f32 %v2564_v15, %v2466_v39  ;;  %v2368_v1 = vpop.f32.mrf.mxu1 }
 0x202   : > { %v2369_v16 = vadd.f32 %v2368_v1, %v2270_v38 }
 0x206   : > { %v2467_v28 = vpop.f32.mrf.mxu2 }
 0x207   : > { %v2468_v24 = vadd.f32 %v2467_v28, %v2369_v16  ;;  %v2272_v4 = vpop.f32.mrf.mxu0  ;;  %v9278_v28 = vld [vmem:[%s8586_s15 + $0x78] sm:$0xff] }
 0x208   : > { %v2566_v13 = vpop.f32.mrf.mxu3  ;;  %v2273_v0 = vadd.f32 %v2272_v4, %v8826_v31 }
 0x209   : > { %v9267_v45 = vadd.f32 %v2566_v13, %v2468_v24  ;;  %v2371_v19 = vpop.f32.mrf.mxu1  ;;  %v1053_v24 = vrot.slane %v9278_v28, 2  ;;  %v1163_v13 = vor.u32 %v1162_v61, %v1161_v62 }
 0x20a   : > { %v2372_v39 = vadd.f32 %v2371_v19, %v2273_v0  ;;  %2311 = vmatmul.bf16.gmra.mxu0 %v973_v5  ;;  %v11298_v19 = vld [vmem:[#allocation17_spill] sm:$0xff] }
 0x20b   : > { %2509 = vmatmul.bf16.gmra.mxu2 %v1052_v57  ;;  %v1054_v0 = vsel %vm1025_vm3, %v1051_v33, %v1053_v24  ;;  %v979_v33 = vrot.slane %v11297_v47, 2 }
 0x20c   : > { %2410 = vmatmul.bf16.gmra.mxu1 %v1050_v55  ;;  %v976_v55 = vor.u32 %v975_v26, %v974_v56 }
 0x20d   : > { %2608 = vmatmul.bf16.gmra.mxu3 %v1160_v40 }
 0x20e   : > { %v2470_v15 = vpop.f32.mrf.mxu2 }
 0x20f   : > { %v2471_v58 = vadd.f32 %v2470_v15, %v2372_v39  ;;  %v2274_v20 = vpop.f32.mrf.mxu0 }
 0x210   : > { %v2569_v27 = vpop.f32.mrf.mxu3  ;;  %v2275_v31 = vadd.f32 %v2274_v20, %v8841_v63  ;;  %v977_v63 = vsel %vm917_vm2, %v972_v25, %v976_v55  ;;  %v978_v25 = vrot.slane %v8912_v22, 1 }
 0x211   : > { %v9273_v38 = vadd.f32 %v2569_v27, %v2471_v58  ;;  %v2373_v1 = vpop.f32.mrf.mxu1  ;;  %v1164_v58 = vsel %vm1104_vm4, %v1159_v12, %v1163_v13  ;;  %v11300_v12 = vld [vmem:[#allocation25_spill] sm:$0xff] }
 0x212   : > { %v2374_v16 = vadd.f32 %v2373_v1, %v2275_v31  ;;  %v11299_v1 = vld [vmem:[#allocation18_spill] sm:$0xff] }
 0x216   : > { %v2472_v4 = vpop.f32.mrf.mxu2 }
 0x217   : > { %v2473_v11 = vadd.f32 %v2472_v4, %v2374_v16  ;;  %v2277_v49 = vpop.f32.mrf.mxu0  ;;  %v1165_v4 = vrot.slane %v11300_v12, 2 }
 0x218   : > { %v2571_v5 = vpop.f32.mrf.mxu3  ;;  %v2278_v40 = vadd.f32 %v2277_v49, %v11298_v19 }
 0x219   : > { %v9284_v39 = vadd.f32 %v2571_v5, %v2473_v11  ;;  %v2376_v15 = vpop.f32.mrf.mxu1  ;;  %v11301_v11 = vld [vmem:[#allocation22_spill] sm:$0xff] }
 0x21a   : > { %v2377_v27 = vadd.f32 %v2376_v15, %v2278_v40  ;;  %2316 = vmatmul.bf16.gmra.mxu0 %v977_v63  ;;  %v1166_v5 = vrot.slane %v11301_v11, 3  ;;  %v9295_v63 = vld [vmem:[%s8586_s15 + $0x80] sm:$0xff] }
 0x21b   : > { %2514 = vmatmul.bf16.gmra.mxu2 %v1054_v0  ;;  %11302 = vst [vmem:[#allocation20_spill] sm:$0xff] %v9295_v63  ;;  %v1055_v19 = vrot.slane %v9295_v63, 2 }
 0x21c   : > { %2415 = vmatmul.bf16.gmra.mxu1 %v1052_v57  ;;  %v980_v57 = vor.u32 %v979_v33, %v978_v25  ;;  %v1167_v40 = vor.u32 %v1166_v5, %v1165_v4 }
 0x21d   : > { %2613 = vmatmul.bf16.gmra.mxu3 %v1164_v58 }
 0x21e   : > { %v2475_v20 = vpop.f32.mrf.mxu2  ;;  %v1168_v25 = vsel %vm1104_vm4, %v1163_v13, %v1167_v40  ;;  %v11306_v13 = vld [vmem:[#allocation30_spill] sm:$0xff] }
 0x21f   : > { %v2476_v56 = vadd.f32 %v2475_v20, %v2377_v27  ;;  %v2279_v31 = vpop.f32.mrf.mxu0  ;;  %v981_v27 = vsel %vm917_vm2, %v976_v55, %v980_v57  ;;  %v1056_v20 = vsel %vm1025_vm3, %v1053_v24, %v1055_v19  ;;  %v982_v55 = vrot.slane %v11300_v12, 1 }
 0x220   : > { %v2574_v26 = vpop.f32.mrf.mxu3  ;;  %v2280_v62 = vadd.f32 %v2279_v31, %v11299_v1  ;;  %v983_v24 = vrot.slane %v11301_v11, 2 }
 0x221   : > { %v9290_v61 = vadd.f32 %v2574_v26, %v2476_v56  ;;  %v2378_v16 = vpop.f32.mrf.mxu1  ;;  %v11303_v56 = vld [vmem:[#allocation19_spill] sm:$0xff] }
 0x222   : > { %v2379_v49 = vadd.f32 %v2378_v16, %v2280_v62 }
 0x226   : > { %v2477_v15 = vpop.f32.mrf.mxu2 }
 0x227   : > { %v2478_v22 = vadd.f32 %v2477_v15, %v2379_v49  ;;  %v2282_v47 = vpop.f32.mrf.mxu0  ;;  %v11304_v49 = vld [vmem:[#allocation21_spill] sm:$0xff] }
 0x228   : > { %v2576_v58 = vpop.f32.mrf.mxu3  ;;  %v2283_v26 = vadd.f32 %v2282_v47, %v11303_v56  ;;  %v1169_v47 = vrot.slane %v11306_v13, 2 }
 0x229   : > { %v9301_v31 = vadd.f32 %v2576_v58, %v2478_v22  ;;  %v2381_v1 = vpop.f32.mrf.mxu1 }
 0x22a   : > { %v2382_v33 = vadd.f32 %v2381_v1, %v2283_v26  ;;  %2321 = vmatmul.bf16.gmra.mxu0 %v981_v27  ;;  %v11307_v27 = vld [vmem:[#allocation26_spill] sm:$0xff] }
 0x22b   : > { %2519 = vmatmul.bf16.gmra.mxu2 %v1056_v20  ;;  %v1170_v56 = vrot.slane %v11307_v27, 3  ;;  %v9312_v1 = vld [vmem:[%s8586_s15 + $0x88] sm:$0xff]  }
 0x22c   : > { %2420 = vmatmul.bf16.gmra.mxu1 %v1054_v0  ;;  %v984_v0 = vor.u32 %v983_v24, %v982_v55  ;;  %11308 = vst [vmem:[#allocation18_spill] sm:$0xff] %v9312_v1  ;;  %v7994_v24 = vld [vmem:[%s11214_s1 + $0x238] sm:$0xff] }
 0x22d   : > { %2618 = vmatmul.bf16.gmra.mxu3 %v1168_v25  ;;  %v1057_v25 = vrot.slane %v9312_v1, 2  ;;  %2644 = vmatpush.bf16.msra.mxu0 %v7994_v24 }
 0x22e   : > { %v2480_v62 = vpop.f32.mrf.mxu2 }
 0x22f   : > { %v2481_v16 = vadd.f32 %v2480_v62, %v2382_v33  ;;  %v2284_v5 = vpop.f32.mrf.mxu0  ;;  %v1171_v33 = vor.u32 %v1170_v56, %v1169_v47  ;;  %v987_v47 = vrot.slane %v11307_v27, 2  ;;  %v11311_v56 = vld [vmem:[#allocation24_spill] sm:$0xff] }
 0x230   : > { %v2579_v4 = vpop.f32.mrf.mxu3  ;;  %v2285_v15 = vadd.f32 %v2284_v5, %v11304_v49  ;;  %v11309_v5 = vld [vmem:[#allocation23_spill] sm:$0xff] }
 0x231   : > { %v9307_v22 = vadd.f32 %v2579_v4, %v2481_v16  ;;  %v2383_v58 = vpop.f32.mrf.mxu1  ;;  %v985_v16 = vsel %vm917_vm2, %v980_v57, %v984_v0  ;;  %v1058_v4 = vsel %vm1025_vm3, %v1055_v19, %v1057_v25  ;;  %v1172_v55 = vsel %vm1104_vm4, %v1167_v40, %v1171_v33 }
 0x232   : > { %v2384_v26 = vadd.f32 %v2383_v58, %v2285_v15  ;;  %v9327_v15 = vld [vmem:[%s8586_s15 + $0x90] sm:$0xff]  ;;  %v986_v58 = vrot.slane %v11306_v13, 1  ;;  %v7991_v13 = vld [vmem:[%s11214_s1 + $0x220] sm:$0xff] }
 0x233   : > { %11305 = vst [vmem:[#allocation17_spill] sm:$0xff] %v9307_v22  ;;  %v991_v57 = vshrl.u32 %v9327_v15, 16  ;;  %v994_v19 = vshll.u32 %v9327_v15, 16 }
 0x234   : > { %11310 = vst [vmem:[#allocation25_spill] sm:$0xff] %v9327_v15 }
 0x236   : > { %v2482_v12 = vpop.f32.mrf.mxu2 }
 0x237   : > { %v2483_v62 = vadd.f32 %v2482_v12, %v2384_v26  ;;  %v2287_v63 = vpop.f32.mrf.mxu0  ;;  %v1173_v26 = vrot.slane %v991_v57, 2  ;;  %v1174_v12 = vrot.slane %v994_v19, 3 }
 0x238   : > { %v2581_v11 = vpop.f32.mrf.mxu3  ;;  %v9318_v49 = vadd.f32 %v2287_v63, %v11309_v5  ;;  %v7993_v63 = vld [vmem:[%s11214_s1 + $0x230] sm:$0xff] }
 0x239   : > { %v9320_v22 = vadd.f32 %v2581_v11, %v2483_v62  ;;  %2645 = vmatpush.bf16.msra.mxu0 %v7993_v63  ;;  %v7992_v62 = vld [vmem:[%s11214_s1 + $0x228] sm:$0xff]  ;;  %v988_v11 = vor.u32 %v987_v47, %v986_v58  ;;  %v1175_v5 = vor.u32 %v1174_v12, %v1173_v26  ;;  %v9356_v47 = vld [vmem:[%s8586_s15 + $0x98] sm:$0xff]  ;;  %v993_v12 = vrot.slane %v991_v57, 1  ;;  %v7987_v57 = vld [vmem:[%s11214_s1 + $0x200] sm:$0xff] }
 0x23a   : > { %2326 = vmatmul.bf16.gmra.mxu0 %v985_v16  ;;  %v9343_v16 = vrot.slane %v9327_v15, 2  ;;  %v11313_v63 = vld [vmem:[#allocation27_spill] sm:$0xff]  ;;  %11315 = vst [vmem:[#allocation21_spill] sm:$0xff] %v9356_v47  ;;  %v1094_v15 = vrot.slane %v9356_v47, 2 }
 0x23b   : > { %2524 = vmatmul.bf16.gmra.mxu2 %v1058_v4  ;;  %v1176_v58 = vsel %vm1104_vm4, %v1171_v33, %v1175_v5  ;;  %v7989_v33 = vld [vmem:[%s11214_s1 + $0x210] sm:$0xff] }
 0x23c   : > { %2425 = vmatmul.bf16.gmra.mxu1 %v1056_v20  ;;  %v1060_v24 = vsel %vm1025_vm3, %v1057_v25, %v9343_v16  ;;  %v1181_v25 = vshll.u32 %v9356_v47, 16 }
 0x23d   : > { %2623 = vmatmul.bf16.gmra.mxu3 %v1172_v55  ;;  %2646 = vmatpush.bf16.msra.mxu0 %v7992_v62  ;;  %v989_v55 = vsel %vm917_vm2, %v984_v0, %v988_v11  ;;  %v1178_v0 = vshrl.u32 %v9356_v47, 16  ;;  %v996_v62 = vrot.slane %v994_v19, 2  ;;  %v11320_v47 = vld [vmem:[#allocation31_spill] sm:$0xff] }
 0x23f   : > { %v2289_v40 = vpop.f32.mrf.mxu0 }
 0x240   : > { %v9337_v20 = vadd.f32 %v2289_v40, %v11311_v56  ;;  %v7990_v56 = vld [vmem:[%s11214_s1 + $0x218] sm:$0xff] }
 0x241   : > { %2647 = vmatpush.bf16.msra.mxu0 %v7991_v13  ;;  %v11316_v13 = vld [vmem:[#allocation28_spill] sm:$0xff] }
 0x242   : > { %11312 = vst [vmem:[#allocation22_spill] sm:$0xff] %v9337_v20  ;;  %v561_v20 = vld [vmem:[%s8586_s15 + $0x98] sm:$0x1] }
 0x245   : > { %2648 = vmatpush.bf16.msra.mxu0 %v7990_v56  ;;  %v997_v56 = vor.u32 %v996_v62, %v993_v12  ;;  %v566_v62 = vld [vmem:[%s8586_s15 + $0xa0] sm:$0x1] }
 0x247   : > { %v2292_v27 = vpop.f32.mrf.mxu0 }
 0x248   : > { %v9352_v40 = vadd.f32 %v2292_v27, %v11313_v63  ;;  %v1183_v63 = vrot.slane %v1181_v25, 3  ;;  %v1095_v25 = vsel %vm1025_vm3, %v9343_v16, %v1094_v15 }
 0x249   : > { %2649 = vmatpush.bf16.msra.mxu0 %v7989_v33  ;;  %v915_v33 = vunpack.c.l.b16 %v561_v20 }
 0x24a   : > { %11314 = vst [vmem:[#allocation19_spill] sm:$0xff] %v9352_v40  ;;  %2331 = vmatmul.bf16.gmra.mxu0 %v989_v55  ;;  %v1180_v55 = vrot.slane %v1178_v0, 2  ;;  %v998_v0 = vsel %vm917_vm2, %v988_v11, %v997_v56 }
 0x24b   : > { %2529 = vmatmul.bf16.gmra.mxu2 %v1060_v24 }
 0x24c   : > { %2430 = vmatmul.bf16.gmra.mxu1 %v1058_v4  ;;  %v567_v4 = vld [vmem:[%s8586_s15 + $0xa0] sm:$0x3]  ;;  %v1184_v40 = vor.u32 %v1183_v63, %v1180_v55  ;;  %v916_v63 = vpack.c.b16 %v915_v33, %v915_v33 }
 0x24d   : > { %2628 = vmatmul.bf16.gmra.mxu3 %v1176_v58  ;;  %v7988_v58 = vld [vmem:[%s11214_s1 + $0x208] sm:$0xff]  ;;  %v1102_v1 = vunpack.c.l.b16 %v567_v4  ;;  %v1088_v4 = vunpack.c.l.b16 %v566_v62 }
 0x24e   : > { %2650 = vmatpush.bf16.msra.mxu0 %v7988_v58  ;;  %v1185_v12 = vsel %vm1104_vm4, %v1175_v5, %v1184_v40 }
 0x24f   : > { %v2294_v26 = vpop.f32.mrf.mxu0  ;;  %v9386_v55 = vpack.c.b16 %v1102_v1, %v1102_v1 }
 0x250   : > { %v9367_v27 = vadd.f32 %v2294_v26, %v11316_v13  ;;  %v11317_v26 = vld [vmem:[#allocation29_spill] sm:$0xff] }
 0x251   : > { %11319 = vst [vmem:[#allocation26_spill] sm:$0xff] %v9386_v55  ;;  %v1187_v11 = vshrl.u32 %v9386_v55, 16  ;;  %v1190_v58 = vshll.u32 %v9386_v55, 16 }
 0x252   : > { %2651 = vmatpush.bf16.msra.mxu0 %v7987_v57 }
 0x253   : > { %v1189_v1 = vrot.slane %v1187_v11, 2  ;;  %v568_v11 = vld [vmem:[%s8586_s15 + $0x10] sm:$0x8] }
 0x257   : > { %v2297_v19 = vpop.f32.mrf.mxu0 }
 0x258   : > { %v9382_v13 = vadd.f32 %v2297_v19, %v11317_v26  ;;  %v1000_v19 = vshll.u32 %v916_v63, 16  ;;  %v1091_v26 = vpack.c.b16 %v1088_v4, %v1088_v4 }
 0x25a   : > { %11318 = vst [vmem:[#allocation30_spill] sm:$0xff] %v9382_v13  ;;  %2336 = vmatmul.bf16.gmra.mxu0 %v998_v0  ;;  %v1192_v13 = vrot.slane %v1190_v58, 3  ;;  %v1002_v57 = vrot.slane %v1000_v19, 2  ;;  %v1096_v0 = vrot.slane %v1091_v26, 2 }
 0x25b   : > { %2534 = vmatmul.bf16.gmra.mxu2 %v1095_v25  ;;  %v1061_v25 = vrot.slane %v916_v63, 2 }
 0x25c   : > { %2435 = vmatmul.bf16.gmra.mxu1 %v1060_v24  ;;  %v1193_v24 = vor.u32 %v1192_v13, %v1189_v1  ;;  %v1003_v33 = vsel %vm917_vm2, %v997_v56, %v1002_v57  ;;  %v1097_v62 = vsel %vm1025_vm3, %v1094_v15, %v1096_v0  ;;  %v1214_v13 = vunpack.c.l.b16 %v568_v11 }
 0x25d   : > { %2633 = vmatmul.bf16.gmra.mxu3 %v1185_v12  ;;  %v1062_v4 = vsel %vm1025_vm3, %v9343_v16, %v1061_v25  ;;  %v11321_v56 = vunpack.c.h.b16 %v8638_v41  ;;  %v8332_v41 = vld [vmem:[%s8586_s15 + $0x20] sm:$0xff] }
 0x25f   : > { %v2299_v20 = vpop.f32.mrf.mxu0  ;;  %v1215_v58 = vpack.c.b16 %v11321_v56, %v1214_v13 }
 0x260   : > { %v9391_v5 = vadd.f32 %v2299_v20, %v11320_v47  ;;  %v1194_v47 = vsel %vm1104_vm4, %v1184_v40, %v1193_v24  ;;  %v8331_v20 = vld [vmem:[%s8586_s15 + $0x18] sm:$0xff] }
 0x261   : > { %v1218_v19 = vrot.slane %v8331_v20, 3 }
 0x267   : > { %v2302_v12 = vpop.f32.mrf.mxu0 }
 0x268   : > { %v9396_v55 = vadd.f32 %v2302_v12, %v9071_v3  ;;  %v1217_v3 = vrot.slane %v1215_v58, 3 }
 0x26a   : > { %2341 = vmatmul.bf16.gmra.mxu0 %v1003_v33  ;;  %v1219_v40 = vsel %vm1216_vm5, %v1217_v3, %v1218_v19 }
 0x26b   : > { %2539 = vmatmul.bf16.gmra.mxu2 %v1097_v62 }
 0x26c   : > { %2440 = vmatmul.bf16.gmra.mxu1 %v1062_v4 }
 0x26d   : > { %2638 = vmatmul.bf16.gmra.mxu3 %v1194_v47 }
 0x26f   : > { %v2304_v63 = vpop.f32.mrf.mxu0 }
 0x270   : > { %v9405_v15 = vadd.f32 %v2304_v63, %v9081_v42  ;;  %v1220_v42 = vrot.slane %v8332_v41, 3 }
 0x272   : > { %v1221_v25 = vsel %vm1216_vm5, %v1218_v19, %v1220_v42 }
 0x277   : > { %v2307_v16 = vpop.f32.mrf.mxu0 }
 0x278   : > { %v9410_v26 = vadd.f32 %v2307_v16, %v9088_v32  ;;  %v8333_v32 = vld [vmem:[%s8586_s15 + $0x28] sm:$0xff] }
 0x279   : > { %v1222_v62 = vrot.slane %v8333_v32, 3 }
 0x27a   : > { %2652 = vmatmul.bf16.vlgmr.msra.gmra.mxu0 %v1219_v40 }
 0x27f   : > { %v2309_v1 = vpop.f32.mrf.mxu0 }
 0x280   : > { %v9413_v57 = vadd.f32 %v2309_v1, %v9097_v29  ;;  %v1223_v29 = vsel %vm1216_vm5, %v1220_v42, %v1222_v62 }
 0x287   : > { %v2312_v0 = vpop.f32.mrf.mxu0 }
 0x288   : > { %v9418_v24 = vadd.f32 %v2312_v0, %v9104_v30  ;;  %v8334_v30 = vld [vmem:[%s8586_s15 + $0x30] sm:$0xff] }
 0x289   : > { %v1224_v63 = vrot.slane %v8334_v30, 3 }
 0x28a   : > { %2657 = vmatmul.bf16.gmra.mxu0 %v1221_v25 }
 0x28b   : > { %v1225_v58 = vsel %vm1216_vm5, %v1222_v62, %v1224_v63 }
 0x28f   : > { %v2314_v12 = vpop.f32.mrf.mxu0 }
 0x290   : > { %v9421_v33 = vadd.f32 %v2314_v12, %v9112_v2 }
 0x297   : > { %v2317_v4 = vpop.f32.mrf.mxu0 }
 0x298   : > { %v9426_v47 = vadd.f32 %v2317_v4, %v9118_v60  ;;  %v1226_v60 = vrot.slane %v9137_v48, 3 }
 0x29a   : > { %2662 = vmatmul.bf16.gmra.mxu0 %v1223_v29  ;;  %v1227_v16 = vsel %vm1216_vm5, %v1224_v63, %v1226_v60 }
 0x29f   : > { %v2319_v11 = vpop.f32.mrf.mxu0 }
 0x2a0   : > { %v9429_v13 = vadd.f32 %v2319_v11, %v9126_v36 }
 0x2a7   : > { %v2322_v56 = vpop.f32.mrf.mxu0 }
 0x2a8   : > { %v9434_v2 = vadd.f32 %v2322_v56, %v9132_v59  ;;  %v1228_v59 = vrot.slane %v9154_v9, 3 }
 0x2aa   : > { %2667 = vmatmul.bf16.gmra.mxu0 %v1225_v58  ;;  %v1229_v42 = vsel %vm1216_vm5, %v1226_v60, %v1228_v59  ;;  %v1236_v58 = vrot.slane %v9227_v6, 3 }
 0x2af   : > { %v2324_v3 = vpop.f32.mrf.mxu0 }
 0x2b0   : > { %v9437_v20 = vadd.f32 %v2324_v3, %v9143_v10 }
 0x2b7   : > { %v2327_v19 = vpop.f32.mrf.mxu0 }
 0x2b8   : > { %v9442_v36 = vadd.f32 %v2327_v19, %v9149_v46  ;;  %v1230_v46 = vrot.slane %v9176_v44, 3 }
 0x2ba   : > { %2672 = vmatmul.bf16.gmra.mxu0 %v1227_v16  ;;  %v1231_v12 = vsel %vm1216_vm5, %v1228_v59, %v1230_v46 }
 0x2bf   : > { %v2329_v40 = vpop.f32.mrf.mxu0 }
 0x2c0   : > { %v9445_v1 = vadd.f32 %v2329_v40, %v9165_v21  ;;  %v1238_v40 = vrot.slane %v9244_v43, 3 }
 0x2c2   : > { %v1239_v59 = vsel %vm1216_vm5, %v1236_v58, %v1238_v40 }
 0x2c7   : > { %v2332_v41 = vpop.f32.mrf.mxu0 }
 0x2c8   : > { %v9450_v10 = vadd.f32 %v2332_v41, %v9171_v23  ;;  %v1232_v23 = vrot.slane %v9193_v18, 3 }
 0x2ca   : > { %2677 = vmatmul.bf16.gmra.mxu0 %v1229_v42  ;;  %v1233_v4 = vsel %vm1216_vm5, %v1230_v46, %v1232_v23  ;;  %v9492_v46 = vpop.f32.mrf.mxu2 }
 0x2cf   : > { %v2334_v48 = vpop.f32.mrf.mxu0 }
 0x2d0   : > { %v9453_v0 = vadd.f32 %v2334_v48, %v9182_v51 }
 0x2d7   : > { %v2337_v25 = vpop.f32.mrf.mxu0 }
 0x2d8   : > { %v9458_v21 = vadd.f32 %v2337_v25, %v9188_v54  ;;  %v1234_v54 = vrot.slane %v9210_v53, 3 }
 0x2da   : > { %11322 = vst [vmem:[#allocation23_spill] sm:$0xff] %v9458_v21  ;;  %2682 = vmatmul.bf16.gmra.mxu0 %v1231_v12  ;;  %v1235_v30 = vsel %vm1216_vm5, %v1232_v23, %v1234_v54  ;;  %v1240_v23 = vrot.slane %v9261_v37, 3  ;;  %v11331_v21 = vld [vmem:[#allocation22_spill] sm:$0xff] }
 0x2df   : > { %v2339_v9 = vpop.f32.mrf.mxu0 }
 0x2e0   : > { %v9461_v32 = vadd.f32 %v2339_v9, %v9199_v7 }
 0x2e2   : > { %11323 = vst [vmem:[#allocation24_spill] sm:$0xff] %v9461_v32 }
 0x2e7   : > { %v2342_v62 = vpop.f32.mrf.mxu0 }
 0x2e8   : > { %v9466_v51 = vadd.f32 %v2342_v62, %v9205_v52 }
 0x2ea   : > { %11324 = vst [vmem:[#allocation27_spill] sm:$0xff] %v9466_v51  ;;  %2687 = vmatmul.bf16.gmra.mxu0 %v1233_v4 }
 0x2ef   : > { %v2344_v44 = vpop.f32.mrf.mxu0 }
 0x2f0   : > { %v9469_v29 = vadd.f32 %v2344_v44, %v9215_v34  ;;  %v1237_v34 = vsel %vm1216_vm5, %v1234_v54, %v1236_v58 }
 0x2f2   : > { %11325 = vst [vmem:[#allocation28_spill] sm:$0xff] %v9469_v29 }
 0x2f7   : > { %v2653_v11 = vpop.f32.mrf.mxu0 }
 0x2f8   : > { %v2654_v7 = vadd.f32 %v2653_v11, %v9222_v14 }
 0x2fa   : > { %v2743_v63 = vmax.f32 %v2654_v7, 0.0  ;;  %2692 = vmatmul.bf16.gmra.mxu0 %v1235_v30  ;;  %v9498_v30 = vpop.f32.mrf.mxu3 }
 0x2fc   : > { %2779 = vst [vmem:[#allocation2] sm:$0xff] %v2743_v63 }
 0x2ff   : > { %v2655_v18 = vpop.f32.mrf.mxu0 }
 0x300   : > { %v2656_v56 = vadd.f32 %v2655_v18, %v9233_v17 }
 0x302   : > { %v2744_v52 = vmax.f32 %v2656_v56, 0.0  ;;  %v1241_v56 = vsel %vm1216_vm5, %v1238_v40, %v1240_v23 }
 0x304   : > { %2780 = vst [vmem:[#allocation2 + $0x8] sm:$0xff] %v2744_v52 }
 0x307   : > { %v2658_v3 = vpop.f32.mrf.mxu0 }
 0x308   : > { %v2659_v53 = vadd.f32 %v2658_v3, %v9239_v50  ;;  %v9487_v50 = vpop.f32.mrf.mxu1 }
 0x30a   : > { %v2745_v60 = vmax.f32 %v2659_v53, 0.0  ;;  %2697 = vmatmul.bf16.gmra.mxu0 %v1237_v34  ;;  %v9517_v34 = vpop.f32.mrf.mxu3 }
 0x30b   : > { %v2849_v25 = vld [vmem:[#allocation2 + $0x1] sm:$0xff] }
 0x30c   : > { %2781 = vst [vmem:[#allocation2 + $0x10] sm:$0xff] %v2745_v60  ;;  %v2883_v44 = vmax.f32 %v2743_v63, %v2849_v25 }
 0x30f   : > { %v2660_v19 = vpop.f32.mrf.mxu0 }
 0x310   : > { %v2661_v14 = vadd.f32 %v2660_v19, %v9250_v35  ;;  %v9510_v3 = vpop.f32.mrf.mxu1 }
 0x312   : > { %v2746_v16 = vmax.f32 %v2661_v14, 0.0 }
 0x313   : > { %v2850_v12 = vld [vmem:[#allocation2 + $0x9] sm:$0xff] }
 0x314   : > { %2782 = vst [vmem:[#allocation2 + $0x18] sm:$0xff] %v2746_v16  ;;  %v2884_v54 = vmax.f32 %v2744_v52, %v2850_v12  ;;  %v9513_v52 = vpop.f32.mrf.mxu2 }
 0x317   : > { %v2663_v17 = vpop.f32.mrf.mxu0 }
 0x318   : > { %v9482_v6 = vadd.f32 %v2663_v17, %v9256_v8 }
 0x31a   : > { %v2747_v41 = vmax.f32 %v9482_v6, 0.0  ;;  %2702 = vmatmul.bf16.gmra.mxu0 %v1239_v59  ;;  %v11328_v6 = vld [vmem:[#allocation18_spill] sm:$0xff] }
 0x31b   : > { %v2917_v35 = vld [vmem:[#allocation2 + $0x12] sm:$0xff] }
 0x31c   : > { %2783 = vst [vmem:[#allocation2 + $0x20] sm:$0xff] %v2747_v41  ;;  %v2951_v48 = vld [vmem:[#allocation2 + $0x13] sm:$0xff] }
 0x31d   : > { %v2985_v9 = vmax.f32 %v2917_v35, %v2951_v48  ;;  %v2851_v40 = vld [vmem:[#allocation2 + $0x11] sm:$0xff]  ;;  %v9523_v35 = vpop.f32.mrf.mxu1  ;;  %v1242_v48 = vrot.slane %v9278_v28, 3 }
 0x31f   : > { %v2665_v42 = vpop.f32.mrf.mxu0 }
 0x320   : > { %v9490_v43 = vadd.f32 %v2665_v42, %v9267_v45  ;;  %v9500_v45 = vmax.f32 %v2883_v44, %v2985_v9  ;;  %v2885_v9 = vmax.f32 %v2745_v60, %v2851_v40  ;;  %v9528_v44 = vpop.f32.mrf.mxu2 }
 0x322   : > { %v2748_v8 = vmax.f32 %v9490_v43, 0.0 }
 0x323   : > { %v2918_v62 = vld [vmem:[#allocation2 + $0x1a] sm:$0xff] }
 0x324   : > { %v2952_v4 = vld [vmem:[#allocation2 + $0x1b] sm:$0xff]  ;;  %2784 = vst [vmem:[#allocation2 + $0x28] sm:$0xff] %v2748_v8 }
 0x325   : > { %v2986_v11 = vmax.f32 %v2918_v62, %v2952_v4  ;;  %v2852_v17 = vld [vmem:[#allocation2 + $0x19] sm:$0xff] }
 0x326   : > { %v2886_v62 = vmax.f32 %v2746_v16, %v2852_v17  ;;  %v9545_v16 = vpop.f32.mrf.mxu1 }
 0x327   : > { %v9502_v7 = vmax.f32 %v2884_v54, %v2986_v11  ;;  %v2668_v18 = vpop.f32.mrf.mxu0 }
 0x328   : > { %v9506_v58 = vadd.f32 %v2668_v18, %v9273_v38  ;;  %v1243_v18 = vsel %vm1216_vm5, %v1240_v23, %v1242_v48 }
 0x32a   : > { %v11258_v63 = vmax.f32 %v9506_v58, 0.0  ;;  %2707 = vmatmul.bf16.gmra.mxu0 %v1241_v56 }
 0x32b   : > { %v2919_v19 = vld [vmem:[#allocation2 + $0x22] sm:$0xff] }
 0x32c   : > { %2785 = vst [vmem:[#allocation2 + $0x30] sm:$0xff] %v11258_v63  ;;  %v2953_v14 = vld [vmem:[#allocation2 + $0x23] sm:$0xff] }
 0x32d   : > { %v2987_v42 = vmax.f32 %v2919_v19, %v2953_v14  ;;  %v9547_v19 = vpop.f32.mrf.mxu2  ;;  %v2853_v17 = vld [vmem:[#allocation2 + $0x21] sm:$0xff] }
 0x32e   : > { %v2887_v37 = vmax.f32 %v2747_v41, %v2853_v17 }
 0x32f   : > { %v2670_v53 = vpop.f32.mrf.mxu0 }
 0x330   : > { %v9520_v38 = vadd.f32 %v2670_v53, %v9284_v39  ;;  %v9530_v39 = vmax.f32 %v2885_v9, %v2987_v42  ;;  %v9540_v53 = vpop.f32.mrf.mxu3 }
 0x332   : > { %v11257_v59 = vmax.f32 %v9520_v38, 0.0 }
 0x333   : > { %v2920_v25 = vld [vmem:[#allocation2 + $0x2a] sm:$0xff] }
 0x334   : > { %v2954_v12 = vld [vmem:[#allocation2 + $0x2b] sm:$0xff]  ;;  %2786 = vst [vmem:[#allocation2 + $0x38] sm:$0xff] %v11257_v59  ;;  %v11327_v59 = vld [vmem:[#allocation17_spill] sm:$0xff] }
 0x335   : > { %v2988_v4 = vmax.f32 %v2920_v25, %v2954_v12  ;;  %v2854_v42 = vld [vmem:[#allocation2 + $0x29] sm:$0xff]  ;;  %v9574_v41 = vpop.f32.mrf.mxu2 }
 0x337   : > { %v9532_v54 = vmax.f32 %v2886_v62, %v2988_v4  ;;  %v2673_v11 = vpop.f32.mrf.mxu0  ;;  %v11326_v62 = vld [vmem:[#allocation20_spill] sm:$0xff] }
 0x338   : > { %v9536_v56 = vadd.f32 %v2673_v11, %v9290_v61  ;;  %v9553_v9 = vpop.f32.mrf.mxu3  ;;  %v1244_v4 = vrot.slane %v11326_v62, 3 }
 0x33a   : > { %v11256_v60 = vmax.f32 %v9536_v56, 0.0  ;;  %2712 = vmatmul.bf16.gmra.mxu0 %v1243_v18  ;;  %v1245_v62 = vsel %vm1216_vm5, %v1242_v48, %v1244_v4 }
 0x33b   : > { %v2921_v23 = vld [vmem:[#allocation2 + $0x32] sm:$0xff] }
 0x33c   : > { %2787 = vst [vmem:[#allocation2 + $0x40] sm:$0xff] %v11256_v60  ;;  %v2955_v40 = vld [vmem:[#allocation2 + $0x33] sm:$0xff] }
 0x33d   : > { %v2989_v12 = vmax.f32 %v2921_v23, %v2955_v40  ;;  %v9566_v23 = vpop.f32.mrf.mxu1 }
 0x33f   : > { %v2675_v14 = vpop.f32.mrf.mxu0  ;;  %v9562_v28 = vmax.f32 %v2887_v37, %v2989_v12 }
 0x340   : > { %v9550_v61 = vadd.f32 %v2675_v14, %v9301_v31  ;;  %v2888_v31 = vmax.f32 %v2748_v8, %v2854_v42  ;;  %v9579_v8 = vpop.f32.mrf.mxu3 }
 0x342   : > { %v11260_v25 = vmax.f32 %v9550_v61, 0.0 }
 0x343   : > { %v2922_v11 = vld [vmem:[#allocation2 + $0x3a] sm:$0xff] }
 0x344   : > { %v2956_v18 = vld [vmem:[#allocation2 + $0x3b] sm:$0xff]  ;;  %2788 = vst [vmem:[#allocation2 + $0x48] sm:$0xff] %v11260_v25 }
 0x345   : > { %v2990_v14 = vmax.f32 %v2922_v11, %v2956_v18  ;;  %v9586_v12 = vpop.f32.mrf.mxu1  ;;  %v2855_v11 = vld [vmem:[#allocation2 + $0x31] sm:$0xff]  ;;  %v2856_v18 = vld [vmem:[#allocation2 + $0x39] sm:$0xff] }
 0x347   : > { %v9564_v60 = vmax.f32 %v2888_v31, %v2990_v14  ;;  %v2678_v40 = vpop.f32.mrf.mxu0 }
 0x348   : > { %v9570_v63 = vadd.f32 %v2678_v40, %v11327_v59  ;;  %v2387_v59 = vadd.f32 %v9487_v50, %v9318_v49  ;;  %v11330_v50 = vmax.f32 %v9520_v38, 0.0 }
 0x34a   : > { %v11259_v43 = vmax.f32 %v9570_v63, 0.0  ;;  %2717 = vmatmul.bf16.gmra.mxu0 %v1245_v62  ;;  %v2486_v31 = vadd.f32 %v9492_v46, %v2387_v59  ;;  %v9590_v62 = vpop.f32.mrf.mxu2 }
 0x34b   : > { %v2923_v17 = vld [vmem:[#allocation2 + $0x42] sm:$0xff] }
 0x34c   : > { %2789 = vst [vmem:[#allocation2 + $0x50] sm:$0xff] %v11259_v43  ;;  %v2957_v42 = vld [vmem:[#allocation2 + $0x43] sm:$0xff]  ;;  %v1246_v43 = vrot.slane %v11328_v6, 3  ;;  %v2585_v46 = vadd.f32 %v9498_v30, %v2486_v31 }
 0x34d   : > { %v2991_v40 = vmax.f32 %v2923_v17, %v2957_v42  ;;  %v9604_v42 = vpop.f32.mrf.mxu3 }
 0x34e   : > { %v1247_v32 = vsel %vm1216_vm5, %v1244_v4, %v1246_v43 }
 0x34f   : > { %v2680_v37 = vpop.f32.mrf.mxu0 }
 0x350   : > { %v9584_v48 = vadd.f32 %v2680_v37, %v9320_v22  ;;  %v11329_v22 = vmax.f32 %v9506_v58, 0.0  ;;  %v2890_v37 = vmax.f32 %v11330_v50, %v2856_v18  ;;  %v11332_v18 = vld [vmem:[#allocation19_spill] sm:$0xff] }
 0x351   : > { %v2392_v31 = vadd.f32 %v9523_v35, %v11332_v18  ;;  %v11334_v35 = vmax.f32 %v9536_v56, 0.0  ;;  %v2394_v56 = vadd.f32 %v9545_v16, %v9367_v27 }
 0x352   : > { %v11261_v14 = vmax.f32 %v9584_v48, 0.0  ;;  %v2889_v49 = vmax.f32 %v11329_v22, %v2855_v11 }
 0x353   : > { %v2924_v25 = vld [vmem:[#allocation2 + $0x4a] sm:$0xff]  ;;  %v2491_v22 = vadd.f32 %v9528_v44, %v2392_v31 }
 0x354   : > { %v2958_v29 = vld [vmem:[#allocation2 + $0x4b] sm:$0xff]  ;;  %2790 = vst [vmem:[#allocation2 + $0x58] sm:$0xff] %v11261_v14  ;;  %v9600_v59 = vmax.f32 %v2889_v49, %v2991_v40  ;;  %v2389_v14 = vadd.f32 %v9510_v3, %v11331_v21 }
 0x355   : > { %v2992_v51 = vmax.f32 %v2924_v25, %v2958_v29  ;;  %v9619_v25 = vpop.f32.mrf.mxu2  ;;  %v2590_v44 = vadd.f32 %v9540_v53, %v2491_v22 }
 0x356   : > { %v2488_v29 = vadd.f32 %v9513_v52, %v2389_v14  ;;  %v9626_v52 = vpop.f32.mrf.mxu3  ;;  %v2858_v14 = vld [vmem:[#allocation2 + $0x49] sm:$0xff] }
 0x357   : > { %v9602_v17 = vmax.f32 %v2890_v37, %v2992_v51  ;;  %v2683_v6 = vpop.f32.mrf.mxu0  ;;  %v9615_v51 = vpop.f32.mrf.mxu1  ;;  %v11333_v37 = vld [vmem:[#allocation25_spill] sm:$0xff] }
 0x358   : > { %v9609_v58 = vadd.f32 %v2683_v6, %v2585_v46  ;;  %v2587_v4 = vadd.f32 %v9517_v34, %v2488_v29  ;;  %v1248_v46 = vrot.slane %v11333_v37, 3 }
 0x35a   : > { %v2755_v30 = vmax.f32 %v9609_v58, 0.0  ;;  %2722 = vmatmul.bf16.gmra.mxu0 %v1247_v32  ;;  %v2857_v32 = vld [vmem:[#allocation2 + $0x41] sm:$0xff] }
 0x35b   : > { %v2925_v3 = vld [vmem:[#allocation2 + $0x52] sm:$0xff]  ;;  %v2891_v29 = vmax.f32 %v11334_v35, %v2857_v32 }
 0x35c   : > { %2791 = vst [vmem:[#allocation2 + $0x60] sm:$0xff] %v2755_v30  ;;  %v2959_v11 = vld [vmem:[#allocation2 + $0x53] sm:$0xff] }
 0x35d   : > { %v2993_v50 = vmax.f32 %v2925_v3, %v2959_v11  ;;  %v9644_v11 = vpop.f32.mrf.mxu2 }
 0x35e   : > { %v9655_v22 = vpop.f32.mrf.mxu3 }
 0x35f   : > { %v2685_v21 = vpop.f32.mrf.mxu0  ;;  %v9637_v38 = vpop.f32.mrf.mxu1  ;;  %v9640_v31 = vmax.f32 %v2891_v29, %v2993_v50 }
 0x360   : > { %v9624_v40 = vadd.f32 %v2685_v21, %v2587_v4  ;;  %v11335_v4 = vmax.f32 %v9550_v61, 0.0 }
 0x362   : > { %v11262_v49 = vmax.f32 %v9624_v40, 0.0  ;;  %v2892_v21 = vmax.f32 %v11335_v4, %v2858_v14  ;;  %v2493_v14 = vadd.f32 %v9547_v19, %v2394_v56 }
 0x363   : > { %v2926_v34 = vld [vmem:[#allocation2 + $0x5a] sm:$0xff] }
 0x364   : > { %v2960_v6 = vld [vmem:[#allocation2 + $0x5b] sm:$0xff]  ;;  %2792 = vst [vmem:[#allocation2 + $0x68] sm:$0xff] %v11262_v49  ;;  %v1249_v49 = vsel %vm1216_vm5, %v1246_v43, %v1248_v46  ;;  %v2592_v43 = vadd.f32 %v9553_v9, %v2493_v14 }
 0x365   : > { %v2994_v18 = vmax.f32 %v2926_v34, %v2960_v6  ;;  %v11336_v6 = vld [vmem:[#allocation30_spill] sm:$0xff]  ;;  %v9666_v19 = vpop.f32.mrf.mxu2  ;;  %v2860_v4 = vld [vmem:[#allocation2 + $0x59] sm:$0xff] }
 0x366   : > { %v2397_v35 = vadd.f32 %v9566_v23, %v11336_v6  ;;  %v11337_v9 = vld [vmem:[#allocation21_spill] sm:$0xff]  ;;  %v11338_v23 = vmax.f32 %v9570_v63, 0.0 }
 0x367   : > { %v9642_v3 = vmax.f32 %v2892_v21, %v2994_v18  ;;  %v2688_v37 = vpop.f32.mrf.mxu0  ;;  %v9660_v50 = vpop.f32.mrf.mxu1 }
 0x368   : > { %v9649_v32 = vadd.f32 %v2688_v37, %v2590_v44  ;;  %v2496_v21 = vadd.f32 %v9574_v41, %v2397_v35  ;;  %v1250_v37 = vrot.slane %v11337_v9, 3 }
 0x36a   : > { %v11263_v53 = vmax.f32 %v9649_v32, 0.0  ;;  %2727 = vmatmul.bf16.gmra.mxu0 %v1249_v49  ;;  %v2859_v49 = vld [vmem:[#allocation2 + $0x51] sm:$0xff]  ;;  %v2595_v41 = vadd.f32 %v9579_v8, %v2496_v21  ;;  %v1251_v9 = vsel %vm1216_vm5, %v1248_v46, %v1250_v37 }
 0x36b   : > { %v2927_v16 = vld [vmem:[#allocation2 + $0x62] sm:$0xff] }
 0x36c   : > { %2793 = vst [vmem:[#allocation2 + $0x70] sm:$0xff] %v11263_v53  ;;  %v2961_v34 = vld [vmem:[#allocation2 + $0x63] sm:$0xff]  ;;  %v9677_v53 = vpop.f32.mrf.mxu3 }
 0x36d   : > { %v2995_v44 = vmax.f32 %v2927_v16, %v2961_v34 }
 0x36f   : > { %v2690_v27 = vpop.f32.mrf.mxu0 }
 0x370   : > { %v9664_v29 = vadd.f32 %v2690_v27, %v2592_v43  ;;  %v2893_v43 = vmax.f32 %v11338_v23, %v2859_v49  ;;  %v11339_v27 = vmax.f32 %v9584_v48, 0.0  ;;  %v9691_v49 = vpop.f32.mrf.mxu1 }
 0x372   : > { %v11264_v18 = vmax.f32 %v9664_v29, 0.0  ;;  %v2894_v6 = vmax.f32 %v11339_v27, %v2860_v4  ;;  %v9680_v35 = vmax.f32 %v2893_v43, %v2995_v44 }
 0x373   : > { %v2928_v56 = vld [vmem:[#allocation2 + $0x6a] sm:$0xff] }
 0x374   : > { %v2962_v14 = vld [vmem:[#allocation2 + $0x6b] sm:$0xff]  ;;  %2794 = vst [vmem:[#allocation2 + $0x78] sm:$0xff] %v11264_v18  ;;  %v2399_v18 = vadd.f32 %v9586_v12, %v9391_v5  ;;  %v9700_v5 = vpop.f32.mrf.mxu3 }
 0x375   : > { %v2996_v61 = vmax.f32 %v2928_v56, %v2962_v14  ;;  %v2402_v56 = vadd.f32 %v9615_v51, %v9396_v55  ;;  %v11341_v51 = vmax.f32 %v9624_v40, 0.0 }
 0x376   : > { %v2498_v4 = vadd.f32 %v9590_v62, %v2399_v18  ;;  %v2861_v62 = vld [vmem:[#allocation2 + $0x61] sm:$0xff]  ;;  %v2862_v18 = vld [vmem:[#allocation2 + $0x69] sm:$0xff] }
 0x377   : > { %v9682_v16 = vmax.f32 %v2894_v6, %v2996_v61  ;;  %v2693_v34 = vpop.f32.mrf.mxu0  ;;  %v9695_v61 = vpop.f32.mrf.mxu2  ;;  %v2501_v23 = vadd.f32 %v9619_v25, %v2402_v56  ;;  %v2895_v55 = vmax.f32 %v2755_v30, %v2861_v62 }
 0x378   : > { %v9687_v63 = vadd.f32 %v2693_v34, %v2595_v41  ;;  %v2597_v46 = vadd.f32 %v9604_v42, %v2498_v4  ;;  %v2411_v6 = vpop.f32.mrf.mxu1  ;;  %v11340_v41 = vld [vmem:[#allocation26_spill] sm:$0xff]  ;;  %v2896_v4 = vmax.f32 %v11341_v51, %v2862_v18 }
 0x379   : > { %v1252_v42 = vrot.slane %v11340_v41, 3  ;;  %v2600_v25 = vadd.f32 %v9626_v52, %v2501_v23 }
 0x37a   : > { %v11265_v8 = vmax.f32 %v9687_v63, 0.0  ;;  %2732 = vmatmul.bf16.gmra.mxu0 %v1251_v9 }
 0x37b   : > { %v2929_v21 = vld [vmem:[#allocation2 + $0x72] sm:$0xff]  ;;  %v1253_v41 = vsel %vm1216_vm5, %v1250_v37, %v1252_v42 }
 0x37c   : > { %2795 = vst [vmem:[#allocation2 + $0x80] sm:$0xff] %v11265_v8  ;;  %v2963_v44 = vld [vmem:[#allocation2 + $0x73] sm:$0xff]  ;;  %v2404_v8 = vadd.f32 %v9637_v38, %v9405_v15  ;;  %v2609_v58 = vpop.f32.mrf.mxu3  ;;  %v2407_v15 = vadd.f32 %v9660_v50, %v9410_v26  ;;  %v11343_v26 = vmax.f32 %v9664_v29, 0.0 }
 0x37d   : > { %v2997_v27 = vmax.f32 %v2929_v21, %v2963_v44  ;;  %v2863_v42 = vld [vmem:[#allocation2 + $0x71] sm:$0xff] }
 0x37e   : > { %v2503_v30 = vadd.f32 %v9644_v11, %v2404_v8  ;;  %v2506_v8 = vadd.f32 %v9666_v19, %v2407_v15 }
 0x37f   : > { %v2695_v12 = vpop.f32.mrf.mxu0  ;;  %v3031_v56 = vmax.f32 %v2895_v55, %v2997_v27 }
 0x380   : > { %v9704_v14 = vadd.f32 %v2695_v12, %v2597_v46  ;;  %v2510_v12 = vpop.f32.mrf.mxu2  ;;  %v2413_v52 = vpop.f32.mrf.mxu1  ;;  %v2602_v62 = vadd.f32 %v9655_v22, %v2503_v30  ;;  %v11342_v22 = vmax.f32 %v9649_v32, 0.0  ;;  %v2409_v30 = vadd.f32 %v9691_v49, %v9413_v57 }
 0x381   : > { %v2412_v57 = vadd.f32 %v2411_v6, %v9418_v24  ;;  %v11345_v24 = vmax.f32 %v9687_v63, 0.0 }
 0x382   : > { %v11266_v43 = vmax.f32 %v9704_v14, 0.0  ;;  %v2508_v32 = vadd.f32 %v9695_v61, %v2409_v30  ;;  %v2414_v30 = vadd.f32 %v2413_v52, %v9421_v33  ;;  %v11349_v33 = vpack.c.bf16 %v9564_v60, %v9562_v28 }
 0x383   : > { %v2930_v34 = vld [vmem:[#allocation2 + $0x7a] sm:$0xff] }
 0x384   : > { %v2964_v9 = vld [vmem:[#allocation2 + $0x7b] sm:$0xff]  ;;  %2796 = vst [vmem:[#allocation2 + $0x88] sm:$0xff] %v11266_v43  ;;  %v2611_v55 = vpop.f32.mrf.mxu3  ;;  %v2607_v29 = vadd.f32 %v9700_v5, %v2508_v32 }
 0x385   : > { %v2998_v46 = vmax.f32 %v2930_v34, %v2964_v9  ;;  %v2864_v11 = vld [vmem:[#allocation2 + $0x79] sm:$0xff] }
 0x386   : > { %v2898_v50 = vmax.f32 %v11343_v26, %v2864_v11 }
 0x387   : > { %v3032_v21 = vmax.f32 %v2896_v4, %v2998_v46  ;;  %v2698_v44 = vpop.f32.mrf.mxu0  ;;  %v2897_v46 = vmax.f32 %v11342_v22, %v2863_v42  ;;  %v11344_v22 = vpack.c.bf16 %v9682_v16, %v9680_v35 }
 0x388   : > { %v9719_v48 = vadd.f32 %v2698_v44, %v2600_v25  ;;  %v2512_v18 = vpop.f32.mrf.mxu2  ;;  %v2416_v44 = vpop.f32.mrf.mxu1 }
 0x389   : > { %v3085_v43 = vpack.c.bf16 %v3032_v21, %v3031_v56  ;;  %v2605_v56 = vadd.f32 %v9677_v53, %v2506_v8 }
 0x38a   : > { %v2761_v40 = vmax.f32 %v9719_v48, 0.0  ;;  %2737 = vmatmul.bf16.gmra.mxu0 %v1253_v41 }
 0x38b   : > { %v2931_v23 = vld [vmem:[#allocation2 + $0x82] sm:$0xff] }
 0x38c   : > { %2797 = vst [vmem:[#allocation2 + $0x90] sm:$0xff] %v2761_v40  ;;  %v2965_v27 = vld [vmem:[#allocation2 + $0x83] sm:$0xff]  ;;  %v2614_v53 = vpop.f32.mrf.mxu3 }
 0x38d   : > { %v2999_v9 = vmax.f32 %v2931_v23, %v2965_v27 }
 0x38f   : > { %v2700_v37 = vpop.f32.mrf.mxu0  ;;  %v3033_v21 = vmax.f32 %v2897_v46, %v2999_v9  ;;  %v2865_v9 = vld [vmem:[#allocation2 + $0x81] sm:$0xff] }
 0x390   : > { %v9728_v38 = vadd.f32 %v2700_v37, %v2602_v62  ;;  %v2515_v23 = vpop.f32.mrf.mxu2  ;;  %v2418_v8 = vpop.f32.mrf.mxu1  ;;  %v2899_v6 = vmax.f32 %v11345_v24, %v2865_v9 }
 0x392   : > { %v2762_v34 = vmax.f32 %v9728_v38, 0.0 }
 0x393   : > { %v2932_v51 = vld [vmem:[#allocation2 + $0x8a] sm:$0xff] }
 0x394   : > { %v2966_v4 = vld [vmem:[#allocation2 + $0x8b] sm:$0xff]  ;;  %2798 = vst [vmem:[#allocation2 + $0x98] sm:$0xff] %v2762_v34 }
 0x395   : > { %v3000_v25 = vmax.f32 %v2932_v51, %v2966_v4  ;;  %v2866_v61 = vld [vmem:[#allocation2 + $0x89] sm:$0xff]  ;;  %v2511_v51 = vadd.f32 %v2510_v12, %v2412_v57 }
 0x397   : > { %v3034_v19 = vmax.f32 %v2898_v50, %v3000_v25  ;;  %v2703_v41 = vpop.f32.mrf.mxu0  ;;  %v11346_v50 = vmax.f32 %v9704_v14, 0.0  ;;  %v2513_v14 = vadd.f32 %v2512_v18, %v2414_v30  ;;  %v2417_v18 = vadd.f32 %v2416_v44, %v9426_v47 }
 0x398   : > { %v9741_v62 = vadd.f32 %v2703_v41, %v2605_v56  ;;  %v2517_v5 = vpop.f32.mrf.mxu2  ;;  %v2610_v56 = vadd.f32 %v2609_v58, %v2511_v51 }
 0x399   : > { %v3086_v37 = vpack.c.bf16 %v3034_v19, %v3033_v21  ;;  %v2900_v25 = vmax.f32 %v11346_v50, %v2866_v61  ;;  %v11347_v21 = vpack.c.bf16 %v9642_v3, %v9640_v31  ;;  %v2616_v19 = vpop.f32.mrf.mxu3  ;;  %v11348_v31 = vpack.c.bf16 %v9602_v17, %v9600_v59  ;;  %v2421_v3 = vpop.f32.mrf.mxu1 }
 0x39a   : > { %v2763_v27 = vmax.f32 %v9741_v62, 0.0  ;;  %v2516_v9 = vadd.f32 %v2515_v23, %v2417_v18 }
 0x39b   : > { %3225 = vmatpush.bf16.msra.mxu1 %v3086_v37  ;;  %v2933_v42 = vld [vmem:[#allocation2 + $0x92] sm:$0xff] }
 0x39c   : > { %2799 = vst [vmem:[#allocation2 + $0xa0] sm:$0xff] %v2763_v27  ;;  %v2967_v11 = vld [vmem:[#allocation2 + $0x93] sm:$0xff] }
 0x39d   : > { %v3001_v46 = vmax.f32 %v2933_v42, %v2967_v11  ;;  %v2867_v59 = vld [vmem:[#allocation2 + $0x91] sm:$0xff] }
 0x39e   : > { %v2901_v47 = vmax.f32 %v2761_v40, %v2867_v59 }
 0x39f   : > { %3226 = vmatpush.bf16.msra.mxu1 %v3085_v43  ;;  %v2705_v15 = vpop.f32.mrf.mxu0  ;;  %v9764_v35 = vmax.f32 %v2899_v6, %v3001_v46  ;;  %v2615_v46 = vadd.f32 %v2614_v53, %v2516_v9  ;;  %v2419_v6 = vadd.f32 %v2418_v8, %v9429_v13 }
 0x3a0   : > { %v9749_v49 = vadd.f32 %v2705_v15, %v2607_v29  ;;  %v2520_v32 = vpop.f32.mrf.mxu2  ;;  %v2612_v29 = vadd.f32 %v2611_v55, %v2513_v14  ;;  %v11350_v55 = vpack.c.bf16 %v9532_v54, %v9530_v39 }
 0x3a1   : > { %v2619_v57 = vpop.f32.mrf.mxu3  ;;  %v2423_v23 = vpop.f32.mrf.mxu1  ;;  %v2518_v38 = vadd.f32 %v2517_v5, %v2419_v6 }
 0x3a2   : > { %v2764_v4 = vmax.f32 %v9749_v49, 0.0  ;;  %v2424_v18 = vadd.f32 %v2423_v23, %v9437_v20 }
 0x3a3   : > { %3227 = vmatpush.bf16.msra.mxu1 %v11344_v22  ;;  %v2934_v43 = vld [vmem:[#allocation2 + $0x9a] sm:$0xff] }
 0x3a4   : > { %v2968_v26 = vld [vmem:[#allocation2 + $0x9b] sm:$0xff]  ;;  %2800 = vst [vmem:[#allocation2 + $0xa8] sm:$0xff] %v2764_v4 }
 0x3a5   : > { %v3002_v12 = vmax.f32 %v2934_v43, %v2968_v26  ;;  %v2868_v17 = vld [vmem:[#allocation2 + $0x99] sm:$0xff]  ;;  %v11351_v43 = vpack.c.bf16 %v9502_v7, %v9500_v45  ;;  %v2617_v45 = vadd.f32 %v2616_v19, %v2518_v38 }
 0x3a6   : > { %v2902_v44 = vmax.f32 %v2762_v34, %v2868_v17 }
 0x3a7   : > { %3228 = vmatpush.bf16.msra.mxu1 %v11347_v21  ;;  %v9766_v16 = vmax.f32 %v2900_v25, %v3002_v12  ;;  %v2708_v41 = vpop.f32.mrf.mxu0 }
 0x3a8   : > { %v9769_v37 = vadd.f32 %v2708_v41, %v2610_v56  ;;  %v2522_v26 = vpop.f32.mrf.mxu2  ;;  %v2422_v56 = vadd.f32 %v2421_v3, %v9434_v2 }
 0x3a9   : > { %v3087_v63 = vpack.c.bf16 %v9766_v16, %v9764_v35  ;;  %v2621_v53 = vpop.f32.mrf.mxu3  ;;  %v2426_v7 = vpop.f32.mrf.mxu1  ;;  %v8005_v35 = vld [vmem:[%s11216_s3 + $0x50] sm:$0xf0]  ;;  %v7998_v16 = vld [vmem:[%s11216_s3 + $0x1c] sm:$0xf] }
 0x3aa   : > { %v2765_v58 = vmax.f32 %v9769_v37, 0.0  ;;  %v2521_v30 = vadd.f32 %v2520_v32, %v2422_v56  ;;  %v2427_v20 = vadd.f32 %v2426_v7, %v9442_v36 }
 0x3ab   : > { %3229 = vmatpush.bf16.msra.mxu1 %v11348_v31  ;;  %v2935_v15 = vld [vmem:[#allocation2 + $0xa2] sm:$0xff] }
 0x3ac   : > { %2801 = vst [vmem:[#allocation2 + $0xb0] sm:$0xff] %v2765_v58  ;;  %v2969_v42 = vld [vmem:[#allocation2 + $0xa3] sm:$0xff] }
 0x3ad   : > { %v3003_v51 = vmax.f32 %v2935_v15, %v2969_v42  ;;  %v2869_v21 = vld [vmem:[#allocation2 + $0xa1] sm:$0xff] }
 0x3ae   : > { %v2903_v19 = vmax.f32 %v2763_v27, %v2869_v21  ;;  %v2523_v27 = vadd.f32 %v2522_v26, %v2424_v18 }
 0x3af   : > { %3230 = vmatpush.bf16.msra.mxu1 %v11349_v33  ;;  %v2710_v52 = vpop.f32.mrf.mxu0  ;;  %v9798_v39 = vmax.f32 %v2901_v47, %v3003_v51 }
 0x3b0   : > { %v9783_v11 = vadd.f32 %v2710_v52, %v2612_v29  ;;  %v2525_v8 = vpop.f32.mrf.mxu2  ;;  %v2620_v52 = vadd.f32 %v2619_v57, %v2521_v30  ;;  %v2622_v57 = vadd.f32 %v2621_v53, %v2523_v27 }
 0x3b1   : > { %v2624_v33 = vpop.f32.mrf.mxu3  ;;  %v2428_v62 = vpop.f32.mrf.mxu1 }
 0x3b2   : > { %v2766_v61 = vmax.f32 %v9783_v11, 0.0 }
 0x3b3   : > { %3231 = vmatpush.bf16.msra.mxu1 %v11350_v55  ;;  %v2936_v28 = vld [vmem:[#allocation2 + $0xaa] sm:$0xff] }
 0x3b4   : > { %v2970_v60 = vld [vmem:[#allocation2 + $0xab] sm:$0xff]  ;;  %2802 = vst [vmem:[#allocation2 + $0xb8] sm:$0xff] %v2766_v61 }
 0x3b5   : > { %v3004_v22 = vmax.f32 %v2936_v28, %v2970_v60  ;;  %v2870_v41 = vld [vmem:[#allocation2 + $0xa9] sm:$0xff] }
 0x3b6   : > { %v2904_v2 = vmax.f32 %v2764_v4, %v2870_v41 }
 0x3b7   : > { %3232 = vmatpush.bf16.msra.mxu1 %v11351_v43  ;;  %v9800_v54 = vmax.f32 %v2902_v44, %v3004_v22  ;;  %v2713_v24 = vpop.f32.mrf.mxu0  ;;  %v2526_v22 = vadd.f32 %v2525_v8, %v2427_v20 }
 0x3b8   : > { %v9803_v48 = vadd.f32 %v2713_v24, %v2615_v46  ;;  %v2527_v4 = vpop.f32.mrf.mxu2 }
 0x3b9   : > { %v3088_v40 = vpack.c.bf16 %v9800_v54, %v9798_v39  ;;  %v2626_v9 = vpop.f32.mrf.mxu3  ;;  %v2431_v43 = vpop.f32.mrf.mxu1  ;;  %v6920_v39 = vld [vmem:[%s11216_s3 + $0x38] sm:$0xf]  ;;  %v8003_v54 = vld [vmem:[%s11216_s3 + $0x40] sm:$0xf0] }
 0x3ba   : > { %v2767_v34 = vmax.f32 %v9803_v48, 0.0 }
 0x3bb   : > { %v2937_v25 = vld [vmem:[#allocation2 + $0xb2] sm:$0xff] }
 0x3bc   : > { %2803 = vst [vmem:[#allocation2 + $0xc0] sm:$0xff] %v2767_v34  ;;  %v2971_v12 = vld [vmem:[#allocation2 + $0xb3] sm:$0xff] }
 0x3bd   : > { %v3005_v14 = vmax.f32 %v2937_v25, %v2971_v12  ;;  %v2871_v47 = vld [vmem:[#allocation2 + $0xb1] sm:$0xff]  ;;  %v2429_v12 = vadd.f32 %v2428_v62, %v9445_v1  ;;  %v2432_v1 = vadd.f32 %v2431_v43, %v9450_v10 }
 0x3be   : > { %v2905_v6 = vmax.f32 %v2765_v58, %v2871_v47 }
 0x3bf   : > { %v2715_v50 = vpop.f32.mrf.mxu0  ;;  %v9820_v15 = vmax.f32 %v2903_v19, %v3005_v14  ;;  %v2528_v58 = vadd.f32 %v2527_v4, %v2429_v12 }
 0x3c0   : > { %v9811_v13 = vadd.f32 %v2715_v50, %v2617_v45  ;;  %v2530_v53 = vpop.f32.mrf.mxu2  ;;  %v2625_v45 = vadd.f32 %v2624_v33, %v2526_v22 }
 0x3c1   : > { %v2629_v37 = vpop.f32.mrf.mxu3  ;;  %v2627_v21 = vadd.f32 %v2626_v9, %v2528_v58 }
 0x3c2   : > { %v2768_v5 = vmax.f32 %v9811_v13, 0.0 }
 0x3c3   : > { %v2938_v31 = vld [vmem:[#allocation2 + $0xba] sm:$0xff] }
 0x3c4   : > { %v2972_v29 = vld [vmem:[#allocation2 + $0xbb] sm:$0xff]  ;;  %2804 = vst [vmem:[#allocation2 + $0xc8] sm:$0xff] %v2768_v5 }
 0x3c5   : > { %v3006_v3 = vmax.f32 %v2938_v31, %v2972_v29  ;;  %v2872_v44 = vld [vmem:[#allocation2 + $0xb9] sm:$0xff] }
 0x3c6   : > { %v2906_v36 = vmax.f32 %v2766_v61, %v2872_v44  ;;  %v2433_v61 = vpop.f32.mrf.mxu1 }
 0x3c7   : > { %v9822_v32 = vmax.f32 %v2904_v2, %v3006_v3  ;;  %v2718_v42 = vpop.f32.mrf.mxu0  ;;  %v2531_v3 = vadd.f32 %v2530_v53, %v2432_v1  ;;  %v2434_v20 = vadd.f32 %v2433_v61, %v9453_v0 }
 0x3c8   : > { %v9825_v59 = vadd.f32 %v2718_v42, %v2620_v52  ;;  %v2532_v41 = vpop.f32.mrf.mxu2 }
 0x3c9   : > { %v3089_v17 = vpack.c.bf16 %v9822_v32, %v9820_v15  ;;  %v2631_v42 = vpop.f32.mrf.mxu3  ;;  %v7995_v15 = vld [vmem:[%s11216_s3 + $0x4] sm:$0xf]  ;;  %v6890_v32 = vld [vmem:[%s11216_s3 + $0xc] sm:$0xf0] }
 0x3ca   : > { %v2769_v49 = vmax.f32 %v9825_v59, 0.0 }
 0x3cb   : > { %v2939_v51 = vld [vmem:[#allocation2 + $0xc2] sm:$0xff] }
 0x3cc   : > { %2805 = vst [vmem:[#allocation2 + $0xd0] sm:$0xff] %v2769_v49  ;;  %v2973_v28 = vld [vmem:[#allocation2 + $0xc3] sm:$0xff] }
 0x3cd   : > { %v3007_v46 = vmax.f32 %v2939_v51, %v2973_v28  ;;  %v2873_v19 = vld [vmem:[#allocation2 + $0xc1] sm:$0xff] }
 0x3ce   : > { %v2907_v27 = vmax.f32 %v2767_v34, %v2873_v19  ;;  %v2436_v51 = vpop.f32.mrf.mxu1  ;;  %v2533_v34 = vadd.f32 %v2532_v41, %v2434_v20 }
 0x3cf   : > { %v2720_v55 = vpop.f32.mrf.mxu0  ;;  %v9842_v7 = vmax.f32 %v2905_v6, %v3007_v46 }
 0x3d0   : > { %v9833_v60 = vadd.f32 %v2720_v55, %v2622_v57  ;;  %v2630_v57 = vadd.f32 %v2629_v37, %v2531_v3  ;;  %v2535_v48 = vpop.f32.mrf.mxu2  ;;  %v2632_v22 = vadd.f32 %v2631_v42, %v2533_v34  ;;  %v11353_v3 = vld [vmem:[#allocation24_spill] sm:$0xff] }
 0x3d2   : > { %v2770_v23 = vmax.f32 %v9833_v60, 0.0 }
 0x3d3   : > { %v2940_v26 = vld [vmem:[#allocation2 + $0xca] sm:$0xff] }
 0x3d4   : > { %v2974_v24 = vld [vmem:[#allocation2 + $0xcb] sm:$0xff]  ;;  %2806 = vst [vmem:[#allocation2 + $0xd8] sm:$0xff] %v2770_v23 }
 0x3d5   : > { %v3008_v38 = vmax.f32 %v2940_v26, %v2974_v24  ;;  %v2874_v2 = vld [vmem:[#allocation2 + $0xc9] sm:$0xff] }
 0x3d6   : > { %v2908_v10 = vmax.f32 %v2768_v5, %v2874_v2  ;;  %v2634_v5 = vpop.f32.mrf.mxu3  ;;  %v11352_v24 = vld [vmem:[#allocation23_spill] sm:$0xff] }
 0x3d7   : > { %v9844_v50 = vmax.f32 %v2906_v36, %v3008_v38  ;;  %v2723_v25 = vpop.f32.mrf.mxu0  ;;  %v2437_v6 = vadd.f32 %v2436_v51, %v11352_v24  ;;  %v2438_v36 = vpop.f32.mrf.mxu1 }
 0x3d8   : > { %v9847_v56 = vadd.f32 %v2723_v25, %v2625_v45  ;;  %v2537_v37 = vpop.f32.mrf.mxu2 }
 0x3d9   : > { %v3090_v8 = vpack.c.bf16 %v9844_v50, %v9842_v7  ;;  %v2536_v45 = vadd.f32 %v2535_v48, %v2437_v6  ;;  %v8002_v7 = vld [vmem:[%s11216_s3 + $0x38] sm:$0xf0] }
 0x3da   : > { %v2771_v11 = vmax.f32 %v9847_v56, 0.0 }
 0x3db   : > { %v2941_v14 = vld [vmem:[#allocation2 + $0xd2] sm:$0xff] }
 0x3dc   : > { %2807 = vst [vmem:[#allocation2 + $0xe0] sm:$0xff] %v2771_v11  ;;  %v2975_v31 = vld [vmem:[#allocation2 + $0xd3] sm:$0xff] }
 0x3dd   : > { %v3009_v52 = vmax.f32 %v2941_v14, %v2975_v31  ;;  %v2875_v38 = vld [vmem:[#allocation2 + $0xd1] sm:$0xff]  ;;  %v2635_v14 = vadd.f32 %v2634_v5, %v2536_v45 }
 0x3de   : > { %v2636_v19 = vpop.f32.mrf.mxu3 }
 0x3df   : > { %v2725_v30 = vpop.f32.mrf.mxu0  ;;  %v9864_v9 = vmax.f32 %v2907_v27, %v3009_v52  ;;  %v2439_v52 = vadd.f32 %v2438_v36, %v11353_v3  ;;  %v2441_v60 = vpop.f32.mrf.mxu1 }
 0x3e0   : > { %v9855_v29 = vadd.f32 %v2725_v30, %v2627_v21  ;;  %v2909_v21 = vmax.f32 %v2769_v49, %v2875_v38 }
 0x3e1   : > { %v2538_v59 = vadd.f32 %v2537_v37, %v2439_v52 }
 0x3e2   : > { %v2772_v33 = vmax.f32 %v9855_v29, 0.0 }
 0x3e3   : > { %v2942_v18 = vld [vmem:[#allocation2 + $0xda] sm:$0xff] }
 0x3e4   : > { %v2976_v62 = vld [vmem:[#allocation2 + $0xdb] sm:$0xff]  ;;  %2808 = vst [vmem:[#allocation2 + $0xe8] sm:$0xff] %v2772_v33 }
 0x3e5   : > { %v3010_v4 = vmax.f32 %v2942_v18, %v2976_v62  ;;  %v2876_v53 = vld [vmem:[#allocation2 + $0xd9] sm:$0xff]  ;;  %v2637_v62 = vadd.f32 %v2636_v19, %v2538_v59 }
 0x3e6   : > { %v2910_v41 = vmax.f32 %v2770_v23, %v2876_v53  ;;  %v2540_v23 = vpop.f32.mrf.mxu2  ;;  %v2639_v20 = vpop.f32.mrf.mxu3 }
 0x3e7   : > { %v9866_v55 = vmax.f32 %v2908_v10, %v3010_v4  ;;  %v2728_v28 = vpop.f32.mrf.mxu0  ;;  %v2443_v38 = vpop.f32.mrf.mxu1 }
 0x3e8   : > { %v9869_v47 = vadd.f32 %v2728_v28, %v2630_v57  ;;  %v11354_v57 = vld [vmem:[#allocation27_spill] sm:$0xff] }
 0x3e9   : > { %v3091_v44 = vpack.c.bf16 %v9866_v55, %v9864_v9  ;;  %v2442_v51 = vadd.f32 %v2441_v60, %v11354_v57  ;;  %v8000_v9 = vld [vmem:[%s11216_s3 + $0x28] sm:$0xf0]  ;;  %v6912_v55 = vld [vmem:[%s11216_s3 + $0x30] sm:$0xf] }
 0x3ea   : > { %v2773_v13 = vmax.f32 %v9869_v47, 0.0  ;;  %v6913_v50 = vor.u32 %v8002_v7, %v6912_v55  ;;  %v8034_v55 = vld [vmem:[%s11217_s4 + $0xa8] sm:$0xff] }
 0x3eb   : > { %v2943_v43 = vld [vmem:[#allocation2 + $0xe2] sm:$0xff]  ;;  %v2541_v5 = vadd.f32 %v2540_v23, %v2442_v51 }
 0x3ec   : > { %2809 = vst [vmem:[#allocation2 + $0xf0] sm:$0xff] %v2773_v13  ;;  %v2977_v26 = vld [vmem:[#allocation2 + $0xe3] sm:$0xff] }
 0x3ed   : > { %v3011_v12 = vmax.f32 %v2943_v43, %v2977_v26  ;;  %v2877_v48 = vld [vmem:[#allocation2 + $0xe1] sm:$0xff]  ;;  %v2640_v53 = vadd.f32 %v2639_v20, %v2541_v5 }
 0x3ee   : > { %v2911_v24 = vmax.f32 %v2771_v11, %v2877_v48  ;;  %v2542_v37 = vpop.f32.mrf.mxu2  ;;  %v6888_v51 = vld [vmem:[%s11216_s3] sm:$0xf]  ;;  %v8014_v7 = vld [vmem:[%s11217_s4 + $0x8] sm:$0xff] }
 0x3ef   : > { %v2730_v46 = vpop.f32.mrf.mxu0  ;;  %v9886_v31 = vmax.f32 %v2909_v21, %v3011_v12 }
 0x3f0   : > { %v9877_v0 = vadd.f32 %v2730_v46, %v2632_v22 }
 0x3f2   : > { %v2774_v25 = vmax.f32 %v9877_v0, 0.0 }
 0x3f3   : > { %v2944_v58 = vld [vmem:[#allocation2 + $0xea] sm:$0xff] }
 0x3f4   : > { %v2978_v61 = vld [vmem:[#allocation2 + $0xeb] sm:$0xff]  ;;  %2810 = vst [vmem:[#allocation2 + $0xf8] sm:$0xff] %v2774_v25 }
 0x3f5   : > { %v3012_v30 = vmax.f32 %v2944_v58, %v2978_v61  ;;  %v2878_v34 = vld [vmem:[#allocation2 + $0xe9] sm:$0xff]  ;;  %v11355_v61 = vld [vmem:[#allocation28_spill] sm:$0xff] }
 0x3f6   : > { %v2912_v6 = vmax.f32 %v2772_v33, %v2878_v34  ;;  %v2444_v21 = vadd.f32 %v2443_v38, %v11355_v61  ;;  %v8399_v38 = vmov 65535  }
 0x3f7   : > { %v9888_v1 = vmax.f32 %v2910_v41, %v3012_v30  ;;  %v2733_v2 = vpop.f32.mrf.mxu0 }
 0x3f8   : > { %v9891_v42 = vadd.f32 %v2733_v2, %v2635_v14  ;;  %v2543_v14 = vadd.f32 %v2542_v37, %v2444_v21  ;;  %v2641_v2 = vpop.f32.mrf.mxu3  ;;  %v7999_v21 = vld [vmem:[%s11216_s3 + $0x20] sm:$0xf0] }
 0x3f9   : > { %v3092_v18 = vpack.c.bf16 %v9888_v1, %v9886_v31  ;;  %v6908_v31 = vld [vmem:[%s11216_s3 + $0x20] sm:$0xf] }
 0x3fa   : > { %v2775_v49 = vmax.f32 %v9891_v42, 0.0  ;;  %v2642_v56 = vadd.f32 %v2641_v2, %v2543_v14  ;;  %v7997_v42 = vld [vmem:[%s11216_s3 + $0x10] sm:$0xf0]  ;;  %v8006_v2 = vld [vmem:[%s11216_s3 + $0x58] sm:$0xf0] }
 0x3fb   : > { %v2945_v10 = vld [vmem:[#allocation2 + $0xf2] sm:$0xff] }
 0x3fc   : > { %2811 = vst [vmem:[#allocation2 + $0x100] sm:$0xff] %v2775_v49  ;;  %v2979_v4 = vld [vmem:[#allocation2 + $0xf3] sm:$0xff] }
 0x3fd   : > { %v3013_v46 = vmax.f32 %v2945_v10, %v2979_v4  ;;  %v2879_v52 = vld [vmem:[#allocation2 + $0xf1] sm:$0xff] }
 0x3fe   : > { %v2913_v10 = vmax.f32 %v2773_v13, %v2879_v52 }
 0x3ff   : > { %v2735_v27 = vpop.f32.mrf.mxu0  ;;  %v3047_v45 = vmax.f32 %v2911_v24, %v3013_v46 }
 0x400   : > { %v2736_v28 = vadd.f32 %v2735_v27, %v2637_v62 }
 0x402   : > { %v2776_v22 = vmax.f32 %v2736_v28, 0.0  ;;  %v7996_v28 = vld [vmem:[%s11216_s3 + $0x8] sm:$0xf0] }
 0x403   : > { %v2946_v43 = vld [vmem:[#allocation2 + $0xfa] sm:$0xff]  ;;  %v6889_v34 = vor.u32 %v7996_v28, %v6888_v51  ;;  %v8011_v51 = vld [vmem:[%s11216_s3 + $0x80] sm:$0xf0] }
 0x404   : > { %v2980_v26 = vld [vmem:[#allocation2 + $0xfb] sm:$0xff]  ;;  %2812 = vst [vmem:[#allocation2 + $0x108] sm:$0xff] %v2776_v22 }
 0x405   : > { %v3014_v36 = vmax.f32 %v2946_v43, %v2980_v26  ;;  %v2880_v59 = vld [vmem:[#allocation2 + $0xf9] sm:$0xff]  ;;  %3233 = vmatmul.bf16.vlgmr.msra.gmra.mxu1 %v6889_v34  ;;  %v8007_v34 = vld [vmem:[%s11216_s3 + $0x64] sm:$0xf] }
 0x406   : > { %v2914_v4 = vmax.f32 %v2774_v25, %v2880_v59 }
 0x407   : > { %v3048_v12 = vmax.f32 %v2912_v6, %v3014_v36  ;;  %v2738_v58 = vpop.f32.mrf.mxu0 }
 0x408   : > { %v2739_v41 = vadd.f32 %v2738_v58, %v2640_v53  ;;  %v3220_v53 = vsel %vm1216_vm5, 4294967295, %v8399_v38  ;;  %v6896_v58 = vld [vmem:[%s11216_s3 + $0x8] sm:$0xf] }
 0x409   : > { %v3093_v30 = vpack.c.bf16 %v3048_v12, %v3047_v45  ;;  %v3221_v37 = vsel %vm1025_vm3, %v3220_v53, 0  ;;  %v8017_v53 = vld [vmem:[%s11217_s4 + $0x20] sm:$0xff] }
 0x40a   : > { %v2777_v19 = vmax.f32 %v2739_v41, 0.0 }
 0x40b   : > { %v2947_v3 = vld [vmem:[#allocation2 + $0x102] sm:$0xff] }
 0x40c   : > { %2813 = vst [vmem:[#allocation2 + $0x110] sm:$0xff] %v2777_v19  ;;  %v2981_v29 = vld [vmem:[#allocation2 + $0x103] sm:$0xff]  ;;  %v6932_v19 = vld [vmem:[%s11216_s3 + $0x50] sm:$0xf] }
 0x40d   : > { %v3015_v23 = vmax.f32 %v2947_v3, %v2981_v29  ;;  %v2881_v22 = vld [vmem:[#allocation2 + $0x101] sm:$0xff]  ;;  %v2882_v13 = vld [vmem:[#allocation2 + $0x109] sm:$0x7]  ;;  %v8001_v3 = vld [vmem:[%s11216_s3 + $0x34] sm:$0xf] }
 0x40e   : > { %v2848_v47 = vld [vmem:[#allocation2 + $0x108] sm:$0x7]  ;;  %v2915_v43 = vmax.f32 %v2775_v49, %v2881_v22  ;;  %v6900_v49 = vld [vmem:[%s11216_s3 + $0x18] sm:$0xf]  ;;  %v6914_v29 = vld [vmem:[%s11216_s3 + $0x3c] sm:$0xf0] }
 0x40f   : > { %v2740_v11 = vpop.f32.mrf.mxu0  ;;  %v3049_v20 = vmax.f32 %v2913_v10, %v3015_v23  ;;  %v2916_v6 = vmax.f32 %v2848_v47, %v2882_v13  ;;  %v6901_v14 = vor.u32 %v7999_v21, %v6900_v49  ;;  %v6917_v59 = vor.u32 %v8001_v3, %v6914_v29  ;;  %v8009_v23 = vld [vmem:[%s11216_s3 + $0x70] sm:$0xf0]  ;;  %v8010_v13 = vld [vmem:[%s11216_s3 + $0x7c] sm:$0xf] }
 0x410   : > { %v2741_v33 = vadd.f32 %v2740_v11, %v2642_v56  ;;  %v6936_v56 = vld [vmem:[%s11216_s3 + $0x60] sm:$0xf]  ;;  %v8008_v11 = vld [vmem:[%s11216_s3 + $0x68] sm:$0xf0]  ;;  %v8036_v49 = vld [vmem:[%s11217_s4 + $0xb8] sm:$0xff] }
 0x411   : > { %v6937_v52 = vor.u32 %v8008_v11, %v6936_v56  ;;  %v8016_v21 = vld [vmem:[%s11217_s4 + $0x18] sm:$0xff] }
 0x412   : > { %v2778_v60 = vmax.f32 %v2741_v33, 0.0  ;;  %v6933_v33 = vor.u32 %v8006_v2, %v6932_v19  ;;  %v8029_v19 = vld [vmem:[%s11217_s4 + $0x80] sm:$0xff] }
 0x413   : > { %v2948_v62 = vld [vmem:[#allocation2 + $0x10a] sm:$0xff] }
 0x414   : > { %v2982_v27 = vld [vmem:[#allocation2 + $0x10b] sm:$0xff]  ;;  %2814 = vst [vmem:[#allocation2 + $0x118] sm:$0x3f] %v2778_v60 }
 0x415   : > { %v3016_v57 = vmax.f32 %v2948_v62, %v2982_v27  ;;  %3238 = vmatmul.bf16.gmra.mxu1 %v6901_v14  ;;  %v6944_v60 = vld [vmem:[%s11216_s3 + $0x68] sm:$0xf]  ;;  %v8004_v62 = vld [vmem:[%s11216_s3 + $0x4c] sm:$0xf]  ;;  %v6926_v27 = vld [vmem:[%s11216_s3 + $0x54] sm:$0xf0] }
 0x416   : > { %v6945_v10 = vor.u32 %v8009_v23, %v6944_v60  ;;  %v8015_v14 = vld [vmem:[%s11217_s4 + $0x10] sm:$0xff] }
 0x417   : > { %v3050_v48 = vmax.f32 %v2914_v4, %v3016_v57  ;;  %v6929_v4 = vor.u32 %v8004_v62, %v6926_v27  ;;  %v6948_v57 = vld [vmem:[%s11216_s3 + $0x78] sm:$0xf] }
 0x418   : > { %v6949_v28 = vor.u32 %v8011_v51, %v6948_v57 }
 0x419   : > { %v3094_v5 = vpack.c.bf16 %v3050_v48, %v3049_v20  ;;  %v6956_v20 = vld [vmem:[%s11216_s3 + $0x80] sm:$0xf]  ;;  %v8012_v48 = vld [vmem:[%s11216_s3 + $0x88] sm:$0xf0] }
 0x41a   : > { %v6957_v22 = vor.u32 %v8012_v48, %v6956_v20 }
 0x41b   : > { %3268 = vmatpush.bf16.msra.mxu2 %v3094_v5  ;;  %v2949_v0 = vld [vmem:[#allocation2 + $0x112] sm:$0xff]  ;;  %v2950_v25 = vld [vmem:[#allocation2 + $0x11a] sm:$0x7] }
 0x41c   : > { %v2983_v46 = vld [vmem:[#allocation2 + $0x113] sm:$0xff]  ;;  %v2984_v26 = vld [vmem:[#allocation2 + $0x11b] sm:$0x7] }
 0x41d   : > { %v3017_v24 = vmax.f32 %v2949_v0, %v2983_v46  ;;  %v3018_v36 = vmax.f32 %v2950_v25, %v2984_v26  ;;  %v6938_v5 = vld [vmem:[%s11216_s3 + $0x6c] sm:$0xf0]  ;;  %v6950_v0 = vld [vmem:[%s11216_s3 + $0x84] sm:$0xf0]  ;;  %v8020_v46 = vld [vmem:[%s11217_s4 + $0x38] sm:$0xff] }
 0x41e   : > { %v6941_v47 = vor.u32 %v8007_v34, %v6938_v5  ;;  %v6953_v25 = vor.u32 %v8010_v13, %v6950_v0  ;;  %4333 = vmatpush.bf16.msrb.mxu1 %v8020_v46  ;;  %v8018_v26 = vld [vmem:[%s11217_s4 + $0x28] sm:$0xff] }
 0x41f   : > { %3269 = vmatpush.bf16.msra.mxu2 %v3093_v30  ;;  %v3051_v45 = vmax.f32 %v2915_v43, %v3017_v24  ;;  %v3052_v12 = vmax.f32 %v2916_v6, %v3018_v36  ;;  %v6897_v30 = vor.u32 %v7997_v42, %v6896_v58  ;;  %v8019_v43 = vld [vmem:[%s11217_s4 + $0x30] sm:$0xff]  ;;  %v3078_v36 = vld [vmem:[%s11216_s3 + $0x98] sm:$0x3] }
 0x420   : > { %v3077_v24 = vld [vmem:[%s11216_s3 + $0x90] sm:$0x33]  ;;  %v8028_v42 = vld [vmem:[%s11217_s4 + $0x78] sm:$0xff] }
 0x421   : > { %v3095_v61 = vpack.c.bf16 %v3052_v12, %v3051_v45  ;;  %v3159_v6 = vunpack.c.h.b16 %v3077_v24  ;;  %v3160_v12 = vunpack.c.l.b16 %v3078_v36 }
 0x422   : > { %4334 = vmatpush.bf16.msrb.mxu1 %v8019_v43 }
 0x423   : > { %3270 = vmatpush.bf16.msra.mxu2 %v3092_v18  ;;  %v3223_v41 = vand.u32 %v3221_v37, %v3095_v61  ;;  %v3180_v45 = vpack.c.b16 %v3159_v6, %v3159_v6  ;;  %v3158_v37 = vunpack.c.l.b16 %v3077_v24  ;;  %v3181_v58 = vpack.c.b16 %v3160_v12, %v3160_v12 }
 0x425   : > { %3318 = vmatpush.bf16.msra.mxu3 %v3223_v41  ;;  %3243 = vmatmul.bf16.gmra.mxu1 %v6913_v50  ;;  %v3179_v61 = vpack.c.b16 %v3158_v37, %v3158_v37  ;;  %v8027_v41 = vld [vmem:[%s11217_s4 + $0x70] sm:$0xff]  ;;  %v8013_v50 = vld [vmem:[%s11217_s4] sm:$0xff] }
 0x426   : > { %4335 = vmatpush.bf16.msrb.mxu1 %v8018_v26 }
 0x427   : > { %3271 = vmatpush.bf16.msra.mxu2 %v3091_v44  ;;  %v6921_v44 = vor.u32 %v8003_v54, %v6920_v39  ;;  %v8032_v39 = vld [vmem:[%s11217_s4 + $0x98] sm:$0xff] }
 0x428   : > { %6958 = vmatmul.msk.bf16.vlgmr.msra.gmra.mxu3 %vm3196_vm6, %v6897_v30  ;;  %v8035_v30 = vld [vmem:[%s11217_s4 + $0xb0] sm:$0xff] }
 0x429   : > { %4401 = vmatpush.bf16.msrb.mxu3 %v8036_v49 }
 0x42a   : > { %4336 = vmatpush.bf16.msrb.mxu1 %v8017_v53 }
 0x42b   : > { %3272 = vmatpush.bf16.msra.mxu2 %v3090_v8  ;;  %v6893_v8 = vor.u32 %v7995_v15, %v6890_v32  ;;  %v8025_v32 = vld [vmem:[%s11217_s4 + $0x60] sm:$0xff] }
 0x42d   : > { %4402 = vmatpush.bf16.msrb.mxu3 %v8035_v30 }
 0x42e   : > { %4337 = vmatpush.bf16.msrb.mxu1 %v8016_v21 }
 0x42f   : > { %3273 = vmatpush.bf16.msra.mxu2 %v3089_v17  ;;  %v6909_v17 = vor.u32 %v8000_v9, %v6908_v31  ;;  %v8026_v9 = vld [vmem:[%s11217_s4 + $0x68] sm:$0xff] }
 0x431   : > { %4403 = vmatpush.bf16.msrb.mxu3 %v8034_v55 }
 0x432   : > { %4338 = vmatpush.bf16.msrb.mxu1 %v8015_v14 }
 0x433   : > { %3274 = vmatpush.bf16.msra.mxu2 %v3088_v40  ;;  %v6924_v40 = vld [vmem:[%s11216_s3 + $0x48] sm:$0xf] }
 0x434   : > { %v6925_v1 = vor.u32 %v8005_v35, %v6924_v40  ;;  %v8023_v35 = vld [vmem:[%s11217_s4 + $0x50] sm:$0xff] }
 0x436   : > { %3248 = vmatmul.bf16.gmra.mxu1 %v6925_v1 }
 0x437   : > { %3275 = vmatpush.bf16.msra.mxu2 %v3087_v63  ;;  %v6902_v63 = vld [vmem:[%s11216_s3 + $0x24] sm:$0xf0]  ;;  %4339 = vmatpush.bf16.msrb.mxu1 %v8014_v7 }
 0x438   : > { %6959 = vmatmul.msk.bf16.gmra.mxu3 %vm3196_vm6, %v6909_v17  ;;  %v6905_v18 = vor.u32 %v7998_v16, %v6902_v63  ;;  %v8033_v17 = vld [vmem:[%s11217_s4 + $0xa0] sm:$0xff]  ;;  %v8031_v16 = vld [vmem:[%s11217_s4 + $0x90] sm:$0xff]  ;;  %v8022_v63 = vld [vmem:[%s11217_s4 + $0x48] sm:$0xff] }
 0x439   : > { %4404 = vmatpush.bf16.msrb.mxu3 %v8033_v17 }
 0x43a   : > { %3276 = vmatmul.bf16.vlgmr.msra.gmra.mxu2 %v6893_v8  ;;  %v8024_v8 = vld [vmem:[%s11217_s4 + $0x58] sm:$0xff] }
 0x43b   : > { %4367 = vmatpush.bf16.msrb.mxu2 %v8028_v42  ;;  %4340 = vmatpush.bf16.msrb.mxu1 %v8013_v50 }
 0x43d   : > { %4405 = vmatpush.bf16.msrb.mxu3 %v8032_v39 }
 0x43f   : > { %4368 = vmatpush.bf16.msrb.mxu2 %v8027_v41 }
 0x441   : > { %4406 = vmatpush.bf16.msrb.mxu3 %v8031_v16 }
 0x443   : > { %4369 = vmatpush.bf16.msrb.mxu2 %v8026_v9 }
 0x446   : > { %3253 = vmatmul.bf16.gmra.mxu1 %v6937_v52 }
 0x447   : > { %4370 = vmatpush.bf16.msrb.mxu2 %v8025_v32 }
 0x448   : > { %6960 = vmatmul.msk.bf16.gmra.mxu3 %vm3196_vm6, %v6921_v44  ;;  %v8030_v44 = vld [vmem:[%s11217_s4 + $0x88] sm:$0xff] }
 0x449   : > { %4407 = vmatpush.bf16.msrb.mxu3 %v8030_v44 }
 0x44a   : > { %3281 = vmatmul.bf16.gmra.mxu2 %v6905_v18  ;;  %v8021_v18 = vld [vmem:[%s11217_s4 + $0x40] sm:$0xff] }
 0x44b   : > { %4371 = vmatpush.bf16.msrb.mxu2 %v8024_v8 }
 0x44d   : > { %4408 = vmatpush.bf16.msrb.mxu3 %v8029_v19 }
 0x44f   : > { %4372 = vmatpush.bf16.msrb.mxu2 %v8023_v35  ;;  %v8044_v35 = vld [vmem:[%s11217_s4 + $0xf8] sm:$0xff] }
 0x450   : > { %4435 = vmatpush.bf16.msra.mxu1 %v8044_v35  ;;  %v8056_v35 = vld [vmem:[%s11217_s4 + $0x158] sm:$0xff] }
 0x453   : > { %4373 = vmatpush.bf16.msrb.mxu2 %v8022_v63 }
 0x456   : > { %3258 = vmatmul.bf16.gmra.mxu1 %v6949_v28 }
 0x457   : > { %4374 = vmatpush.bf16.msrb.mxu2 %v8021_v18 }
 0x458   : > { %6961 = vmatmul.msk.bf16.gmra.mxu3 %vm3196_vm6, %v6933_v33 }
 0x45a   : > { %3286 = vmatmul.bf16.gmra.mxu2 %v6917_v59 }
 0x466   : > { %3263 = vmatmul.bf16.gmra.mxu1 %v3179_v61 }
 0x468   : > { %6962 = vmatmul.msk.bf16.gmra.mxu3 %vm3196_vm6, %v6945_v10 }
 0x46a   : > { %3291 = vmatmul.bf16.gmra.mxu2 %v6929_v4 }
 0x478   : > { %6963 = vmatmul.msk.bf16.gmra.mxu3 %vm3196_vm6, %v6957_v22 }
 0x47a   : > { %3296 = vmatmul.bf16.gmra.mxu2 %v6941_v47 }
 0x482   : > { %v3234_v31 = vpop.f32.mrf.mxu1 }
 0x488   : > { %6964 = vmatmul.msk.bf16.gmra.mxu3 %vm3196_vm6, %v3181_v58 }
 0x48a   : > { %3301 = vmatmul.bf16.gmra.mxu2 %v6953_v25  ;;  %v3236_v54 = vpop.f32.mrf.mxu1 }
 0x492   : > { %v3239_v1 = vpop.f32.mrf.mxu1 }
 0x49a   : > { %3306 = vmatmul.bf16.gmra.mxu2 %v3180_v45  ;;  %v3241_v33 = vpop.f32.mrf.mxu1 }
 0x4a2   : > { %v3244_v28 = vpop.f32.mrf.mxu1 }
 0x4aa   : > { %v3246_v43 = vpop.f32.mrf.mxu1 }
 0x4ab   : > { %v3320_v15 = vpop.f32.mrf.mxu3 }
 0x4b3   : > { %v3322_v40 = vpop.f32.mrf.mxu3  ;;  %v3249_v55 = vpop.f32.mrf.mxu1 }
 0x4bb   : > { %v3325_v56 = vpop.f32.mrf.mxu3 }
 0x4bd   : > { %v3277_v2 = vpop.f32.mrf.mxu2 }
 0x4be   : > { %v3278_v11 = vadd.f32 %v3277_v2, %v3234_v31 }
 0x4c0   : > { %v3321_v3 = vadd.f32 %v3320_v15, %v3278_v11 }
 0x4c2   : > { %3354 = vst [vmem:[#allocation3] sm:$0xff] %v3321_v3  ;;  %v3377_v23 = vpack.c.bf16 %v3321_v3, %v3321_v3 }
 0x4c3   : > { %v3327_v59 = vpop.f32.mrf.mxu3 }
 0x4c4   : > { %v3525_v27 = vunpack.c.l.b16 %v3377_v23 }
 0x4c5   : > { %v3279_v29 = vpop.f32.mrf.mxu2 }
 0x4c6   : > { %v3280_v52 = vadd.f32 %v3279_v29, %v3236_v54 }
 0x4c8   : > { %v3323_v60 = vadd.f32 %v3322_v40, %v3280_v52  ;;  %v3251_v52 = vpop.f32.mrf.mxu1 }
 0x4ca   : > { %3355 = vst [vmem:[#allocation3 + $0x8] sm:$0xff] %v3323_v60  ;;  %v3378_v62 = vpack.c.bf16 %v3323_v60, %v3323_v60 }
 0x4cb   : > { %v3330_v48 = vpop.f32.mrf.mxu3 }
 0x4cc   : > { %v3526_v10 = vunpack.c.l.b16 %v3378_v62 }
 0x4cd   : > { %v3282_v4 = vpop.f32.mrf.mxu2 }
 0x4ce   : > { %v3283_v57 = vadd.f32 %v3282_v4, %v3239_v1  ;;  %v3535_v51 = vpack.c.b16 %v3526_v10, %v3525_v27 }
 0x4d0   : > { %v3326_v20 = vadd.f32 %v3325_v56, %v3283_v57  ;;  %4341 = vmatmul.bf16.vlgmr.msrb.gmra.mxu1 %v3535_v51  ;;  %v8042_v57 = vld [vmem:[%s11217_s4 + $0xe8] sm:$0xff]  ;;  %v8052_v51 = vld [vmem:[%s11217_s4 + $0x138] sm:$0xff] }
 0x4d1   : > { %v3387_v34 = vld [vmem:[#allocation3 + $0x1] sm:$0xff]  ;;  %4469 = vmatpush.bf16.msra.mxu2 %v8052_v51 }
 0x4d2   : > { %3356 = vst [vmem:[#allocation3 + $0x10] sm:$0xff] %v3326_v20  ;;  %v3407_v5 = vld [vmem:[#allocation3 + $0x2] sm:$0xff]  ;;  %v3397_v13 = vpack.c.bf16 %v3387_v34, %v3387_v34  ;;  %v3379_v46 = vpack.c.bf16 %v3326_v20, %v3326_v20 }
 0x4d3   : > { %v3417_v0 = vpack.c.bf16 %v3407_v5, %v3407_v5  ;;  %v3332_v45 = vpop.f32.mrf.mxu3  ;;  %v8041_v34 = vld [vmem:[%s11217_s4 + $0xe0] sm:$0xff]  ;;  %v8051_v5 = vld [vmem:[%s11217_s4 + $0x130] sm:$0xff] }
 0x4d4   : > { %v3555_v12 = vunpack.c.l.b16 %v3397_v13  ;;  %v3527_v42 = vunpack.c.l.b16 %v3379_v46 }
 0x4d5   : > { %v3284_v22 = vpop.f32.mrf.mxu2  ;;  %v3585_v37 = vunpack.c.l.b16 %v3417_v0  ;;  %4470 = vmatpush.bf16.msra.mxu2 %v8051_v5  ;;  %v3254_v0 = vpop.f32.mrf.mxu1 }
 0x4d6   : > { %v3285_v47 = vadd.f32 %v3284_v22, %v3241_v33  ;;  %v8043_v33 = vld [vmem:[%s11217_s4 + $0xf0] sm:$0xff] }
 0x4d7   : > { %4436 = vmatpush.bf16.msra.mxu1 %v8043_v33  ;;  %v8059_v22 = vld [vmem:[%s11217_s4 + $0x170] sm:$0xff] }
 0x4d8   : > { %v3328_v25 = vadd.f32 %v3327_v59, %v3285_v47 }
 0x4d9   : > { %v3388_v26 = vld [vmem:[#allocation3 + $0x9] sm:$0xff] }
 0x4da   : > { %v3408_v24 = vld [vmem:[#allocation3 + $0xa] sm:$0xff]  ;;  %3357 = vst [vmem:[#allocation3 + $0x18] sm:$0xff] %v3328_v25  ;;  %v3398_v6 = vpack.c.bf16 %v3388_v26, %v3388_v26  ;;  %v3380_v53 = vpack.c.bf16 %v3328_v25, %v3328_v25 }
 0x4db   : > { %v3418_v36 = vpack.c.bf16 %v3408_v24, %v3408_v24  ;;  %v3335_v17 = vpop.f32.mrf.mxu3  ;;  %4437 = vmatpush.bf16.msra.mxu1 %v8042_v57  ;;  %v8040_v24 = vld [vmem:[%s11217_s4 + $0xd8] sm:$0xff] }
 0x4dc   : > { %v3556_v58 = vunpack.c.l.b16 %v3398_v6  ;;  %v3528_v49 = vunpack.c.l.b16 %v3380_v53  ;;  %v8050_v6 = vld [vmem:[%s11217_s4 + $0x128] sm:$0xff] }
 0x4dd   : > { %v10124_v61 = vunpack.c.l.b16 %v3418_v36  ;;  %v3287_v21 = vpop.f32.mrf.mxu2  ;;  %v8058_v36 = vld [vmem:[%s11217_s4 + $0x168] sm:$0xff]  ;;  %4471 = vmatpush.bf16.msra.mxu2 %v8050_v6 }
 0x4de   : > { %v3288_v41 = vadd.f32 %v3287_v21, %v3244_v28  ;;  %v3565_v30 = vpack.c.b16 %v3556_v58, %v3555_v12  ;;  %v3536_v31 = vpack.c.b16 %v3528_v49, %v3527_v42  ;;  %v8060_v28 = vld [vmem:[%s11217_s4 + $0x178] sm:$0xff]  ;;  %v8039_v49 = vld [vmem:[%s11217_s4 + $0xd0] sm:$0xff] }
 0x4df   : > { %v3595_v14 = vpack.c.b16 %v10124_v61, %v3585_v37  ;;  %4503 = vmatpush.bf16.msra.mxu3 %v8060_v28  ;;  %4438 = vmatpush.bf16.msra.mxu1 %v8041_v34  ;;  %v8045_v28 = vld [vmem:[%s11217_s4 + $0x100] sm:$0xff] }
 0x4e0   : > { %v3331_v9 = vadd.f32 %v3330_v48, %v3288_v41  ;;  %4375 = vmatmul.bf16.vlgmr.msrb.gmra.mxu2 %v3565_v30  ;;  %4346 = vmatmul.bf16.gmra.mxu1 %v3536_v31  ;;  %v8049_v30 = vld [vmem:[%s11217_s4 + $0x120] sm:$0xff] }
 0x4e1   : > { %4409 = vmatmul.bf16.vlgmr.msrb.gmra.mxu3 %v3595_v14  ;;  %v3389_v7 = vld [vmem:[#allocation3 + $0x11] sm:$0xff]  ;;  %v8057_v14 = vld [vmem:[%s11217_s4 + $0x160] sm:$0xff]  ;;  %4472 = vmatpush.bf16.msra.mxu2 %v8049_v30 }
 0x4e2   : > { %3358 = vst [vmem:[#allocation3 + $0x20] sm:$0xff] %v3331_v9  ;;  %v3409_v15 = vld [vmem:[#allocation3 + $0x12] sm:$0xff]  ;;  %v3399_v8 = vpack.c.bf16 %v3389_v7, %v3389_v7  ;;  %v3381_v40 = vpack.c.bf16 %v3331_v9, %v3331_v9 }
 0x4e3   : > { %v3419_v39 = vpack.c.bf16 %v3409_v15, %v3409_v15  ;;  %v3337_v10 = vpop.f32.mrf.mxu3  ;;  %4504 = vmatpush.bf16.msra.mxu3 %v8059_v22  ;;  %4439 = vmatpush.bf16.msra.mxu1 %v8040_v24 }
 0x4e4   : > { %v3557_v19 = vunpack.c.l.b16 %v3399_v8  ;;  %v3529_v3 = vunpack.c.l.b16 %v3381_v40  ;;  %v8048_v40 = vld [vmem:[%s11217_s4 + $0x118] sm:$0xff] }
 0x4e5   : > { %v3289_v32 = vpop.f32.mrf.mxu2  ;;  %v10130_v2 = vunpack.c.l.b16 %v3419_v39  ;;  %4473 = vmatpush.bf16.msra.mxu2 %v8048_v40 }
 0x4e6   : > { %v3290_v50 = vadd.f32 %v3289_v32, %v3246_v43 }
 0x4e7   : > { %4505 = vmatpush.bf16.msra.mxu3 %v8058_v36  ;;  %4440 = vmatpush.bf16.msra.mxu1 %v8039_v49 }
 0x4e8   : > { %v3333_v54 = vadd.f32 %v3332_v45, %v3290_v50 }
 0x4e9   : > { %v3390_v16 = vld [vmem:[#allocation3 + $0x19] sm:$0xff] }
 0x4ea   : > { %v3410_v63 = vld [vmem:[#allocation3 + $0x1a] sm:$0xff]  ;;  %3359 = vst [vmem:[#allocation3 + $0x28] sm:$0xff] %v3333_v54  ;;  %v3400_v44 = vpack.c.bf16 %v3390_v16, %v3390_v16  ;;  %v3382_v18 = vpack.c.bf16 %v3333_v54, %v3333_v54  ;;  %v8038_v54 = vld [vmem:[%s11217_s4 + $0xc8] sm:$0xff]  ;;  %v3256_v16 = vpop.f32.mrf.mxu1 }
 0x4eb   : > { %v3420_v1 = vpack.c.bf16 %v3410_v63, %v3410_v63  ;;  %v3340_v53 = vpop.f32.mrf.mxu3  ;;  %4506 = vmatpush.bf16.msra.mxu3 %v8057_v14  ;;  %4441 = vmatpush.bf16.msra.mxu1 %v8038_v54  ;;  %v8037_v63 = vld [vmem:[%s11217_s4 + $0xc0] sm:$0xff] }
 0x4ec   : > { %v3558_v56 = vunpack.c.l.b16 %v3400_v44  ;;  %v3530_v29 = vunpack.c.l.b16 %v3382_v18  ;;  %v8055_v18 = vld [vmem:[%s11217_s4 + $0x150] sm:$0xff] }
 0x4ed   : > { %v10132_v11 = vunpack.c.l.b16 %v3420_v1  ;;  %v3292_v59 = vpop.f32.mrf.mxu2  ;;  %v8047_v1 = vld [vmem:[%s11217_s4 + $0x110] sm:$0xff] }
 0x4ee   : > { %v3293_v60 = vadd.f32 %v3292_v59, %v3249_v55  ;;  %v3566_v23 = vpack.c.b16 %v3558_v56, %v3557_v19  ;;  %v3537_v27 = vpack.c.b16 %v3530_v29, %v3529_v3  ;;  %4474 = vmatpush.bf16.msra.mxu2 %v8047_v1 }
 0x4ef   : > { %v3596_v62 = vpack.c.b16 %v10132_v11, %v10130_v2  ;;  %4507 = vmatpush.bf16.msra.mxu3 %v8056_v35  ;;  %4442 = vmatpush.bf16.msra.mxu1 %v8037_v63  ;;  %v3452_v63 = vld [vmem:[#allocation3 + $0x14] sm:$0xff] }
 0x4f0   : > { %v3336_v4 = vadd.f32 %v3335_v17, %v3293_v60  ;;  %4380 = vmatmul.bf16.gmra.mxu2 %v3566_v23  ;;  %4351 = vmatmul.bf16.gmra.mxu1 %v3537_v27  ;;  %v8046_v60 = vld [vmem:[%s11217_s4 + $0x108] sm:$0xff] }
 0x4f1   : > { %4414 = vmatmul.bf16.gmra.mxu3 %v3596_v62  ;;  %v3391_v20 = vld [vmem:[#allocation3 + $0x21] sm:$0xff] }
 0x4f2   : > { %3360 = vst [vmem:[#allocation3 + $0x30] sm:$0xff] %v3336_v4  ;;  %v3411_v48 = vld [vmem:[#allocation3 + $0x22] sm:$0xff]  ;;  %v3401_v25 = vpack.c.bf16 %v3391_v20, %v3391_v20  ;;  %v3383_v26 = vpack.c.bf16 %v3336_v4, %v3336_v4  ;;  %v3259_v62 = vpop.f32.mrf.mxu1  ;;  %4475 = vmatpush.bf16.msra.mxu2 %v8046_v60 }
 0x4f3   : > { %v3421_v46 = vpack.c.bf16 %v3411_v48, %v3411_v48  ;;  %v3342_v44 = vpop.f32.mrf.mxu3  ;;  %4508 = vmatpush.bf16.msra.mxu3 %v8055_v18  ;;  %v8054_v23 = vld [vmem:[%s11217_s4 + $0x148] sm:$0xff]  ;;  %v8053_v20 = vld [vmem:[%s11217_s4 + $0x140] sm:$0xff] }
 0x4f4   : > { %v3559_v21 = vunpack.c.l.b16 %v3401_v25  ;;  %v3531_v55 = vunpack.c.l.b16 %v3383_v26  ;;  %v3431_v18 = vld [vmem:[#allocation3 + $0xb] sm:$0xff] }
 0x4f5   : > { %v3294_v47 = vpop.f32.mrf.mxu2  ;;  %v10169_v41 = vunpack.c.l.b16 %v3421_v46 }
 0x4f6   : > { %v3295_v13 = vadd.f32 %v3294_v47, %v3251_v52  ;;  %4476 = vmatpush.bf16.msra.mxu2 %v8045_v28 }
 0x4f7   : > { %4509 = vmatpush.bf16.msra.mxu3 %v8054_v23 }
 0x4f8   : > { %v3338_v43 = vadd.f32 %v3337_v10, %v3295_v13 }
 0x4f9   : > { %v3392_v45 = vld [vmem:[#allocation3 + $0x29] sm:$0xff] }
 0x4fa   : > { %v3412_v12 = vld [vmem:[#allocation3 + $0x2a] sm:$0xff]  ;;  %3361 = vst [vmem:[#allocation3 + $0x38] sm:$0xff] %v3338_v43  ;;  %v3402_v37 = vpack.c.bf16 %v3392_v45, %v3392_v45  ;;  %v3384_v42 = vpack.c.bf16 %v3338_v43, %v3338_v43 }
 0x4fb   : > { %v3422_v58 = vpack.c.bf16 %v3412_v12, %v3412_v12  ;;  %v3345_v51 = vpop.f32.mrf.mxu3  ;;  %4510 = vmatpush.bf16.msra.mxu3 %v8053_v20  ;;  %v3433_v20 = vld [vmem:[#allocation3 + $0x1b] sm:$0xff] }
 0x4fc   : > { %v3560_v31 = vunpack.c.l.b16 %v3402_v37  ;;  %v3532_v7 = vunpack.c.l.b16 %v3384_v42 }
 0x4fd   : > { %v10177_v9 = vunpack.c.l.b16 %v3422_v58  ;;  %v3297_v15 = vpop.f32.mrf.mxu2 }
 0x4fe   : > { %v3298_v32 = vadd.f32 %v3297_v15, %v3254_v0  ;;  %v3567_v17 = vpack.c.b16 %v3560_v31, %v3559_v21  ;;  %v3538_v8 = vpack.c.b16 %v3532_v7, %v3531_v55 }
 0x4ff   : > { %v3597_v50 = vpack.c.b16 %v10177_v9, %v10169_v41 }
 0x500   : > { %v3341_v39 = vadd.f32 %v3340_v53, %v3298_v32  ;;  %4385 = vmatmul.bf16.gmra.mxu2 %v3567_v17  ;;  %4356 = vmatmul.bf16.gmra.mxu1 %v3538_v8  ;;  %v3261_v53 = vpop.f32.mrf.mxu1 }
 0x501   : > { %4419 = vmatmul.bf16.gmra.mxu3 %v3597_v50  ;;  %v3393_v56 = vld [vmem:[#allocation3 + $0x31] sm:$0xff] }
 0x502   : > { %3362 = vst [vmem:[#allocation3 + $0x40] sm:$0xff] %v3341_v39  ;;  %v3413_v3 = vld [vmem:[#allocation3 + $0x32] sm:$0xff]  ;;  %v3403_v52 = vpack.c.bf16 %v3393_v56, %v3393_v56  ;;  %v3385_v43 = vpack.c.bf16 %v3341_v39, %v3341_v39 }
 0x503   : > { %v3423_v59 = vpack.c.bf16 %v3413_v3, %v3413_v3  ;;  %v3347_v49 = vpop.f32.mrf.mxu3  ;;  %v3609_v3 = vpack.c.b16 %v10130_v2, %v10124_v61  ;;  %v3434_v61 = vld [vmem:[#allocation3 + $0x23] sm:$0xff] }
 0x504   : > { %v3561_v48 = vunpack.c.l.b16 %v3403_v52  ;;  %v3533_v37 = vunpack.c.l.b16 %v3385_v43  ;;  %v3454_v2 = vld [vmem:[#allocation3 + $0x24] sm:$0xff] }
 0x505   : > { %v3299_v19 = vpop.f32.mrf.mxu2  ;;  %v10211_v5 = vunpack.c.l.b16 %v3423_v59  ;;  %v3441_v59 = vpack.c.bf16 %v3431_v18, %v3431_v18  ;;  %v8081_v18 = vld [vmem:[%s11217_s4 + $0x220] sm:$0xff] }
 0x506   : > { %v3300_v29 = vadd.f32 %v3299_v19, %v3256_v16  ;;  %v3432_v16 = vld [vmem:[#allocation3 + $0x13] sm:$0xff] }
 0x507   : > { %v3451_v19 = vld [vmem:[#allocation3 + $0xc] sm:$0xff] }
 0x508   : > { %v3343_v33 = vadd.f32 %v3342_v44, %v3300_v29  ;;  %v3264_v40 = vpop.f32.mrf.mxu1  ;;  %v3442_v29 = vpack.c.bf16 %v3432_v16, %v3432_v16  ;;  %v3461_v60 = vpack.c.bf16 %v3451_v19, %v3451_v19  ;;  %v8062_v19 = vld [vmem:[%s11217_s4 + $0x188] sm:$0xff] }
 0x509   : > { %v3394_v27 = vld [vmem:[#allocation3 + $0x39] sm:$0xff] }
 0x50a   : > { %v3414_v10 = vld [vmem:[#allocation3 + $0x3a] sm:$0xff]  ;;  %3363 = vst [vmem:[#allocation3 + $0x48] sm:$0xff] %v3343_v33  ;;  %v3404_v4 = vpack.c.bf16 %v3394_v27, %v3394_v27  ;;  %v3462_v33 = vpack.c.bf16 %v3452_v63, %v3452_v63  ;;  %v3630_v23 = vunpack.c.l.b16 %v3442_v29 }
 0x50b   : > { %v3424_v57 = vpack.c.bf16 %v3414_v10, %v3414_v10  ;;  %v3350_v1 = vpop.f32.mrf.mxu3  ;;  %v3629_v10 = vunpack.c.l.b16 %v3441_v59  ;;  %v3437_v59 = vld [vmem:[#allocation3 + $0x3b] sm:$0xff] }
 0x50c   : > { %v3562_v34 = vunpack.c.l.b16 %v3404_v4  ;;  %v3659_v4 = vunpack.c.l.b16 %v3461_v60  ;;  %v3457_v60 = vld [vmem:[#allocation3 + $0x3c] sm:$0xff] }
 0x50d   : > { %v10213_v22 = vunpack.c.l.b16 %v3424_v57  ;;  %v3302_v47 = vpop.f32.mrf.mxu2 }
 0x50e   : > { %v3303_v13 = vadd.f32 %v3302_v47, %v3259_v62  ;;  %v3568_v0 = vpack.c.b16 %v3562_v34, %v3561_v48  ;;  %v10222_v62 = vunpack.c.l.b16 %v3462_v33  ;;  %v3453_v48 = vld [vmem:[#allocation3 + $0x1c] sm:$0xff]  ;;  %v3610_v34 = vpack.c.b16 %v10169_v41, %v10132_v11 }
 0x50f   : > { %v3598_v25 = vpack.c.b16 %v10213_v22, %v10211_v5  ;;  %v3444_v47 = vpack.c.bf16 %v3434_v61, %v3434_v61  ;;  %v3467_v61 = vpack.c.bf16 %v3457_v60, %v3457_v60  ;;  %v3496_v60 = vld [vmem:[#allocation3 + $0x1e] sm:$0xff] }
 0x510   : > { %v3346_v46 = vadd.f32 %v3345_v51, %v3303_v13  ;;  %4390 = vmatmul.bf16.gmra.mxu2 %v3568_v0  ;;  %v3266_v52 = vpop.f32.mrf.mxu1  ;;  %v3639_v51 = vpack.c.b16 %v3630_v23, %v3629_v10  ;;  %v3669_v28 = vpack.c.b16 %v10222_v62, %v3659_v4  ;;  %v3464_v13 = vpack.c.bf16 %v3454_v2, %v3454_v2  ;;  %v8061_v4 = vld [vmem:[%s11217_s4 + $0x180] sm:$0xff] }
 0x511   : > { %4424 = vmatmul.bf16.gmra.mxu3 %v3598_v25  ;;  %v3376_v26 = vld [vmem:[#allocation3 + $0x48] sm:$0x3f]  ;;  %v3443_v0 = vpack.c.bf16 %v3433_v20, %v3433_v20  ;;  %v3463_v25 = vpack.c.bf16 %v3453_v48, %v3453_v48  ;;  %v3632_v43 = vunpack.c.l.b16 %v3444_v47 }
 0x512   : > { %3364 = vst [vmem:[#allocation3 + $0x50] sm:$0xff] %v3346_v46  ;;  %v3386_v24 = vpack.c.bf16 %v3376_v26, %v3376_v26  ;;  %v3395_v6 = vld [vmem:[#allocation3 + $0x41] sm:$0xff]  ;;  %v3396_v36 = vld [vmem:[#allocation3 + $0x49] sm:$0x3f]  ;;  %v8068_v46 = vld [vmem:[%s11217_s4 + $0x1b8] sm:$0xff]  ;;  %v10230_v26 = vunpack.c.l.b16 %v3464_v13  ;;  %v10311_v13 = vunpack.c.l.b16 %v3467_v61 }
 0x513   : > { %v3415_v45 = vld [vmem:[#allocation3 + $0x42] sm:$0xff]  ;;  %v3416_v12 = vld [vmem:[#allocation3 + $0x4a] sm:$0x3f]  ;;  %v3405_v21 = vpack.c.bf16 %v3395_v6, %v3395_v6  ;;  %v3406_v30 = vpack.c.bf16 %v3396_v36, %v3396_v36  ;;  %v3352_v57 = vpop.f32.mrf.mxu3  ;;  %4537 = vmatpush.bf16.msrb.mxu1 %v8068_v46  ;;  %v3631_v6 = vunpack.c.l.b16 %v3443_v0  ;;  %v10235_v36 = vunpack.c.l.b16 %v3463_v25  ;;  %v10316_v0 = vld [vmem:[%s11218_s5] ss:$0 sm:$0xff] }
 0x514   : > { %v3534_v58 = vunpack.c.l.b16 %v3386_v24  ;;  %v3425_v55 = vpack.c.bf16 %v3415_v45, %v3415_v45  ;;  %v3426_v7 = vpack.c.bf16 %v3416_v12, %v3416_v12  ;;  %v8067_v24 = vld [vmem:[%s11217_s4 + $0x1b0] sm:$0xff]  ;;  %v8076_v45 = vld [vmem:[%s11217_s4 + $0x1f8] sm:$0xff]  ;;  %v3438_v29 = vld [vmem:[#allocation3 + $0x43] sm:$0xff] }
 0x515   : > { %v3304_v42 = vpop.f32.mrf.mxu2  ;;  %v3563_v32 = vunpack.c.l.b16 %v3405_v21  ;;  %v3564_v17 = vunpack.c.l.b16 %v3406_v30  ;;  %v3640_v11 = vpack.c.b16 %v3632_v43, %v3631_v6  ;;  %v3670_v41 = vpack.c.b16 %v10230_v26, %v10235_v36  ;;  %v8084_v12 = vld [vmem:[%s11217_s4 + $0x238] sm:$0xff]  ;;  %4571 = vmatpush.bf16.msrb.mxu2 %v8076_v45  ;;  %v3458_v33 = vld [vmem:[#allocation3 + $0x44] sm:$0xff]  ;;  %v8071_v57 = vld [vmem:[%s11217_s4 + $0x1d0] sm:$0xff] }
 0x516   : > { %v3305_v14 = vadd.f32 %v3304_v42, %v3261_v53  ;;  %v3539_v31 = vpack.c.b16 %v3534_v58, %v3533_v37  ;;  %v10217_v50 = vunpack.c.l.b16 %v3425_v55  ;;  %v3594_v8 = vunpack.c.l.b16 %v3426_v7  ;;  %v8066_v53 = vld [vmem:[%s11217_s4 + $0x1a8] sm:$0xff]  ;;  %v3436_v37 = vld [vmem:[#allocation3 + $0x33] sm:$0xff]  ;;  %4605 = vmatpush.bf16.msrb.mxu3 %v8084_v12 }
 0x517   : > { %v3569_v39 = vpack.c.b16 %v3564_v17, %v3563_v32  ;;  %4538 = vmatpush.bf16.msrb.mxu1 %v8067_v24  ;;  %v3456_v58 = vld [vmem:[#allocation3 + $0x34] sm:$0xff]  ;;  %v3435_v42 = vld [vmem:[#allocation3 + $0x2b] sm:$0xff]  ;;  %v3611_v21 = vpack.c.b16 %v10211_v5, %v10177_v9  ;;  %v3446_v30 = vpack.c.bf16 %v3436_v37, %v3436_v37  ;;  %v3468_v10 = vpack.c.bf16 %v3458_v33, %v3458_v33 }
 0x518   : > { %v3348_v15 = vadd.f32 %v3347_v49, %v3305_v14  ;;  %4361 = vmatmul.bf16.gmra.mxu1 %v3539_v31  ;;  %v3599_v54 = vpack.c.b16 %v3594_v8, %v10217_v50  ;;  %v3455_v49 = vld [vmem:[#allocation3 + $0x2c] sm:$0xff]  ;;  %v3466_v14 = vpack.c.bf16 %v3456_v58, %v3456_v58  ;;  %v8065_v31 = vld [vmem:[%s11217_s4 + $0x1a0] sm:$0xff]  ;;  %v8064_v5 = vld [vmem:[%s11217_s4 + $0x198] sm:$0xff]  ;;  %v3612_v23 = vpack.c.b16 %v10217_v50, %v10213_v22 }
 0x519   : > { %v8075_v55 = vld [vmem:[%s11217_s4 + $0x1f0] sm:$0xff]  ;;  %v3465_v32 = vpack.c.bf16 %v3455_v49, %v3455_v49  ;;  %v8074_v9 = vld [vmem:[%s11217_s4 + $0x1e8] sm:$0xff]  ;;  %v3634_v8 = vunpack.c.l.b16 %v3446_v30  ;;  %v10306_v2 = vunpack.c.l.b16 %v3468_v10 }
 0x51a   : > { %3365 = vst [vmem:[#allocation3 + $0x58] sm:$0xff] %v3348_v15  ;;  %v8083_v7 = vld [vmem:[%s11217_s4 + $0x230] sm:$0xff]  ;;  %v3445_v15 = vpack.c.bf16 %v3435_v42, %v3435_v42  ;;  %4572 = vmatpush.bf16.msrb.mxu2 %v8075_v55  ;;  %v8082_v17 = vld [vmem:[%s11217_s4 + $0x228] sm:$0xff] }
 0x51b   : > { %4539 = vmatpush.bf16.msrb.mxu1 %v8066_v53  ;;  %4606 = vmatpush.bf16.msrb.mxu3 %v8083_v7  ;;  %v8070_v22 = vld [vmem:[%s11217_s4 + $0x1c8] sm:$0xff]  ;;  %v3672_v46 = vpack.c.b16 %v10306_v2, %v10311_v13  ;;  %v3495_v10 = vld [vmem:[#allocation3 + $0x16] sm:$0xff] }
 0x51c   : > { %v8078_v20 = vld [vmem:[%s11217_s4 + $0x208] sm:$0xff] }
 0x51d   : > { %v3307_v35 = vpop.f32.mrf.mxu2  ;;  %v3427_v48 = vld [vmem:[#allocation3 + $0x4a] sm:$0xff] }
 0x51e   : > { %v3308_v44 = vadd.f32 %v3307_v35, %v3264_v40  ;;  %v10270_v40 = vunpack.c.l.b16 %v3465_v32  ;;  %4573 = vmatpush.bf16.msrb.mxu2 %v8074_v9  ;;  %v3429_v24 = vpack.c.bf16 %v3427_v48, %v3427_v48  ;;  %v3439_v30 = vld [vmem:[#allocation3 + $0x4b] sm:$0xff] }
 0x51f   : > { %4540 = vmatpush.bf16.msrb.mxu1 %v8065_v31  ;;  %4607 = vmatpush.bf16.msrb.mxu3 %v8082_v17  ;;  %v3449_v9 = vpack.c.bf16 %v3439_v30, %v3439_v30 }
 0x520   : > { %4395 = vmatmul.bf16.gmra.mxu2 %v3569_v39  ;;  %v3351_v56 = vadd.f32 %v3350_v1, %v3308_v44  ;;  %v10268_v39 = vunpack.c.l.b16 %v3466_v14  ;;  %v8063_v44 = vld [vmem:[%s11217_s4 + $0x190] sm:$0xff]  ;;  %v8073_v1 = vld [vmem:[%s11217_s4 + $0x1e0] sm:$0xff]  ;;  %v3607_v45 = vunpack.c.l.b16 %v3429_v24  ;;  %v3684_v30 = vpack.c.b16 %v10270_v40, %v10230_v26 }
 0x521   : > { %4429 = vmatmul.bf16.gmra.mxu3 %v3599_v54  ;;  %v3633_v54 = vunpack.c.l.b16 %v3445_v15  ;;  %v3440_v42 = vld [vmem:[#allocation3 + $0x53] sm:$0x3f] }
 0x522   : > { %3366 = vst [vmem:[#allocation3 + $0x60] sm:$0xf] %v3351_v56  ;;  %v3671_v63 = vpack.c.b16 %v10268_v39, %v10270_v40  ;;  %4574 = vmatpush.bf16.msrb.mxu2 %v8073_v1  ;;  %v8072_v56 = vld [vmem:[%s11217_s4 + $0x1d8] sm:$0xff]  ;;  %v3459_v14 = vld [vmem:[#allocation3 + $0x4c] sm:$0xff]  ;;  %v3450_v15 = vpack.c.bf16 %v3440_v42, %v3440_v42 }
 0x523   : > { %4541 = vmatpush.bf16.msrb.mxu1 %v8064_v5  ;;  %v3641_v16 = vpack.c.b16 %v3634_v8, %v3633_v54  ;;  %4608 = vmatpush.bf16.msrb.mxu3 %v8081_v18  ;;  %v3460_v49 = vld [vmem:[#allocation3 + $0x54] sm:$0x3f]  ;;  %v3469_v5 = vpack.c.bf16 %v3459_v14, %v3459_v14  ;;  %v3477_v42 = vld [vmem:[#allocation3 + $0x25] sm:$0xff] }
 0x524   : > { %v3470_v32 = vpack.c.bf16 %v3460_v49, %v3460_v49  ;;  %v3638_v8 = vunpack.c.l.b16 %v3450_v15  ;;  %v3497_v49 = vld [vmem:[#allocation3 + $0x26] sm:$0xff] }
 0x525   : > { %v3309_v27 = vpop.f32.mrf.mxu2  ;;  %v10330_v1 = vunpack.c.l.b16 %v3469_v5  ;;  %v3507_v15 = vpack.c.bf16 %v3497_v49, %v3497_v49 }
 0x526   : > { %4575 = vmatpush.bf16.msrb.mxu2 %v8072_v56  ;;  %v3448_v27 = vpack.c.bf16 %v3438_v29, %v3438_v29  ;;  %v3668_v54 = vunpack.c.l.b16 %v3470_v32 }
 0x527   : > { %4542 = vmatpush.bf16.msrb.mxu1 %v8063_v44  ;;  %v3637_v44 = vunpack.c.l.b16 %v3449_v9 }
 0x528   : > { %4443 = vmatmul.bf16.vlgmr.msra.gmra.mxu1 %v3609_v3  ;;  %v8080_v3 = vld [vmem:[%s11217_s4 + $0x218] sm:$0xff]  ;;  %v3636_v50 = vunpack.c.l.b16 %v3448_v27  ;;  %v3673_v56 = vpack.c.b16 %v3668_v54, %v10330_v1 }
 0x529   : > { %4609 = vmatpush.bf16.msrb.mxu3 %v8080_v3  ;;  %v3475_v27 = vld [vmem:[#allocation3 + $0x15] sm:$0xff] }
 0x52a   : > { %4576 = vmatpush.bf16.msrb.mxu2 %v8071_v57 }
 0x52b   : > { %4543 = vmatpush.bf16.msrb.mxu1 %v8062_v19  ;;  %v3643_v19 = vpack.c.b16 %v3638_v8, %v3637_v44 }
 0x52e   : > { %4577 = vmatpush.bf16.msrb.mxu2 %v8070_v22  ;;  %v3485_v22 = vpack.c.bf16 %v3475_v27, %v3475_v27 }
 0x52f   : > { %4544 = vmatpush.bf16.msrb.mxu1 %v8061_v4  ;;  %v3683_v4 = vpack.c.b16 %v10235_v36, %v10222_v62 }
 0x530   : > { %4477 = vmatmul.bf16.vlgmr.msra.gmra.mxu2 %v3639_v51  ;;  %v8079_v51 = vld [vmem:[%s11217_s4 + $0x210] sm:$0xff] }
 0x531   : > { %4511 = vmatmul.bf16.vlgmr.msra.gmra.mxu3 %v3669_v28  ;;  %v3447_v28 = vpack.c.bf16 %v3437_v59, %v3437_v59  ;;  %v3476_v59 = vld [vmem:[#allocation3 + $0x1d] sm:$0xff] }
 0x532   : > { %4610 = vmatpush.bf16.msrb.mxu3 %v8079_v51  ;;  %v3486_v51 = vpack.c.bf16 %v3476_v59, %v3476_v59 }
 0x533   : > { %v3635_v47 = vunpack.c.l.b16 %v3447_v28  ;;  %v3506_v28 = vpack.c.bf16 %v3496_v60, %v3496_v60  ;;  %v3479_v60 = vld [vmem:[#allocation3 + $0x35] sm:$0xff] }
 0x534   : > { %v3704_v48 = vunpack.c.l.b16 %v3486_v51 }
 0x535   : > { %v3642_v25 = vpack.c.b16 %v3636_v50, %v3635_v47  ;;  %v3505_v50 = vpack.c.bf16 %v3495_v10, %v3495_v10  ;;  %v3685_v10 = vpack.c.b16 %v10311_v13, %v10268_v39  ;;  %v3482_v13 = vld [vmem:[#allocation3 + $0x4d] sm:$0xff] }
 0x536   : > { %4611 = vmatpush.bf16.msrb.mxu3 %v8078_v20 }
 0x537   : > { %v3733_v24 = vunpack.c.l.b16 %v3505_v50 }
 0x538   : > { %4448 = vmatmul.bf16.gmra.mxu1 %v3610_v34  ;;  %v3428_v34 = vld [vmem:[#allocation3 + $0x52] sm:$0x3f] }
 0x539   : > { %v3430_v6 = vpack.c.bf16 %v3428_v34, %v3428_v34  ;;  %v3734_v34 = vunpack.c.l.b16 %v3506_v28  ;;  %v3489_v28 = vpack.c.bf16 %v3479_v60, %v3479_v60 }
 0x53b   : > { %v3608_v12 = vunpack.c.l.b16 %v3430_v6  ;;  %v3743_v36 = vpack.c.b16 %v3734_v34, %v3733_v24  ;;  %v3707_v34 = vunpack.c.l.b16 %v3489_v28 }
 0x53d   : > { %v3613_v55 = vpack.c.b16 %v3608_v12, %v3607_v45  ;;  %v3478_v12 = vld [vmem:[#allocation3 + $0x2d] sm:$0xff] }
 0x53e   : > { %v3488_v14 = vpack.c.bf16 %v3478_v12, %v3478_v12  ;;  %v3501_v12 = vld [vmem:[#allocation3 + $0x46] sm:$0xff] }
 0x540   : > { %4482 = vmatmul.bf16.gmra.mxu2 %v3640_v11  ;;  %v8069_v11 = vld [vmem:[%s11217_s4 + $0x1c0] sm:$0xff]  ;;  %v3706_v9 = vunpack.c.l.b16 %v3488_v14  ;;  %v3511_v14 = vpack.c.bf16 %v3501_v12, %v3501_v12 }
 0x541   : > { %4516 = vmatmul.bf16.gmra.mxu3 %v3670_v41  ;;  %v8077_v41 = vld [vmem:[%s11217_s4 + $0x200] sm:$0xff]  ;;  %4578 = vmatpush.bf16.msrb.mxu2 %v8069_v11 }
 0x542   : > { %4612 = vmatpush.bf16.msrb.mxu3 %v8077_v41 }
 0x548   : > { %4453 = vmatmul.bf16.gmra.mxu1 %v3611_v21 }
 0x54d   : > { %v4342_v35 = vpop.f32.mrf.mxu1 }
 0x54e   : > { %v4343_v53 = vadd.f32 %v10316_v0, %v4342_v35 }
 0x550   : > { %4487 = vmatmul.bf16.gmra.mxu2 %v3641_v16 }
 0x551   : > { %4521 = vmatmul.bf16.gmra.mxu3 %v3671_v63 }
 0x555   : > { %v4344_v52 = vpop.f32.mrf.mxu1 }
 0x556   : > { %v4345_v17 = vadd.f32 %v10316_v0, %v4344_v52 }
 0x558   : > { %4458 = vmatmul.bf16.gmra.mxu1 %v3612_v23 }
 0x55d   : > { %v4347_v43 = vpop.f32.mrf.mxu1 }
 0x55e   : > { %v4348_v29 = vadd.f32 %v10316_v0, %v4347_v43  ;;  %v3703_v43 = vunpack.c.l.b16 %v3485_v22 }
 0x560   : > { %4492 = vmatmul.bf16.gmra.mxu2 %v3642_v25  ;;  %v3713_v62 = vpack.c.b16 %v3704_v48, %v3703_v43 }
 0x561   : > { %4526 = vmatmul.bf16.gmra.mxu3 %v3672_v46 }
 0x563   : > { %v4376_v37 = vpop.f32.mrf.mxu2 }
 0x564   : > { %v4410_v58 = vpop.f32.mrf.mxu3  ;;  %v4377_v21 = vadd.f32 %v4376_v37, %v4343_v53  ;;  %v3498_v37 = vld [vmem:[#allocation3 + $0x2e] sm:$0xff] }
 0x565   : > { %v4349_v7 = vpop.f32.mrf.mxu1 }
 0x566   : > { %v10327_v31 = vadd.f32 %v4410_v58, %v4377_v21  ;;  %v4350_v20 = vadd.f32 %v10316_v0, %v4349_v7  ;;  %v3487_v7 = vpack.c.bf16 %v3477_v42, %v3477_v42  ;;  %v3686_v42 = vpack.c.b16 %v10330_v1, %v10306_v2 }
 0x568   : > { %4463 = vmatmul.bf16.gmra.mxu1 %v3613_v55  ;;  %v3508_v55 = vpack.c.bf16 %v3498_v37, %v3498_v37 }
 0x56a   : > { %v3736_v5 = vunpack.c.l.b16 %v3508_v55 }
 0x56b   : > { %v4378_v35 = vpop.f32.mrf.mxu2 }
 0x56c   : > { %v4412_v16 = vpop.f32.mrf.mxu3  ;;  %v4379_v63 = vadd.f32 %v4378_v35, %v4345_v17  ;;  %v3705_v35 = vunpack.c.l.b16 %v3487_v7 }
 0x56d   : > { %v4352_v3 = vpop.f32.mrf.mxu1 }
 0x56e   : > { %v10332_v18 = vadd.f32 %v4412_v16, %v4379_v63  ;;  %v4353_v11 = vadd.f32 %v10316_v0, %v4352_v3  ;;  %v3735_v16 = vunpack.c.l.b16 %v3507_v15 }
 0x570   : > { %4497 = vmatmul.bf16.gmra.mxu2 %v3643_v19  ;;  %v3714_v19 = vpack.c.b16 %v3706_v9, %v3705_v35  ;;  %v3744_v26 = vpack.c.b16 %v3736_v5, %v3735_v16  ;;  %v3471_v9 = vld [vmem:[#allocation3 + $0x54] sm:$0xff]  ;;  %v3472_v5 = vld [vmem:[#allocation3 + $0x5c] sm:$0x3f] }
 0x571   : > { %4531 = vmatmul.bf16.gmra.mxu3 %v3673_v56  ;;  %v3473_v16 = vpack.c.bf16 %v3471_v9, %v3471_v9  ;;  %v3474_v2 = vpack.c.bf16 %v3472_v5, %v3472_v5 }
 0x573   : > { %v4381_v33 = vpop.f32.mrf.mxu2  ;;  %v3681_v1 = vunpack.c.l.b16 %v3473_v16 }
 0x574   : > { %v4415_v52 = vpop.f32.mrf.mxu3  ;;  %v4382_v23 = vadd.f32 %v4381_v33, %v4348_v29  ;;  %v3480_v29 = vld [vmem:[#allocation3 + $0x3d] sm:$0xff] }
 0x575   : > { %v4354_v61 = vpop.f32.mrf.mxu1  ;;  %v3500_v33 = vld [vmem:[#allocation3 + $0x3e] sm:$0xff] }
 0x576   : > { %v10338_v57 = vadd.f32 %v4415_v52, %v4382_v23  ;;  %v4355_v32 = vadd.f32 %v10316_v0, %v4354_v61  ;;  %v3499_v23 = vld [vmem:[#allocation3 + $0x36] sm:$0xff]  ;;  %v3510_v51 = vpack.c.bf16 %v3500_v33, %v3500_v33  ;;  %v3504_v33 = vld [vmem:[#allocation3 + $0x5e] sm:$0x3f] }
 0x577   : > { %v3509_v61 = vpack.c.bf16 %v3499_v23, %v3499_v23 }
 0x578   : > { %4545 = vmatmul.bf16.vlgmr.msrb.gmra.mxu1 %v3683_v4  ;;  %v3490_v4 = vpack.c.bf16 %v3480_v29, %v3480_v29  ;;  %v3738_v50 = vunpack.c.l.b16 %v3510_v51 }
 0x57a   : > { %v3708_v22 = vunpack.c.l.b16 %v3490_v4 }
 0x57b   : > { %v4383_v47 = vpop.f32.mrf.mxu2 }
 0x57c   : > { %v4417_v25 = vpop.f32.mrf.mxu3  ;;  %v4384_v46 = vadd.f32 %v4383_v47, %v4350_v20  ;;  %v3737_v47 = vunpack.c.l.b16 %v3509_v61  ;;  %v3514_v61 = vpack.c.bf16 %v3504_v33, %v3504_v33 }
 0x57d   : > { %v4357_v41 = vpop.f32.mrf.mxu1 }
 0x57e   : > { %v10341_v6 = vadd.f32 %v4417_v25, %v4384_v46  ;;  %v4358_v40 = vadd.f32 %v10316_v0, %v4357_v41  ;;  %v3715_v46 = vpack.c.b16 %v3708_v22, %v3707_v34  ;;  %v3745_v43 = vpack.c.b16 %v3738_v50, %v3737_v47 }
 0x57f   : > { %v3742_v47 = vunpack.c.l.b16 %v3514_v61 }
 0x580   : > { %4579 = vmatmul.bf16.vlgmr.msrb.gmra.mxu2 %v3713_v62 }
 0x581   : > { %4613 = vmatmul.bf16.vlgmr.msrb.gmra.mxu3 %v3743_v36  ;;  %v3502_v36 = vld [vmem:[#allocation3 + $0x4e] sm:$0xff] }
 0x582   : > { %v3512_v49 = vpack.c.bf16 %v3502_v36, %v3502_v36 }
 0x583   : > { %v4386_v53 = vpop.f32.mrf.mxu2 }
 0x584   : > { %v4420_v45 = vpop.f32.mrf.mxu3  ;;  %v4387_v58 = vadd.f32 %v4386_v53, %v4353_v11  ;;  %v3481_v53 = vld [vmem:[#allocation3 + $0x45] sm:$0xff]  ;;  %v3740_v7 = vunpack.c.l.b16 %v3512_v49 }
 0x585   : > { %v10349_v63 = vpop.f32.mrf.mxu1 }
 0x586   : > { %v10344_v21 = vadd.f32 %v4420_v45, %v4387_v58  ;;  %v3492_v45 = vpack.c.bf16 %v3482_v13, %v3482_v13 }
 0x588   : > { %4550 = vmatmul.bf16.gmra.mxu1 %v3684_v30  ;;  %v3491_v30 = vpack.c.bf16 %v3481_v53, %v3481_v53  ;;  %v3710_v55 = vunpack.c.l.b16 %v3492_v45 }
 0x58b   : > { %v4388_v17 = vpop.f32.mrf.mxu2 }
 0x58c   : > { %v4422_v8 = vpop.f32.mrf.mxu3  ;;  %v4389_v54 = vadd.f32 %v4388_v17, %v4355_v32  ;;  %v3709_v17 = vunpack.c.l.b16 %v3491_v30 }
 0x58e   : > { %v10351_v44 = vadd.f32 %v4422_v8, %v4389_v54  ;;  %v3739_v8 = vunpack.c.l.b16 %v3511_v14 }
 0x590   : > { %4584 = vmatmul.bf16.gmra.mxu2 %v3714_v19  ;;  %v3746_v35 = vpack.c.b16 %v3740_v7, %v3739_v8  ;;  %v3682_v19 = vunpack.c.l.b16 %v3474_v2 }
 0x591   : > { %4618 = vmatmul.bf16.gmra.mxu3 %v3744_v26  ;;  %v3483_v26 = vld [vmem:[#allocation3 + $0x55] sm:$0xff] }
 0x592   : > { %v3493_v60 = vpack.c.bf16 %v3483_v26, %v3483_v26  ;;  %v3687_v28 = vpack.c.b16 %v3682_v19, %v3681_v1 }
 0x593   : > { %v4391_v56 = vpop.f32.mrf.mxu2 }
 0x594   : > { %v4425_v3 = vpop.f32.mrf.mxu3  ;;  %v4392_v52 = vadd.f32 %v4391_v56, %v4358_v40  ;;  %v3484_v40 = vld [vmem:[#allocation3 + $0x5d] sm:$0x3f]  ;;  %v3711_v22 = vunpack.c.l.b16 %v3493_v60 }
 0x595   : > { %v4362_v59 = vpop.f32.mrf.mxu1  ;;  %v3503_v56 = vld [vmem:[#allocation3 + $0x56] sm:$0xff]  ;;  %v3494_v23 = vpack.c.bf16 %v3484_v40, %v3484_v40 }
 0x596   : > { %v10354_v27 = vadd.f32 %v4425_v3, %v4392_v52  ;;  %v4363_v39 = vadd.f32 %v10316_v0, %v4362_v59 }
 0x597   : > { %v3712_v50 = vunpack.c.l.b16 %v3494_v23 }
 0x598   : > { %4555 = vmatmul.bf16.gmra.mxu1 %v3685_v10  ;;  %v3513_v10 = vpack.c.bf16 %v3503_v56, %v3503_v56 }
 0x599   : > { %v3717_v13 = vpack.c.b16 %v3712_v50, %v3711_v22 }
 0x59a   : > { %v3741_v34 = vunpack.c.l.b16 %v3513_v10 }
 0x59b   : > { %v10358_v20 = vpop.f32.mrf.mxu2 }
 0x59c   : > { %v10360_v48 = vpop.f32.mrf.mxu3 }
 0x59d   : > { %v10362_v25 = vpop.f32.mrf.mxu1 }
 0x5a0   : > { %4589 = vmatmul.bf16.gmra.mxu2 %v3715_v46 }
 0x5a1   : > { %4623 = vmatmul.bf16.gmra.mxu3 %v3745_v43 }
 0x5a3   : > { %v4396_v24 = vpop.f32.mrf.mxu2 }
 0x5a4   : > { %v4430_v62 = vpop.f32.mrf.mxu3  ;;  %v4397_v11 = vadd.f32 %v4396_v24, %v4363_v39  ;;  %v3747_v24 = vpack.c.b16 %v3742_v47, %v3741_v34 }
 0x5a5   : > { %v4444_v41 = vpop.f32.mrf.mxu1 }
 0x5a6   : > { %v10365_v37 = vadd.f32 %v4430_v62, %v4397_v11  ;;  %v4445_v58 = vadd.f32 %v4444_v41, %v10327_v31  ;;  %v3716_v31 = vpack.c.b16 %v3710_v55, %v3709_v17 }
 0x5a8   : > { %4560 = vmatmul.bf16.gmra.mxu1 %v3686_v42 }
 0x5ab   : > { %v10370_v15 = vpop.f32.mrf.mxu2 }
 0x5ac   : > { %v10372_v32 = vpop.f32.mrf.mxu3 }
 0x5ad   : > { %v10374_v54 = vpop.f32.mrf.mxu1 }
 0x5b0   : > { %4594 = vmatmul.bf16.gmra.mxu2 %v3716_v31 }
 0x5b1   : > { %4628 = vmatmul.bf16.gmra.mxu3 %v3746_v35 }
 0x5b3   : > { %v4478_v3 = vpop.f32.mrf.mxu2 }
 0x5b4   : > { %v4512_v29 = vpop.f32.mrf.mxu3  ;;  %v4479_v52 = vadd.f32 %v4478_v3, %v4445_v58 }
 0x5b5   : > { %v4449_v59 = vpop.f32.mrf.mxu1 }
 0x5b6   : > { %v4513_v4 = vadd.f32 %v4512_v29, %v4479_v52  ;;  %v4450_v51 = vadd.f32 %v4449_v59, %v10338_v57 }
 0x5b8   : > { %4565 = vmatmul.bf16.gmra.mxu1 %v3687_v28 }
 0x5bb   : > { %v4480_v46 = vpop.f32.mrf.mxu2 }
 0x5bc   : > { %v4514_v43 = vpop.f32.mrf.mxu3 }
 0x5bd   : > { %v4451_v39 = vpop.f32.mrf.mxu1 }
 0x5c0   : > { %4599 = vmatmul.bf16.gmra.mxu2 %v3717_v13 }
 0x5c1   : > { %4633 = vmatmul.bf16.gmra.mxu3 %v3747_v24 }
 0x5c3   : > { %v4483_v62 = vpop.f32.mrf.mxu2 }
 0x5c4   : > { %v4517_v36 = vpop.f32.mrf.mxu3  ;;  %v4484_v11 = vadd.f32 %v4483_v62, %v4450_v51 }
 0x5c5   : > { %v4454_v41 = vpop.f32.mrf.mxu1 }
 0x5c6   : > { %v4518_v53 = vadd.f32 %v4517_v36, %v4484_v11  ;;  %v4455_v57 = vadd.f32 %v4454_v41, %v10344_v21 }
 0x5cb   : > { %v4485_v45 = vpop.f32.mrf.mxu2 }
 0x5cc   : > { %v4519_v12 = vpop.f32.mrf.mxu3 }
 0x5cd   : > { %v10378_v58 = vpop.f32.mrf.mxu1 }
 0x5d3   : > { %v4488_v42 = vpop.f32.mrf.mxu2 }
 0x5d4   : > { %v4522_v49 = vpop.f32.mrf.mxu3  ;;  %v4489_v30 = vadd.f32 %v4488_v42, %v4455_v57  ;;  %v4452_v57 = vadd.f32 %v4451_v39, %v10341_v6 }
 0x5d5   : > { %v4459_v14 = vpop.f32.mrf.mxu1 }
 0x5d6   : > { %v4523_v55 = vadd.f32 %v4522_v49, %v4489_v30  ;;  %v4460_v7 = vadd.f32 %v4459_v14, %v10354_v27 }
 0x5db   : > { %v4490_v9 = vpop.f32.mrf.mxu2 }
 0x5dc   : > { %v10381_v5 = vpop.f32.mrf.mxu3 }
 0x5dd   : > { %v10383_v17 = vpop.f32.mrf.mxu1 }
 0x5e3   : > { %v4493_v8 = vpop.f32.mrf.mxu2 }
 0x5e4   : > { %v4527_v31 = vpop.f32.mrf.mxu3  ;;  %v4494_v35 = vadd.f32 %v4493_v8, %v4460_v7 }
 0x5e5   : > { %v4464_v21 = vpop.f32.mrf.mxu1 }
 0x5e6   : > { %v10385_v16 = vadd.f32 %v4527_v31, %v4494_v35  ;;  %v4465_v2 = vadd.f32 %v4464_v21, %v10365_v37  ;;  %v4447_v37 = vadd.f32 %v10374_v54, %v10332_v18 }
 0x5e8   : > { %v4481_v51 = vadd.f32 %v4480_v46, %v4447_v37  ;;  %v4486_v46 = vadd.f32 %v4485_v45, %v4452_v57  ;;  %v4457_v45 = vadd.f32 %v10378_v58, %v10351_v44  ;;  %v4360_v44 = vadd.f32 %v10316_v0, %v10349_v63 }
 0x5ea   : > { %v4515_v50 = vadd.f32 %v4514_v43, %v4481_v51  ;;  %v4520_v43 = vadd.f32 %v4519_v12, %v4486_v46  ;;  %v4491_v12 = vadd.f32 %v4490_v9, %v4457_v45 }
 0x5eb   : > { %v10388_v1 = vpop.f32.mrf.mxu2 }
 0x5ec   : > { %v10390_v19 = vpop.f32.mrf.mxu3 }
 0x5ed   : > { %v10392_v26 = vpop.f32.mrf.mxu1 }
 0x5f3   : > { %v4498_v27 = vpop.f32.mrf.mxu2 }
 0x5f4   : > { %v4532_v40 = vpop.f32.mrf.mxu3  ;;  %v4499_v56 = vadd.f32 %v4498_v27, %v4465_v2 }
 0x5f5   : > { %v4546_v3 = vpop.f32.mrf.mxu1 }
 0x5f6   : > { %v10394_v29 = vadd.f32 %v4532_v40, %v4499_v56  ;;  %v4547_v60 = vadd.f32 %v4546_v3, %v4513_v4 }
 0x5fb   : > { %v10396_v33 = vpop.f32.mrf.mxu2 }
 0x5fc   : > { %v10398_v52 = vpop.f32.mrf.mxu3 }
 0x5fd   : > { %v4548_v59 = vpop.f32.mrf.mxu1 }
 0x5fe   : > { %v4549_v47 = vadd.f32 %v4548_v59, %v4515_v50 }
 0x603   : > { %v4580_v23 = vpop.f32.mrf.mxu2 }
 0x604   : > { %v4614_v10 = vpop.f32.mrf.mxu3  ;;  %v4581_v28 = vadd.f32 %v4580_v23, %v4547_v60  ;;  %v4525_v23 = vadd.f32 %v10381_v5, %v4491_v12  ;;  %v4394_v5 = vadd.f32 %v10358_v20, %v4360_v44 }
 0x605   : > { %v4551_v61 = vpop.f32.mrf.mxu1 }
 0x606   : > { %v4615_v22 = vadd.f32 %v4614_v10, %v4581_v28  ;;  %v4552_v18 = vadd.f32 %v4551_v61, %v4518_v53  ;;  %v4428_v57 = vadd.f32 %v10360_v48, %v4394_v5 }
 0x608   : > { %v4639_v34 = vmax.f32 %v4615_v22, 0.0 }
 0x60a   : > { %4649 = vst [vmem:[#allocation4] sm:$0xff] %v4639_v34 }
 0x60b   : > { %v4582_v13 = vpop.f32.mrf.mxu2 }
 0x60c   : > { %v4616_v24 = vpop.f32.mrf.mxu3  ;;  %v4583_v62 = vadd.f32 %v4582_v13, %v4549_v47 }
 0x60d   : > { %v4553_v36 = vpop.f32.mrf.mxu1 }
 0x60e   : > { %v4617_v11 = vadd.f32 %v4616_v24, %v4583_v62  ;;  %v4554_v7 = vadd.f32 %v4553_v36, %v4520_v43 }
 0x610   : > { %v4640_v41 = vmax.f32 %v4617_v11, 0.0 }
 0x612   : > { %4650 = vst [vmem:[#allocation4 + $0x8] sm:$0xff] %v4640_v41 }
 0x613   : > { %v4585_v54 = vpop.f32.mrf.mxu2 }
 0x614   : > { %v4619_v4 = vpop.f32.mrf.mxu3  ;;  %v4586_v42 = vadd.f32 %v4585_v54, %v4552_v18 }
 0x615   : > { %v4556_v49 = vpop.f32.mrf.mxu1 }
 0x616   : > { %v10403_v30 = vadd.f32 %v4619_v4, %v4586_v42  ;;  %v4557_v21 = vadd.f32 %v4556_v49, %v4523_v55 }
 0x618   : > { %v4641_v14 = vmax.f32 %v10403_v30, 0.0 }
 0x619   : > { %v4668_v37 = vld [vmem:[#allocation4 + $0x1] sm:$0xff] }
 0x61a   : > { %4651 = vst [vmem:[#allocation4 + $0x10] sm:$0xff] %v4641_v14  ;;  %v4677_v9 = vmax.f32 %v4639_v34, %v4668_v37  ;;  %v4462_v34 = vadd.f32 %v10383_v17, %v4428_v57 }
 0x61b   : > { %v4587_v8 = vpop.f32.mrf.mxu2 }
 0x61c   : > { %v4621_v31 = vpop.f32.mrf.mxu3  ;;  %v4588_v35 = vadd.f32 %v4587_v8, %v4554_v7  ;;  %v4496_v46 = vadd.f32 %v10388_v1, %v4462_v34 }
 0x61d   : > { %v4558_v39 = vpop.f32.mrf.mxu1 }
 0x61e   : > { %v4622_v6 = vadd.f32 %v4621_v31, %v4588_v35  ;;  %v4559_v61 = vadd.f32 %v4558_v39, %v4525_v23  ;;  %v4530_v31 = vadd.f32 %v10390_v19, %v4496_v46  ;;  %v4365_v39 = vadd.f32 %v10316_v0, %v10362_v25 }
 0x620   : > { %v4642_v53 = vmax.f32 %v4622_v6, 0.0  ;;  %v4399_v12 = vadd.f32 %v10370_v15, %v4365_v39 }
 0x621   : > { %v4686_v56 = vld [vmem:[#allocation4 + $0xa] sm:$0xff] }
 0x622   : > { %4652 = vst [vmem:[#allocation4 + $0x18] sm:$0xff] %v4642_v53  ;;  %v4695_v3 = vld [vmem:[#allocation4 + $0xb] sm:$0xff] }
 0x623   : > { %v4590_v2 = vpop.f32.mrf.mxu2  ;;  %v4669_v60 = vld [vmem:[#allocation4 + $0x9] sm:$0xff]  ;;  %v4704_v28 = vmax.f32 %v4686_v56, %v4695_v3 }
 0x624   : > { %v4624_v27 = vpop.f32.mrf.mxu3  ;;  %v4591_v40 = vadd.f32 %v4590_v2, %v4557_v21  ;;  %v4678_v22 = vmax.f32 %v4640_v41, %v4669_v60 }
 0x625   : > { %v4561_v51 = vpop.f32.mrf.mxu1  ;;  %v10419_v62 = vmax.f32 %v4677_v9, %v4704_v28 }
 0x626   : > { %v10410_v59 = vadd.f32 %v4624_v27, %v4591_v40  ;;  %v4562_v41 = vadd.f32 %v4561_v51, %v10385_v16 }
 0x628   : > { %v4643_v10 = vmax.f32 %v10410_v59, 0.0 }
 0x629   : > { %v4687_v58 = vld [vmem:[#allocation4 + $0x12] sm:$0xff] }
 0x62a   : > { %v4696_v55 = vld [vmem:[#allocation4 + $0x13] sm:$0xff]  ;;  %4653 = vst [vmem:[#allocation4 + $0x20] sm:$0xff] %v4643_v10 }
 0x62b   : > { %v4705_v50 = vmax.f32 %v4687_v58, %v4696_v55  ;;  %v4592_v47 = vpop.f32.mrf.mxu2  ;;  %v4670_v35 = vld [vmem:[#allocation4 + $0x11] sm:$0xff] }
 0x62c   : > { %v4626_v13 = vpop.f32.mrf.mxu3  ;;  %v4593_v24 = vadd.f32 %v4592_v47, %v4559_v61  ;;  %v4679_v19 = vmax.f32 %v4641_v14, %v4670_v35 }
 0x62d   : > { %v10421_v36 = vmax.f32 %v4678_v22, %v4705_v50  ;;  %v4563_v54 = vpop.f32.mrf.mxu1 }
 0x62e   : > { %v4627_v11 = vadd.f32 %v4626_v13, %v4593_v24  ;;  %v4564_v45 = vadd.f32 %v4563_v54, %v4530_v31 }
 0x62f   : > { %v4727_v63 = vpack.c.bf16 %v10421_v36, %v10419_v62  ;;  %v4726_v62 = vld [vmem:[%s11219_s6 + $0x10] sm:$0x3] }
 0x630   : > { %v4644_v18 = vmax.f32 %v4627_v11, 0.0  ;;  %v4741_v36 = vunpack.c.l.b16 %v4726_v62  ;;  %v8138_v62 = vld [vmem:[%s11220_s7 + $0x198] sm:$0xff] }
 0x631   : > { %v4688_v43 = vld [vmem:[#allocation4 + $0x1a] sm:$0xff] }
 0x632   : > { %4654 = vst [vmem:[#allocation4 + $0x28] sm:$0xff] %v4644_v18  ;;  %v4697_v7 = vld [vmem:[#allocation4 + $0x1b] sm:$0xff] }
 0x633   : > { %v4595_v4 = vpop.f32.mrf.mxu2  ;;  %v4671_v8 = vld [vmem:[#allocation4 + $0x19] sm:$0xff]  ;;  %v4706_v16 = vmax.f32 %v4688_v43, %v4697_v7 }
 0x634   : > { %v4629_v20 = vpop.f32.mrf.mxu3  ;;  %v4596_v42 = vadd.f32 %v4595_v4, %v4562_v41  ;;  %v4680_v1 = vmax.f32 %v4642_v53, %v4671_v8  ;;  %v4433_v53 = vadd.f32 %v10372_v32, %v4399_v12 }
 0x635   : > { %v4566_v3 = vpop.f32.mrf.mxu1  ;;  %v10442_v37 = vmax.f32 %v4679_v19, %v4706_v16 }
 0x636   : > { %v10429_v49 = vadd.f32 %v4629_v20, %v4596_v42  ;;  %v4467_v23 = vadd.f32 %v10392_v26, %v4433_v53  ;;  %v4567_v30 = vadd.f32 %v4566_v3, %v10394_v29  ;;  %v8085_v53 = vld [vmem:[%s11219_s6] sm:$0xff] }
 0x638   : > { %v4645_v48 = vmax.f32 %v10429_v49, 0.0  ;;  %v4501_v51 = vadd.f32 %v10396_v33, %v4467_v23  ;;  %v8094_v49 = vld [vmem:[%s11220_s7 + $0x38] sm:$0xff] }
 0x639   : > { %v4689_v17 = vld [vmem:[#allocation4 + $0x22] sm:$0xff]  ;;  %v8110_v23 = vld [vmem:[%s11220_s7 + $0xb8] sm:$0xff] }
 0x63a   : > { %v4698_v6 = vld [vmem:[#allocation4 + $0x23] sm:$0xff]  ;;  %4655 = vst [vmem:[#allocation4 + $0x30] sm:$0xff] %v4645_v48  ;;  %v4535_v50 = vadd.f32 %v10398_v52, %v4501_v51  ;;  %5546 = vmatpush.bf16.msra.mxu2 %v8110_v23 }
 0x63b   : > { %v4707_v21 = vmax.f32 %v4689_v17, %v4698_v6  ;;  %v4597_v2 = vpop.f32.mrf.mxu2  ;;  %v4672_v9 = vld [vmem:[#allocation4 + $0x21] sm:$0xff] }
 0x63c   : > { %v4631_v27 = vpop.f32.mrf.mxu3  ;;  %v4598_v40 = vadd.f32 %v4597_v2, %v4564_v45  ;;  %v4681_v29 = vmax.f32 %v4643_v10, %v4672_v9  ;;  %v4757_v10 = vsel %vm4755_vm7, 4294967295, %v8399_v38  ;;  %v8109_v51 = vld [vmem:[%s11220_s7 + $0xb0] sm:$0xff]  ;;  %v8100_v9 = vld [vmem:[%s11220_s7 + $0x68] sm:$0xff] }
 0x63d   : > { %v10440_v56 = vmax.f32 %v4680_v1, %v4707_v21  ;;  %v4568_v61 = vpop.f32.mrf.mxu1  ;;  %v4758_v45 = vsel %vm4756_vm8, %v4757_v10, 0  ;;  %v8121_v10 = vld [vmem:[%s11220_s7 + $0x110] sm:$0xff]  ;;  %v8156_v23 = vld [vmem:[%s11220_s7 + $0x228] sm:$0xff] }
 0x63e   : > { %v4632_v0 = vadd.f32 %v4631_v27, %v4598_v40  ;;  %v4569_v5 = vadd.f32 %v4568_v61, %v4535_v50  ;;  %5547 = vmatpush.bf16.msra.mxu2 %v8109_v51  ;;  %v8116_v61 = vld [vmem:[%s11220_s7 + $0xe8] sm:$0xff]  ;;  %v8107_v50 = vld [vmem:[%s11220_s7 + $0xa0] sm:$0xff] }
 0x63f   : > { %v4728_v25 = vpack.c.bf16 %v10440_v56, %v10442_v37  ;;  %v8086_v56 = vld [vmem:[%s11219_s6 + $0x8] sm:$0xff] }
 0x640   : > { %v4646_v60 = vmax.f32 %v4632_v0, 0.0  ;;  %v8092_v37 = vld [vmem:[%s11220_s7 + $0x28] sm:$0xff] }
 0x641   : > { %v4690_v44 = vld [vmem:[#allocation4 + $0x2a] sm:$0xff] }
 0x642   : > { %4656 = vst [vmem:[#allocation4 + $0x38] sm:$0xff] %v4646_v60  ;;  %v4699_v58 = vld [vmem:[#allocation4 + $0x2b] sm:$0xff] }
 0x643   : > { %v4600_v14 = vpop.f32.mrf.mxu2  ;;  %v4673_v22 = vld [vmem:[#allocation4 + $0x29] sm:$0xff]  ;;  %v4708_v47 = vmax.f32 %v4690_v44, %v4699_v58  ;;  %v8088_v58 = vld [vmem:[%s11220_s7 + $0x8] sm:$0xff] }
 0x644   : > { %v4634_v15 = vpop.f32.mrf.mxu3  ;;  %v4601_v28 = vadd.f32 %v4600_v14, %v4567_v30  ;;  %v4682_v24 = vmax.f32 %v4644_v18, %v4673_v22  ;;  %v8118_v30 = vld [vmem:[%s11220_s7 + $0xf8] sm:$0xff]  ;;  %v8101_v44 = vld [vmem:[%s11220_s7 + $0x70] sm:$0xff]  ;;  %v8087_v22 = vld [vmem:[%s11220_s7] sm:$0xff] }
 0x645   : > { %v4717_v34 = vmax.f32 %v4681_v29, %v4708_v47  ;;  %v8102_v14 = vld [vmem:[%s11220_s7 + $0x78] sm:$0xff]  ;;  %5564 = vmatpush.bf16.msra.mxu3 %v8118_v30  ;;  %v8099_v47 = vld [vmem:[%s11220_s7 + $0x60] sm:$0xff]  ;;  %v8137_v30 = vld [vmem:[%s11220_s7 + $0x190] sm:$0xff] }
 0x646   : > { %v4635_v55 = vadd.f32 %v4634_v15, %v4601_v28  ;;  %5528 = vmatpush.bf16.msra.mxu1 %v8102_v14  ;;  %v8089_v15 = vld [vmem:[%s11220_s7 + $0x10] sm:$0xff]  ;;  %v8114_v29 = vld [vmem:[%s11220_s7 + $0xd8] sm:$0xff] }
 0x647   : > { %v8117_v28 = vld [vmem:[%s11220_s7 + $0xf0] sm:$0xff] }
 0x648   : > { %v4647_v32 = vmax.f32 %v4635_v55, 0.0  ;;  %v8108_v55 = vld [vmem:[%s11220_s7 + $0xa8] sm:$0xff] }
 0x649   : > { %v4691_v13 = vld [vmem:[#allocation4 + $0x32] sm:$0xff]  ;;  %5565 = vmatpush.bf16.msra.mxu3 %v8117_v28  ;;  %5548 = vmatpush.bf16.msra.mxu2 %v8108_v55  ;;  %v8129_v28 = vld [vmem:[%s11220_s7 + $0x150] sm:$0xff] }
 0x64a   : > { %v4700_v26 = vld [vmem:[#allocation4 + $0x33] sm:$0xff]  ;;  %4657 = vst [vmem:[#allocation4 + $0x40] sm:$0xff] %v4647_v32  ;;  %5529 = vmatpush.bf16.msra.mxu1 %v8101_v44 }
 0x64b   : > { %v4709_v33 = vmax.f32 %v4691_v13, %v4700_v26  ;;  %v4602_v11 = vpop.f32.mrf.mxu2  ;;  %v4674_v1 = vld [vmem:[#allocation4 + $0x31] sm:$0xff] }
 0x64c   : > { %v4603_v57 = vadd.f32 %v4602_v11, %v4569_v5  ;;  %v4636_v54 = vpop.f32.mrf.mxu3  ;;  %v4683_v12 = vmax.f32 %v4645_v48, %v4674_v1  ;;  %v8093_v48 = vld [vmem:[%s11220_s7 + $0x30] sm:$0xff]  ;;  %v8115_v32 = vld [vmem:[%s11220_s7 + $0xe0] sm:$0xff]  ;;  %v8126_v13 = vld [vmem:[%s11220_s7 + $0x138] sm:$0xff] }
 0x64d   : > { %v4718_v41 = vmax.f32 %v4682_v24, %v4709_v33  ;;  %5566 = vmatpush.bf16.msra.mxu3 %v8116_v61  ;;  %5549 = vmatpush.bf16.msra.mxu2 %v8107_v50  ;;  %v8106_v26 = vld [vmem:[%s11220_s7 + $0x98] sm:$0xff]  ;;  %v8125_v5 = vld [vmem:[%s11220_s7 + $0x130] sm:$0xff]  ;;  %v8124_v11 = vld [vmem:[%s11220_s7 + $0x128] sm:$0xff] }
 0x64e   : > { %v4637_v4 = vadd.f32 %v4636_v54, %v4603_v57  ;;  %5530 = vmatpush.bf16.msra.mxu1 %v8100_v9  ;;  %v8098_v24 = vld [vmem:[%s11220_s7 + $0x58] sm:$0xff]  ;;  %v8105_v33 = vld [vmem:[%s11220_s7 + $0x90] sm:$0xff]  ;;  %v8123_v54 = vld [vmem:[%s11220_s7 + $0x120] sm:$0xff] }
 0x64f   : > { %v4729_v20 = vpack.c.bf16 %v4718_v41, %v4717_v34  ;;  %v8113_v57 = vld [vmem:[%s11220_s7 + $0xd0] sm:$0xff]  ;;  %v8104_v41 = vld [vmem:[%s11220_s7 + $0x88] sm:$0xff] }
 0x650   : > { %v4648_v46 = vmax.f32 %v4637_v4, 0.0  ;;  %v8097_v34 = vld [vmem:[%s11220_s7 + $0x50] sm:$0xff]  ;;  %v8112_v4 = vld [vmem:[%s11220_s7 + $0xc8] sm:$0xff] }
 0x651   : > { %v4667_v52 = vld [vmem:[#allocation4 + $0x40] sm:$0x7]  ;;  %5567 = vmatpush.bf16.msra.mxu3 %v8115_v32  ;;  %5550 = vmatpush.bf16.msra.mxu2 %v8106_v26 }
 0x652   : > { %4658 = vst [vmem:[#allocation4 + $0x48] sm:$0x3f] %v4648_v46  ;;  %v4676_v42 = vld [vmem:[#allocation4 + $0x41] sm:$0x7]  ;;  %v4675_v35 = vld [vmem:[#allocation4 + $0x39] sm:$0xff]  ;;  %5531 = vmatpush.bf16.msra.mxu1 %v8099_v47  ;;  %v8122_v46 = vld [vmem:[%s11220_s7 + $0x118] sm:$0xff] }
 0x653   : > { %v4685_v31 = vmax.f32 %v4667_v52, %v4676_v42  ;;  %v4692_v17 = vld [vmem:[#allocation4 + $0x3a] sm:$0xff]  ;;  %v4684_v2 = vmax.f32 %v4646_v60, %v4675_v35  ;;  %v8090_v60 = vld [vmem:[%s11220_s7 + $0x18] sm:$0xff]  ;;  %v8149_v35 = vld [vmem:[%s11220_s7 + $0x1f0] sm:$0xff] }
 0x654   : > { %v4701_v6 = vld [vmem:[#allocation4 + $0x3b] sm:$0xff] }
 0x655   : > { %v4710_v27 = vmax.f32 %v4692_v17, %v4701_v6  ;;  %5568 = vmatpush.bf16.msra.mxu3 %v8114_v29  ;;  %5551 = vmatpush.bf16.msra.mxu2 %v8105_v33  ;;  %v8103_v52 = vld [vmem:[%s11220_s7 + $0x80] sm:$0xff]  ;;  %v8133_v17 = vld [vmem:[%s11220_s7 + $0x170] sm:$0xff]  ;;  %v8136_v26 = vld [vmem:[%s11220_s7 + $0x188] sm:$0xff] }
 0x656   : > { %5532 = vmatpush.bf16.msra.mxu1 %v8098_v24  ;;  %v8111_v42 = vld [vmem:[%s11220_s7 + $0xc0] sm:$0xff] }
 0x657   : > { %v4719_v3 = vmax.f32 %v4683_v12, %v4710_v27  ;;  %v8119_v27 = vld [vmem:[%s11220_s7 + $0x100] sm:$0xff]  ;;  %v8132_v12 = vld [vmem:[%s11220_s7 + $0x168] sm:$0xff] }
 0x659   : > { %v4694_v43 = vld [vmem:[#allocation4 + $0x4a] sm:$0x7]  ;;  %v4693_v8 = vld [vmem:[#allocation4 + $0x42] sm:$0xff]  ;;  %5569 = vmatpush.bf16.msra.mxu3 %v8113_v57  ;;  %5552 = vmatpush.bf16.msra.mxu2 %v8104_v41 }
 0x65a   : > { %v4703_v7 = vld [vmem:[#allocation4 + $0x4b] sm:$0x7]  ;;  %v4702_v18 = vld [vmem:[#allocation4 + $0x43] sm:$0xff]  ;;  %5533 = vmatpush.bf16.msra.mxu1 %v8097_v34 }
 0x65b   : > { %v4712_v59 = vmax.f32 %v4694_v43, %v4703_v7  ;;  %v4711_v39 = vmax.f32 %v4693_v8, %v4702_v18  ;;  %v8095_v7 = vld [vmem:[%s11220_s7 + $0x40] sm:$0xff]  ;;  %v8142_v8 = vld [vmem:[%s11220_s7 + $0x1b8] sm:$0xff]  ;;  %v8141_v18 = vld [vmem:[%s11220_s7 + $0x1b0] sm:$0xff] }
 0x65d   : > { %v4721_v16 = vmax.f32 %v4685_v31, %v4712_v59  ;;  %v4720_v40 = vmax.f32 %v4684_v2, %v4711_v39  ;;  %5570 = vmatpush.bf16.msra.mxu3 %v8112_v4  ;;  %v8150_v31 = vld [vmem:[%s11220_s7 + $0x1f8] sm:$0xff]  ;;  %5553 = vmatpush.bf16.msra.mxu2 %v8103_v52  ;;  %v8128_v52 = vld [vmem:[%s11220_s7 + $0x148] sm:$0xff] }
 0x65e   : > { %v8134_v59 = vld [vmem:[%s11220_s7 + $0x178] sm:$0xff] }
 0x65f   : > { %v4731_v21 = vpack.c.bf16 %v4721_v16, %v4721_v16  ;;  %v4730_v0 = vpack.c.bf16 %v4720_v40, %v4719_v3  ;;  %v8120_v16 = vld [vmem:[%s11220_s7 + $0x108] sm:$0xff]  ;;  %v8158_v3 = vld [vmem:[%s11220_s7 + $0x238] sm:$0xff] }
 0x661   : > { %v4760_v19 = vand.u32 %v4758_v45, %v4731_v21  ;;  %5571 = vmatpush.bf16.msra.mxu3 %v8111_v42  ;;  %5618 = vmatpush.bf16.msrb.mxu2 %v8142_v8  ;;  %v8140_v45 = vld [vmem:[%s11220_s7 + $0x1a8] sm:$0xff]  ;;  %v8143_v8 = vld [vmem:[%s11220_s7 + $0x1c0] sm:$0xff] }
 0x663   : > { %4765 = vmatpush.bf16.msrb.mxu0 %v4760_v19  ;;  %v8148_v19 = vld [vmem:[%s11220_s7 + $0x1e8] sm:$0xff] }
 0x665   : > { %5636 = vmatpush.bf16.msrb.mxu3 %v8150_v31  ;;  %5619 = vmatpush.bf16.msrb.mxu2 %v8141_v18 }
 0x667   : > { %4766 = vmatpush.bf16.msrb.mxu0 %v4730_v0  ;;  %v8139_v0 = vld [vmem:[%s11220_s7 + $0x1a0] sm:$0xff] }
 0x669   : > { %5637 = vmatpush.bf16.msrb.mxu3 %v8149_v35  ;;  %5620 = vmatpush.bf16.msrb.mxu2 %v8140_v45 }
 0x66b   : > { %4767 = vmatpush.bf16.msrb.mxu0 %v4729_v20  ;;  %v8096_v20 = vld [vmem:[%s11220_s7 + $0x48] sm:$0xff] }
 0x66c   : > { %5534 = vmatpush.bf16.msra.mxu1 %v8096_v20 }
 0x66d   : > { %5638 = vmatpush.bf16.msrb.mxu3 %v8148_v19  ;;  %5621 = vmatpush.bf16.msrb.mxu2 %v8139_v0  ;;  %v8151_v0 = vld [vmem:[%s11220_s7 + $0x200] sm:$0xff] }
 0x66f   : > { %4768 = vmatpush.bf16.msrb.mxu0 %v4728_v25  ;;  %v8091_v25 = vld [vmem:[%s11220_s7 + $0x20] sm:$0xff] }
 0x670   : > { %5535 = vmatpush.bf16.msra.mxu1 %v8095_v7  ;;  %v8135_v7 = vld [vmem:[%s11220_s7 + $0x180] sm:$0xff] }
 0x671   : > { %5622 = vmatpush.bf16.msrb.mxu2 %v8138_v62 }
 0x673   : > { %4769 = vmatpush.bf16.msrb.mxu0 %v4727_v63  ;;  %v4744_v63 = vpack.c.b16 %v4741_v36, %v4741_v36  ;;  %v8146_v36 = vld [vmem:[%s11220_s7 + $0x1d8] sm:$0xff] }
 0x674   : > { %5600 = vmatpush.bf16.msrb.mxu1 %v8134_v59  ;;  %v8153_v59 = vld [vmem:[%s11220_s7 + $0x210] sm:$0xff] }
 0x675   : > { %5623 = vmatpush.bf16.msrb.mxu2 %v8137_v30 }
 0x676   : > { %7261 = vmatmul.msk.bf16.vlgmr.msrb.gmra.mxu0 %vm4745_vm9, %v8085_v53  ;;  %v8147_v53 = vld [vmem:[%s11220_s7 + $0x1e0] sm:$0xff] }
 0x677   : > { %5510 = vmatpush.bf16.msra.mxu0 %v8094_v49  ;;  %5639 = vmatpush.bf16.msrb.mxu3 %v8147_v53 }
 0x678   : > { %5601 = vmatpush.bf16.msrb.mxu1 %v8133_v17 }
 0x679   : > { %5624 = vmatpush.bf16.msrb.mxu2 %v8136_v26 }
 0x67b   : > { %5511 = vmatpush.bf16.msra.mxu0 %v8093_v48  ;;  %v8157_v48 = vld [vmem:[%s11220_s7 + $0x230] sm:$0xff]  ;;  %5640 = vmatpush.bf16.msrb.mxu3 %v8146_v36 }
 0x67c   : > { %5602 = vmatpush.bf16.msrb.mxu1 %v8132_v12 }
 0x67d   : > { %5625 = vmatpush.bf16.msrb.mxu2 %v8135_v7 }
 0x67f   : > { %5512 = vmatpush.bf16.msra.mxu0 %v8092_v37  ;;  %v8130_v37 = vld [vmem:[%s11220_s7 + $0x158] sm:$0xff] }
 0x683   : > { %5513 = vmatpush.bf16.msra.mxu0 %v8091_v25 }
 0x686   : > { %7262 = vmatmul.msk.bf16.gmra.mxu0 %vm4745_vm9, %v8086_v56  ;;  %v8131_v56 = vld [vmem:[%s11220_s7 + $0x160] sm:$0xff] }
 0x687   : > { %5514 = vmatpush.bf16.msra.mxu0 %v8090_v60  ;;  %5603 = vmatpush.bf16.msrb.mxu1 %v8131_v56 }
 0x68b   : > { %5515 = vmatpush.bf16.msra.mxu0 %v8089_v15  ;;  %v8145_v15 = vld [vmem:[%s11220_s7 + $0x1d0] sm:$0xff]  ;;  %5604 = vmatpush.bf16.msrb.mxu1 %v8130_v37 }
 0x68c   : > { %5641 = vmatpush.bf16.msrb.mxu3 %v8145_v15 }
 0x68f   : > { %5516 = vmatpush.bf16.msra.mxu0 %v8088_v58  ;;  %5605 = vmatpush.bf16.msrb.mxu1 %v8129_v28 }
 0x693   : > { %5517 = vmatpush.bf16.msra.mxu0 %v8087_v22  ;;  %5606 = vmatpush.bf16.msrb.mxu1 %v8128_v52 }
 0x696   : > { %7263 = vmatmul.msk.bf16.gmra.mxu0 %vm4745_vm9, %v4744_v63 }
 0x697   : > { %5582 = vmatpush.bf16.msrb.mxu0 %v8126_v13  ;;  %v8155_v13 = vld [vmem:[%s11220_s7 + $0x220] sm:$0xff] }
 0x69b   : > { %5583 = vmatpush.bf16.msrb.mxu0 %v8125_v5 }
 0x69f   : > { %5584 = vmatpush.bf16.msrb.mxu0 %v8124_v11 }
 0x6a3   : > { %5585 = vmatpush.bf16.msrb.mxu0 %v8123_v54  ;;  %v8144_v54 = vld [vmem:[%s11220_s7 + $0x1c8] sm:$0xff] }
 0x6a4   : > { %5642 = vmatpush.bf16.msrb.mxu3 %v8144_v54 }
 0x6a7   : > { %5586 = vmatpush.bf16.msrb.mxu0 %v8122_v46 }
 0x6a8   : > { %5643 = vmatpush.bf16.msrb.mxu3 %v8143_v8 }
 0x6ab   : > { %5587 = vmatpush.bf16.msrb.mxu0 %v8121_v10  ;;  %v8127_v10 = vld [vmem:[%s11220_s7 + $0x140] sm:$0xff] }
 0x6ac   : > { %5607 = vmatpush.bf16.msrb.mxu1 %v8127_v10 }
 0x6af   : > { %5588 = vmatpush.bf16.msrb.mxu0 %v8120_v16 }
 0x6b3   : > { %5589 = vmatpush.bf16.msrb.mxu0 %v8119_v27 }
 0x6f3   : > { %v4771_v43 = vpop.f32.mrf.mxu0 }
 0x6f4   : > { %4785 = vst [vmem:[#allocation5] sm:$0xff] %v4771_v43  ;;  %v4793_v6 = vpack.c.bf16 %v4771_v43, %v4771_v43  ;;  %v8154_v43 = vld [vmem:[%s11220_s7 + $0x218] sm:$0xff] }
 0x6f6   : > { %v4845_v21 = vunpack.c.l.b16 %v4793_v6 }
 0x6fb   : > { %v4773_v39 = vpop.f32.mrf.mxu0 }
 0x6fc   : > { %4786 = vst [vmem:[#allocation5 + $0x8] sm:$0xff] %v4773_v39  ;;  %v4794_v1 = vpack.c.bf16 %v4773_v39, %v4773_v39 }
 0x6fe   : > { %v10609_v2 = vunpack.c.l.b16 %v4794_v1  ;;  %v8152_v1 = vld [vmem:[%s11220_s7 + $0x208] sm:$0xff] }
 0x700   : > { %v4848_v40 = vpack.c.b16 %v10609_v2, %v4845_v21 }
 0x702   : > { %5518 = vmatmul.bf16.vlgmr.msra.gmra.mxu0 %v4848_v40 }
 0x703   : > { %v10630_v49 = vpop.f32.mrf.mxu0  ;;  %5654 = vmatpush.bf16.msra.mxu0 %v8158_v3  ;;  %v4802_v63 = vld [vmem:[#allocation5 + $0x2] sm:$0xff] }
 0x704   : > { %4787 = vst [vmem:[#allocation5 + $0x10] sm:$0xff] %v10630_v49  ;;  %v4808_v25 = vld [vmem:[#allocation5 + $0x6] sm:$0xff]  ;;  %v4805_v14 = vpack.c.bf16 %v4802_v63, %v4802_v63 }
 0x705   : > { %v4796_v60 = vld [vmem:[#allocation5 + $0x1] sm:$0xff]  ;;  %v4811_v51 = vpack.c.bf16 %v4808_v25, %v4808_v25 }
 0x706   : > { %v4799_v9 = vpack.c.bf16 %v4796_v60, %v4796_v60  ;;  %v4865_v5 = vunpack.c.l.b16 %v4805_v14  ;;  %v4814_v16 = vld [vmem:[#allocation5 + $0x7] sm:$0xff] }
 0x707   : > { %5655 = vmatpush.bf16.msra.mxu0 %v8157_v48  ;;  %v4875_v11 = vunpack.c.l.b16 %v4811_v51  ;;  %v4817_v19 = vpack.c.bf16 %v4814_v16, %v4814_v16 }
 0x708   : > { %v4855_v34 = vunpack.c.l.b16 %v4799_v9 }
 0x709   : > { %v4885_v56 = vunpack.c.l.b16 %v4817_v19 }
 0x70b   : > { %v4792_v44 = vld [vmem:[#allocation5 + $0x10] sm:$0x3f]  ;;  %v4778_v61 = vpop.f32.mrf.mxu0  ;;  %5656 = vmatpush.bf16.msra.mxu0 %v8156_v23 }
 0x70c   : > { %v4803_v58 = vld [vmem:[#allocation5 + $0xa] sm:$0xff]  ;;  %v4795_v22 = vpack.c.bf16 %v4792_v44, %v4792_v44  ;;  %4788 = vst [vmem:[#allocation5 + $0x18] sm:$0xff] %v4778_v61  ;;  %v4804_v35 = vld [vmem:[#allocation5 + $0x12] sm:$0x3f]  ;;  %v4822_v44 = vpack.c.bf16 %v10630_v49, %v10630_v49 }
 0x70d   : > { %v4809_v55 = vld [vmem:[#allocation5 + $0xe] sm:$0xff]  ;;  %v4806_v50 = vpack.c.bf16 %v4803_v58, %v4803_v58  ;;  %v4807_v45 = vpack.c.bf16 %v4804_v35, %v4804_v35 }
 0x70e   : > { %v4812_v32 = vpack.c.bf16 %v4809_v55, %v4809_v55  ;;  %v4797_v47 = vld [vmem:[#allocation5 + $0x9] sm:$0xff]  ;;  %v4847_v24 = vunpack.c.l.b16 %v4795_v22  ;;  %v4798_v6 = vld [vmem:[#allocation5 + $0x11] sm:$0x3f] }
 0x70f   : > { %v4800_v29 = vpack.c.bf16 %v4797_v47, %v4797_v47  ;;  %v4866_v33 = vunpack.c.l.b16 %v4806_v50  ;;  %5657 = vmatpush.bf16.msra.mxu0 %v8155_v13  ;;  %v4815_v18 = vld [vmem:[#allocation5 + $0xf] sm:$0xff]  ;;  %v4801_v27 = vpack.c.bf16 %v4798_v6, %v4798_v6  ;;  %v4867_v3 = vunpack.c.l.b16 %v4807_v45 }
 0x710   : > { %v10666_v57 = vunpack.c.l.b16 %v4812_v32  ;;  %v4849_v4 = vpack.c.b16 %v4847_v24, %v4847_v24  ;;  %v4818_v39 = vpack.c.bf16 %v4815_v18, %v4815_v18  ;;  %v4824_v30 = vld [vmem:[#allocation5 + $0xc] sm:$0xff]  ;;  %v4894_v50 = vunpack.c.l.b16 %v4822_v44 }
 0x711   : > { %v4856_v41 = vunpack.c.l.b16 %v4800_v29  ;;  %v4868_v20 = vpack.c.b16 %v4866_v33, %v4865_v5  ;;  %v4857_v48 = vunpack.c.l.b16 %v4801_v27  ;;  %v4869_v36 = vpack.c.b16 %v4867_v3, %v4867_v3  ;;  %v4830_v51 = vld [vmem:[#allocation5 + $0xd] sm:$0xff] }
 0x712   : > { %v4878_v46 = vpack.c.b16 %v10666_v57, %v4875_v11  ;;  %5523 = vmatmul.bf16.gmra.mxu0 %v4849_v4  ;;  %v4886_v40 = vunpack.c.l.b16 %v4818_v39  ;;  %v4827_v58 = vpack.c.bf16 %v4824_v30, %v4824_v30  ;;  %v4833_v55 = vpack.c.bf16 %v4830_v51, %v4830_v51 }
 0x713   : > { %v4858_v42 = vpack.c.b16 %v4856_v41, %v4855_v34  ;;  %5554 = vmatmul.bf16.vlgmr.msra.gmra.mxu2 %v4868_v20  ;;  %v4781_v31 = vpop.f32.mrf.mxu0  ;;  %5658 = vmatpush.bf16.msra.mxu0 %v8154_v43  ;;  %v4810_v17 = vld [vmem:[#allocation5 + $0x16] sm:$0x3f]  ;;  %v4859_v37 = vpack.c.b16 %v4857_v48, %v4857_v48  ;;  %v4896_v29 = vpack.c.b16 %v4894_v50, %v10609_v2 }
 0x714   : > { %5572 = vmatmul.bf16.vlgmr.msra.gmra.mxu3 %v4878_v46  ;;  %4789 = vst [vmem:[#allocation5 + $0x20] sm:$0xf] %v4781_v31  ;;  %v4813_v21 = vpack.c.bf16 %v4810_v17, %v4810_v17  ;;  %v4888_v62 = vpack.c.b16 %v4886_v40, %v4885_v56  ;;  %v4816_v25 = vld [vmem:[#allocation5 + $0x17] sm:$0x3f]  ;;  %v4903_v32 = vunpack.c.l.b16 %v4827_v58  ;;  %v4913_v47 = vunpack.c.l.b16 %v4833_v55 }
 0x715   : > { %5536 = vmatmul.bf16.vlgmr.msra.gmra.mxu1 %v4858_v42  ;;  %v4825_v60 = vld [vmem:[#allocation5 + $0x14] sm:$0xff]  ;;  %v4819_v14 = vpack.c.bf16 %v4816_v25, %v4816_v25 }
 0x716   : > { %v4877_v53 = vunpack.c.l.b16 %v4813_v21  ;;  %v4831_v23 = vld [vmem:[#allocation5 + $0x15] sm:$0xff]  ;;  %v4828_v15 = vpack.c.bf16 %v4825_v60, %v4825_v60 }
 0x717   : > { %5659 = vmatpush.bf16.msra.mxu0 %v8153_v59  ;;  %v4834_v28 = vpack.c.bf16 %v4831_v23, %v4831_v23  ;;  %v4887_v61 = vunpack.c.l.b16 %v4819_v14  ;;  %v4837_v24 = vld [vmem:[#allocation5 + $0x16] sm:$0xff] }
 0x718   : > { %v4879_v63 = vpack.c.b16 %v4877_v53, %v4877_v53  ;;  %v4904_v9 = vunpack.c.l.b16 %v4828_v15  ;;  %v4821_v11 = vld [vmem:[#allocation5 + $0x18] sm:$0x3f]  ;;  %v4840_v34 = vpack.c.bf16 %v4837_v24, %v4837_v24  ;;  %v8317_v53 = vld [vmem:[%s11221_s8] ss:$0 sm:$0xff] }
 0x719   : > { %v4914_v22 = vunpack.c.l.b16 %v4834_v28  ;;  %v4889_v13 = vpack.c.b16 %v4887_v61, %v4887_v61  ;;  %v4823_v4 = vpack.c.bf16 %v4821_v11, %v4821_v11 }
 0x71a   : > { %v4906_v26 = vpack.c.b16 %v4904_v9, %v4903_v32  ;;  %v4924_v20 = vunpack.c.l.b16 %v4840_v34 }
 0x71b   : > { %v4783_v12 = vpop.f32.mrf.mxu0  ;;  %5660 = vmatpush.bf16.msra.mxu0 %v8152_v1  ;;  %v4916_v5 = vpack.c.b16 %v4914_v22, %v4913_v47  ;;  %v4826_v33 = vld [vmem:[#allocation5 + $0x1c] sm:$0x3f]  ;;  %v4895_v42 = vunpack.c.l.b16 %v4823_v4 }
 0x71c   : > { %v4832_v49 = vld [vmem:[#allocation5 + $0x1d] sm:$0x3f]  ;;  %v4829_v41 = vpack.c.bf16 %v4826_v33, %v4826_v33  ;;  %v4926_v43 = vpack.c.b16 %v4924_v20, %v10666_v57 }
 0x71d   : > { %v4835_v54 = vpack.c.bf16 %v4832_v49, %v4832_v49  ;;  %v4897_v8 = vpack.c.b16 %v4895_v42, %v4895_v42  ;;  %v4838_v31 = vld [vmem:[#allocation5 + $0x1e] sm:$0x3f] }
 0x71e   : > { %v4905_v46 = vunpack.c.l.b16 %v4829_v41  ;;  %v4841_v59 = vpack.c.bf16 %v4838_v31, %v4838_v31 }
 0x71f   : > { %5661 = vmatpush.bf16.msra.mxu0 %v8151_v0  ;;  %v4915_v52 = vunpack.c.l.b16 %v4835_v54 }
 0x720   : > { %v4907_v7 = vpack.c.b16 %v4905_v46, %v4905_v46  ;;  %v4925_v10 = vunpack.c.l.b16 %v4841_v59 }
 0x721   : > { %v4917_v2 = vpack.c.b16 %v4915_v52, %v4915_v52 }
 0x722   : > { %5590 = vmatmul.bf16.vlgmr.msrb.gmra.mxu0 %v4888_v62  ;;  %v4927_v18 = vpack.c.b16 %v4925_v10, %v4925_v10 }
 0x723   : > { %5559 = vmatmul.bf16.gmra.mxu2 %v4869_v36 }
 0x724   : > { %5577 = vmatmul.bf16.gmra.mxu3 %v4879_v63 }
 0x725   : > { %5541 = vmatmul.bf16.gmra.mxu1 %v4859_v37 }
 0x732   : > { %5595 = vmatmul.bf16.gmra.mxu0 %v4889_v13 }
 0x733   : > { %5626 = vmatmul.bf16.vlgmr.msrb.gmra.mxu2 %v4906_v26 }
 0x734   : > { %5644 = vmatmul.bf16.vlgmr.msrb.gmra.mxu3 %v4916_v5 }
 0x735   : > { %5608 = vmatmul.bf16.vlgmr.msrb.gmra.mxu1 %v4896_v29 }
 0x742   : > { %5662 = vmatmul.bf16.vlgmr.msra.gmra.mxu0 %v4926_v43  ;;  %v7611_v43 = vld [vmem:[%s11223_s10 + $0x70] sm:$0xf] }
 0x743   : > { %5631 = vmatmul.bf16.gmra.mxu2 %v4907_v7  ;;  %v8174_v7 = vld [vmem:[%s11223_s10 + $0x74] sm:$0xf0] }
 0x744   : > { %5649 = vmatmul.bf16.gmra.mxu3 %v4917_v2  ;;  %v7675_v2 = vld [vmem:[%s11223_s10 + $0xf0] sm:$0xf]  ;;  %v7612_v10 = vor.u32 %v8174_v7, %v7611_v43  ;;  %v8198_v7 = vld [vmem:[%s11223_s10 + $0x134] sm:$0xf0] }
 0x745   : > { %5613 = vmatmul.bf16.gmra.mxu1 %v4897_v8  ;;  %v7707_v43 = vld [vmem:[%s11223_s10 + $0x130] sm:$0xf] }
 0x746   : > { %6117 = vmatpush.bf16.msra.mxu2 %v7612_v10  ;;  %v5700_v10 = vsel %vm845_vm0, 4294967295, %v8399_v38  ;;  %v7627_v38 = vld [vmem:[%s11223_s10 + $0x90] sm:$0xf] }
 0x752   : > { %5667 = vmatmul.bf16.gmra.mxu0 %v4927_v18  ;;  %v8190_v18 = vld [vmem:[%s11223_s10 + $0xf4] sm:$0xf0] }
 0x77f   : > { %v5519_v35 = vpop.f32.mrf.mxu0 }
 0x780   : > { %v5520_v56 = vadd.f32 %v8317_v53, %v5519_v35  ;;  %v7603_v35 = vld [vmem:[%s11223_s10 + $0x60] sm:$0xf] }
 0x787   : > { %v5521_v17 = vpop.f32.mrf.mxu0 }
 0x788   : > { %v5522_v23 = vadd.f32 %v8317_v53, %v5521_v17  ;;  %v8172_v17 = vld [vmem:[%s11223_s10 + $0x64] sm:$0xf0] }
 0x78f   : > { %v5524_v6 = vpop.f32.mrf.mxu0 }
 0x790   : > { %v5525_v22 = vadd.f32 %v8317_v53, %v5524_v6  ;;  %v7676_v6 = vor.u32 %v8190_v18, %v7675_v2 }
 0x792   : > { %v5537_v16 = vpop.f32.mrf.mxu1  ;;  %6130 = vmatpush.bf16.msra.mxu3 %v7676_v6  ;;  %v7708_v6 = vor.u32 %v8198_v7, %v7707_v43  ;;  %v7683_v7 = vld [vmem:[%s11223_s10 + $0x100] sm:$0xf] }
 0x793   : > { %v5538_v36 = vadd.f32 %v5537_v16, %v5520_v56  ;;  %v7667_v16 = vld [vmem:[%s11223_s10 + $0xe0] sm:$0xf] }
 0x796   : > { %v5555_v39 = vpop.f32.mrf.mxu2 }
 0x797   : > { %v5573_v45 = vpop.f32.mrf.mxu3  ;;  %v5526_v1 = vpop.f32.mrf.mxu0  ;;  %v5556_v25 = vadd.f32 %v5555_v39, %v5538_v36  ;;  %v8188_v39 = vld [vmem:[%s11223_s10 + $0xe4] sm:$0xf0] }
 0x799   : > { %v5574_v30 = vadd.f32 %v5573_v45, %v5556_v25 }
 0x79a   : > { %v5539_v57 = vpop.f32.mrf.mxu1 }
 0x79b   : > { %v5540_v51 = vadd.f32 %v5539_v57, %v5522_v23  ;;  %v7604_v57 = vor.u32 %v8172_v17, %v7603_v35  ;;  %v7587_v23 = vld [vmem:[%s11223_s10 + $0x40] sm:$0xf]  ;;  %v7563_v35 = vld [vmem:[%s11223_s10 + $0x10] sm:$0xf]  ;;  %v8162_v17 = vld [vmem:[%s11223_s10 + $0x14] sm:$0xf0] }
 0x79d   : > { %6118 = vmatpush.bf16.msra.mxu2 %v7604_v57  ;;  %v7699_v57 = vld [vmem:[%s11223_s10 + $0x120] sm:$0xf] }
 0x79e   : > { %v5557_v21 = vpop.f32.mrf.mxu2 }
 0x79f   : > { %v5575_v27 = vpop.f32.mrf.mxu3  ;;  %v5591_v19 = vpop.f32.mrf.mxu0  ;;  %v5558_v58 = vadd.f32 %v5557_v21, %v5540_v51  ;;  %v7595_v21 = vld [vmem:[%s11223_s10 + $0x50] sm:$0xf]  ;;  %v7651_v51 = vld [vmem:[%s11223_s10 + $0xc0] sm:$0xf] }
 0x7a0   : > { %v5592_v15 = vadd.f32 %v5591_v19, %v5574_v30  ;;  %v8170_v19 = vld [vmem:[%s11223_s10 + $0x54] sm:$0xf0]  ;;  %v8168_v30 = vld [vmem:[%s11223_s10 + $0x44] sm:$0xf0] }
 0x7a1   : > { %v5576_v50 = vadd.f32 %v5575_v27, %v5558_v58  ;;  %v7668_v27 = vor.u32 %v8188_v39, %v7667_v16  ;;  %v7596_v36 = vor.u32 %v8170_v19, %v7595_v21  ;;  %v8202_v58 = vld [vmem:[%s11223_s10 + $0x154] sm:$0xf0]  ;;  %v8196_v21 = vld [vmem:[%s11223_s10 + $0x124] sm:$0xf0] }
 0x7a2   : > { %v5542_v12 = vpop.f32.mrf.mxu1 }
 0x7a3   : > { %v5543_v13 = vadd.f32 %v5542_v12, %v5525_v22  ;;  %v7739_v12 = vld [vmem:[%s11223_s10 + $0x170] sm:$0xf]  ;;  %6131 = vmatpush.bf16.msra.mxu3 %v7668_v27  ;;  %6119 = vmatpush.bf16.msra.mxu2 %v7596_v36 }
 0x7a6   : > { %v5560_v40 = vpop.f32.mrf.mxu2 }
 0x7a7   : > { %v5578_v3 = vpop.f32.mrf.mxu3  ;;  %v5593_v0 = vpop.f32.mrf.mxu0  ;;  %v5561_v24 = vadd.f32 %v5560_v40, %v5543_v13  ;;  %v8206_v40 = vld [vmem:[%s11223_s10 + $0x174] sm:$0xf0] }
 0x7a8   : > { %v5594_v47 = vadd.f32 %v5593_v0, %v5576_v50  ;;  %v8186_v0 = vld [vmem:[%s11223_s10 + $0xd4] sm:$0xf0]  ;;  %v7740_v53 = vor.u32 %v8206_v40, %v7739_v12  ;;  %v7579_v50 = vld [vmem:[%s11223_s10 + $0x30] sm:$0xf] }
 0x7a9   : > { %v5579_v54 = vadd.f32 %v5578_v3, %v5561_v24  ;;  %v7659_v3 = vld [vmem:[%s11223_s10 + $0xd0] sm:$0xf]  ;;  %v8182_v13 = vld [vmem:[%s11223_s10 + $0xb4] sm:$0xf0] }
 0x7aa   : > { %v5544_v48 = vpop.f32.mrf.mxu1  ;;  %6143 = vmatpush.bf16.msrb.mxu0 %v7740_v53  ;;  %v7803_v12 = vld [vmem:[%s11223_s10 + $0x1f0] sm:$0xf]  ;;  %v8222_v40 = vld [vmem:[%s11223_s10 + $0x1f4] sm:$0xf0]  ;;  %v5701_v53 = vsel %vm5699_vm10, %v5700_v10, 0 }
 0x7ab   : > { %v7741_v10 = vld [vmem:[%s11223_s10 + $0x178] sm:$0xf0] }
 0x7ae   : > { %v5562_v62 = vpop.f32.mrf.mxu2 }
 0x7af   : > { %v5580_v63 = vpop.f32.mrf.mxu3  ;;  %v5596_v37 = vpop.f32.mrf.mxu0 }
 0x7b0   : > { %v5597_v20 = vadd.f32 %v5596_v37, %v5579_v54  ;;  %v7731_v63 = vld [vmem:[%s11223_s10 + $0x160] sm:$0xf]  ;;  %v8204_v37 = vld [vmem:[%s11223_s10 + $0x164] sm:$0xf0] }
 0x7b2   : > { %v5609_v60 = vpop.f32.mrf.mxu1 }
 0x7b3   : > { %v5610_v55 = vadd.f32 %v5609_v60, %v5592_v15  ;;  %v7660_v60 = vor.u32 %v8186_v0, %v7659_v3  ;;  %v7564_v3 = vor.u32 %v8162_v17, %v7563_v35  ;;  %v7700_v0 = vor.u32 %v8196_v21, %v7699_v57  ;;  %v8169_v57 = vld [vmem:[%s11223_s10 + $0x54] sm:$0xf]  ;;  %v7597_v21 = vld [vmem:[%s11223_s10 + $0x58] sm:$0xf0] }
 0x7b5   : > { %6132 = vmatpush.bf16.msra.mxu3 %v7660_v60  ;;  %v7795_v60 = vld [vmem:[%s11223_s10 + $0x1e0] sm:$0xf] }
 0x7b6   : > { %v5627_v14 = vpop.f32.mrf.mxu2 }
 0x7b7   : > { %v5645_v28 = vpop.f32.mrf.mxu3  ;;  %v5598_v44 = vpop.f32.mrf.mxu0  ;;  %v5628_v9 = vadd.f32 %v5627_v14, %v5610_v55  ;;  %v7732_v14 = vor.u32 %v8204_v37, %v7731_v63  ;;  %v8173_v63 = vld [vmem:[%s11223_s10 + $0x74] sm:$0xf]  ;;  %v7613_v37 = vld [vmem:[%s11223_s10 + $0x78] sm:$0xf0] }
 0x7b8   : > { %v7723_v44 = vld [vmem:[%s11223_s10 + $0x150] sm:$0xf] }
 0x7b9   : > { %v5646_v26 = vadd.f32 %v5645_v28, %v5628_v9  ;;  %v8184_v28 = vld [vmem:[%s11223_s10 + $0xc4] sm:$0xf0]  ;;  %6144 = vmatpush.bf16.msrb.mxu0 %v7732_v14  ;;  %v7724_v9 = vor.u32 %v8202_v58, %v7723_v44  ;;  %v7677_v44 = vld [vmem:[%s11223_s10 + $0xf8] sm:$0xf0]  ;;  %v7616_v58 = vor.u32 %v8173_v63, %v7613_v37  ;;  %v7653_v63 = vld [vmem:[%s11223_s10 + $0xc8] sm:$0xf0] }
 0x7ba   : > { %v5611_v61 = vpop.f32.mrf.mxu1  ;;  %v7652_v22 = vor.u32 %v8184_v28, %v7651_v51  ;;  %v8189_v28 = vld [vmem:[%s11223_s10 + $0xf4] sm:$0xf] }
 0x7bb   : > { %v5612_v49 = vadd.f32 %v5611_v61, %v5594_v47  ;;  %v7588_v61 = vor.u32 %v8168_v30, %v7587_v23  ;;  %v7643_v47 = vld [vmem:[%s11223_s10 + $0xb0] sm:$0xf]  ;;  %v7619_v23 = vld [vmem:[%s11223_s10 + $0x80] sm:$0xf]  ;;  %v8176_v30 = vld [vmem:[%s11223_s10 + $0x84] sm:$0xf0] }
 0x7bc   : > { %6133 = vmatpush.bf16.msra.mxu3 %v7652_v22  ;;  %v7644_v54 = vor.u32 %v8182_v13, %v7643_v47  ;;  %v7680_v22 = vor.u32 %v8189_v28, %v7677_v44  ;;  %v7779_v13 = vld [vmem:[%s11223_s10 + $0x1c0] sm:$0xf]  ;;  %v7789_v28 = vld [vmem:[%s11223_s10 + $0x1d8] sm:$0xf0] }
 0x7bd   : > { %6120 = vmatpush.bf16.msra.mxu2 %v7588_v61  ;;  %6145 = vmatpush.bf16.msrb.mxu0 %v7724_v9  ;;  %v7620_v61 = vor.u32 %v8176_v30, %v7619_v23  ;;  %v8201_v23 = vld [vmem:[%s11223_s10 + $0x154] sm:$0xf]  ;;  %v7725_v30 = vld [vmem:[%s11223_s10 + $0x158] sm:$0xf0] }
 0x7be   : > { %v5629_v32 = vpop.f32.mrf.mxu2 }
 0x7bf   : > { %v5647_v5 = vpop.f32.mrf.mxu3  ;;  %v5663_v29 = vpop.f32.mrf.mxu0  ;;  %v5630_v41 = vadd.f32 %v5629_v32, %v5612_v49  ;;  %v8166_v32 = vld [vmem:[%s11223_s10 + $0x34] sm:$0xf0] }
 0x7c0   : > { %v10703_v33 = vadd.f32 %v5663_v29, %v5646_v26  ;;  %v7580_v49 = vor.u32 %v8166_v32, %v7579_v50  ;;  %6134 = vmatpush.bf16.msra.mxu3 %v7644_v54  ;;  %v7787_v50 = vld [vmem:[%s11223_s10 + $0x1d0] sm:$0xf]  ;;  %v8218_v32 = vld [vmem:[%s11223_s10 + $0x1d4] sm:$0xf0] }
 0x7c1   : > { %v5648_v46 = vadd.f32 %v5647_v5, %v5630_v41  ;;  %v7715_v5 = vld [vmem:[%s11223_s10 + $0x140] sm:$0xf]  ;;  %v7788_v47 = vor.u32 %v8218_v32, %v7787_v50  ;;  %v7645_v50 = vld [vmem:[%s11223_s10 + $0xb8] sm:$0xf0] }
 0x7c2   : > { %v5614_v11 = vpop.f32.mrf.mxu1  ;;  %v5672_v34 = vmax.f32 %v10703_v33, 0.0  ;;  %6121 = vmatpush.bf16.msra.mxu2 %v7580_v49 }
 0x7c3   : > { %v5615_v31 = vadd.f32 %v5614_v11, %v5597_v20  ;;  %v8200_v11 = vld [vmem:[%s11223_s10 + $0x144] sm:$0xf0] }
 0x7c4   : > { %5675 = vst [vmem:[#allocation6] sm:$0xff] %v5672_v34  ;;  %v8164_v20 = vld [vmem:[%s11223_s10 + $0x24] sm:$0xf0] }
 0x7c6   : > { %v5632_v4 = vpop.f32.mrf.mxu2 }
 0x7c7   : > { %v5650_v52 = vpop.f32.mrf.mxu3  ;;  %v5665_v42 = vpop.f32.mrf.mxu0  ;;  %v5633_v1 = vadd.f32 %v5632_v4, %v5615_v31  ;;  %v7571_v4 = vld [vmem:[%s11223_s10 + $0x20] sm:$0xf] }
 0x7c8   : > { %v5666_v8 = vadd.f32 %v5665_v42, %v5648_v46  ;;  %v7635_v46 = vld [vmem:[%s11223_s10 + $0xa0] sm:$0xf]  ;;  %v8180_v42 = vld [vmem:[%s11223_s10 + $0xa4] sm:$0xf0]  ;;  %v7572_v18 = vor.u32 %v8164_v20, %v7571_v4  ;;  %v7691_v4 = vld [vmem:[%s11223_s10 + $0x110] sm:$0xf] }
 0x7c9   : > { %v5651_v56 = vadd.f32 %v5650_v52, %v5633_v1  ;;  %v7716_v52 = vor.u32 %v8200_v11, %v7715_v5  ;;  %v8178_v1 = vld [vmem:[%s11223_s10 + $0x94] sm:$0xf0]  ;;  %v7763_v11 = vld [vmem:[%s11223_s10 + $0x1a0] sm:$0xf] }
 0x7ca   : > { %v5616_v59 = vpop.f32.mrf.mxu1  ;;  %v5673_v45 = vmax.f32 %v5666_v8, 0.0  ;;  %6122 = vmatpush.bf16.msra.mxu2 %v7572_v18  ;;  %v8194_v20 = vld [vmem:[%s11223_s10 + $0x114] sm:$0xf0]  ;;  %v8208_v18 = vld [vmem:[%s11223_s10 + $0x184] sm:$0xf0] }
 0x7cb   : > { %6146 = vmatpush.bf16.msrb.mxu0 %v7716_v52  ;;  %v7692_v52 = vor.u32 %v8194_v20, %v7691_v4  ;;  %v8197_v20 = vld [vmem:[%s11223_s10 + $0x134] sm:$0xf] }
 0x7cc   : > { %5676 = vst [vmem:[#allocation6 + $0x8] sm:$0xff] %v5673_v45 }
 0x7ce   : > { %v5634_v48 = vpop.f32.mrf.mxu2  ;;  %6123 = vmatpush.bf16.msra.mxu2 %v7564_v3  ;;  %v8167_v3 = vld [vmem:[%s11223_s10 + $0x44] sm:$0xf] }
 0x7cf   : > { %v5652_v62 = vpop.f32.mrf.mxu3  ;;  %v5668_v25 = vpop.f32.mrf.mxu0  ;;  %6147 = vmatpush.bf16.msrb.mxu0 %v7708_v6  ;;  %v7628_v48 = vor.u32 %v8178_v1, %v7627_v38  ;;  %v8221_v6 = vld [vmem:[%s11223_s10 + $0x1f4] sm:$0xf]  ;;  %v8187_v38 = vld [vmem:[%s11223_s10 + $0xe4] sm:$0xf]  ;;  %v7669_v1 = vld [vmem:[%s11223_s10 + $0xe8] sm:$0xf0] }
 0x7d0   : > { %v5669_v15 = vadd.f32 %v5668_v25, %v5651_v56  ;;  %v7555_v56 = vld [vmem:[%s11223_s10] sm:$0xf]  ;;  %v8160_v62 = vld [vmem:[%s11223_s10 + $0x4] sm:$0xf0]  ;;  %v7804_v25 = vor.u32 %v8222_v40, %v7803_v12  ;;  %v7661_v12 = vld [vmem:[%s11223_s10 + $0xd8] sm:$0xf0]  ;;  %v7600_v40 = vor.u32 %v8169_v57, %v7597_v21 }
 0x7d1   : > { %v7556_v51 = vor.u32 %v8160_v62, %v7555_v56  ;;  %v7733_v56 = vld [vmem:[%s11223_s10 + $0x168] sm:$0xf0]  ;;  %v8219_v62 = vld [vmem:[%s11223_s10 + $0x1e4] sm:$0xf]  ;;  %v8193_v21 = vld [vmem:[%s11223_s10 + $0x114] sm:$0xf] }
 0x7d2   : > { %v5674_v55 = vmax.f32 %v5669_v15, 0.0  ;;  %v8220_v15 = vld [vmem:[%s11223_s10 + $0x1e4] sm:$0xf0] }
 0x7d3   : > { %v5680_v26 = vld [vmem:[#allocation6 + $0x1] sm:$0xff]  ;;  %v5681_v8 = vld [vmem:[#allocation6 + $0x9] sm:$0x7f]  ;;  %6148 = vmatpush.bf16.msrb.mxu0 %v7700_v0  ;;  %v7796_v9 = vor.u32 %v8220_v15, %v7795_v60  ;;  %6124 = vmatpush.bf16.msra.mxu2 %v7556_v51  ;;  %v7728_v51 = vor.u32 %v8201_v23, %v7725_v30 }
 0x7d4   : > { %5677 = vst [vmem:[#allocation6 + $0x10] sm:$0x3f] %v5674_v55  ;;  %v5684_v29 = vld [vmem:[#allocation6 + $0x6] sm:$0xff]  ;;  %v5682_v31 = vmax.f32 %v5672_v34, %v5680_v26  ;;  %v7636_v34 = vor.u32 %v8180_v42, %v7635_v46  ;;  %v5692_v55 = vld [vmem:[%s11222_s9] sm:$0x3] }
 0x7d5   : > { %v5686_v24 = vld [vmem:[#allocation6 + $0x7] sm:$0xff]  ;;  %v7755_v46 = vld [vmem:[%s11223_s10 + $0x190] sm:$0xf]  ;;  %v8210_v42 = vld [vmem:[%s11223_s10 + $0x194] sm:$0xf0] }
 0x7d6   : > { %v5679_v2 = vld [vmem:[#allocation6 + $0x8] sm:$0x7f]  ;;  %v5688_v59 = vmax.f32 %v5684_v29, %v5686_v24  ;;  %6135 = vmatpush.bf16.msra.mxu3 %v7636_v34  ;;  %v7771_v29 = vld [vmem:[%s11223_s10 + $0x1b0] sm:$0xf]  ;;  %v8214_v24 = vld [vmem:[%s11223_s10 + $0x1b4] sm:$0xf0]  ;;  %v7756_v43 = vor.u32 %v8210_v42, %v7755_v46 }
 0x7d7   : > { %v5670_v41 = vpop.f32.mrf.mxu0  ;;  %v5683_v39 = vmax.f32 %v5679_v2, %v5681_v8  ;;  %6169 = vmatpush.bf16.msrb.mxu2 %v7616_v58  ;;  %v8216_v26 = vld [vmem:[%s11223_s10 + $0x1c4] sm:$0xf0]  ;;  %v7772_v49 = vor.u32 %v8214_v24, %v7771_v29  ;;  %6149 = vmatpush.bf16.msrb.mxu0 %v7692_v52  ;;  %v7747_v8 = vld [vmem:[%s11223_s10 + $0x180] sm:$0xf]  ;;  %v7605_v34 = vld [vmem:[%s11223_s10 + $0x68] sm:$0xf0] }
 0x7d8   : > { %v5690_v27 = vmax.f32 %v5682_v31, %v5688_v59  ;;  %v7780_v5 = vor.u32 %v8216_v26, %v7779_v13  ;;  %v8212_v41 = vld [vmem:[%s11223_s10 + $0x1a4] sm:$0xf0]  ;;  %v8205_v59 = vld [vmem:[%s11223_s10 + $0x174] sm:$0xf]  ;;  %v7748_v17 = vor.u32 %v8208_v18, %v7747_v8  ;;  %v7589_v0 = vld [vmem:[%s11223_s10 + $0x48] sm:$0xf0] }
 0x7d9   : > { %v7764_v54 = vor.u32 %v8212_v41, %v7763_v11  ;;  %v8192_v2 = vld [vmem:[%s11223_s10 + $0x104] sm:$0xf0]  ;;  %v7744_v35 = vor.u32 %v8205_v59, %v7741_v10  ;;  %v7592_v15 = vor.u32 %v8167_v3, %v7589_v0  ;;  %v7573_v13 = vld [vmem:[%s11223_s10 + $0x28] sm:$0xf0]  ;;  %v8199_v26 = vld [vmem:[%s11223_s10 + $0x144] sm:$0xf] }
 0x7da   : > { %6136 = vmatpush.bf16.msra.mxu3 %v7628_v48  ;;  %v7684_v31 = vor.u32 %v8192_v2, %v7683_v7  ;;  %v8203_v48 = vld [vmem:[%s11223_s10 + $0x164] sm:$0xf]  ;;  %v7637_v29 = vld [vmem:[%s11223_s10 + $0xa8] sm:$0xf0]  ;;  %v7709_v46 = vld [vmem:[%s11223_s10 + $0x138] sm:$0xf0] }
 0x7db   : > { %v5685_v16 = vld [vmem:[#allocation6 + $0xe] sm:$0x7f]  ;;  %v7736_v37 = vor.u32 %v8203_v48, %v7733_v56  ;;  %v8215_v11 = vld [vmem:[%s11223_s10 + $0x1c4] sm:$0xf]  ;;  %v7712_v7 = vor.u32 %v8197_v20, %v7709_v46  ;;  %v7773_v59 = vld [vmem:[%s11223_s10 + $0x1b8] sm:$0xf0] }
 0x7dc   : > { %v5687_v33 = vld [vmem:[#allocation6 + $0xf] sm:$0x7f]  ;;  %6150 = vmatpush.bf16.msrb.mxu0 %v7684_v31  ;;  %v7629_v31 = vld [vmem:[%s11223_s10 + $0x98] sm:$0xf0]  ;;  %v8195_v18 = vld [vmem:[%s11223_s10 + $0x124] sm:$0xf] }
 0x7dd   : > { %v5689_v45 = vmax.f32 %v5685_v16, %v5687_v33  ;;  %v7805_v16 = vld [vmem:[%s11223_s10 + $0x1f8] sm:$0xf0]  ;;  %v8171_v33 = vld [vmem:[%s11223_s10 + $0x64] sm:$0xf]  ;;  %v7717_v24 = vld [vmem:[%s11223_s10 + $0x148] sm:$0xf0] }
 0x7de   : > { %6137 = vmatpush.bf16.msra.mxu3 %v7620_v61  ;;  %v7581_v61 = vld [vmem:[%s11223_s10 + $0x38] sm:$0xf0]  ;;  %v7781_v41 = vld [vmem:[%s11223_s10 + $0x1c8] sm:$0xf0]  ;;  %v8161_v42 = vld [vmem:[%s11223_s10 + $0x14] sm:$0xf] }
 0x7df   : > { %v5691_v19 = vmax.f32 %v5683_v39, %v5689_v45  ;;  %v7808_v39 = vor.u32 %v8221_v6, %v7805_v16  ;;  %v7608_v45 = vor.u32 %v8171_v33, %v7605_v34  ;;  %v7784_v4 = vor.u32 %v8215_v11, %v7781_v41  ;;  %v8213_v2 = vld [vmem:[%s11223_s10 + $0x1b4] sm:$0xf]  ;;  %v7765_v16 = vld [vmem:[%s11223_s10 + $0x1a8] sm:$0xf0]  ;;  %v8159_v34 = vld [vmem:[%s11223_s10 + $0x4] sm:$0xf] }
 0x7e0   : > { %6195 = vmatpush.bf16.msra.mxu0 %v7744_v35  ;;  %v8177_v8 = vld [vmem:[%s11223_s10 + $0x94] sm:$0xf]  ;;  %v7776_v10 = vor.u32 %v8213_v2, %v7773_v59  ;;  %v7701_v35 = vld [vmem:[%s11223_s10 + $0x128] sm:$0xf0]  ;;  %v8191_v48 = vld [vmem:[%s11223_s10 + $0x104] sm:$0xf] }
 0x7e1   : > { %v5693_v36 = vpack.c.bf16 %v5691_v19, %v5690_v27  ;;  %v7672_v27 = vor.u32 %v8187_v38, %v7669_v1  ;;  %v8185_v19 = vld [vmem:[%s11223_s10 + $0xd4] sm:$0xf]  ;;  %6170 = vmatpush.bf16.msrb.mxu2 %v7608_v45  ;;  %v7632_v33 = vor.u32 %v8177_v8, %v7629_v31  ;;  %v7557_v38 = vld [vmem:[%s11223_s10 + $0x8] sm:$0xf0]  ;;  %v8175_v45 = vld [vmem:[%s11223_s10 + $0x84] sm:$0xf] }
 0x7e2   : > { %6182 = vmatpush.bf16.msrb.mxu3 %v7680_v22  ;;  %v7621_v1 = vld [vmem:[%s11223_s10 + $0x88] sm:$0xf0]  ;;  %v8233_v11 = vld [vmem:[%s11225_s12 + $0x50] sm:$0xff]  ;;  %v5791_v41 = vld [vmem:[%s11224_s11] sm:$0x3] }
 0x7e3   : > { %v5703_v14 = vand.u32 %v5701_v53, %v5693_v36  ;;  %v7664_v53 = vor.u32 %v8185_v19, %v7661_v12  ;;  %v8183_v36 = vld [vmem:[%s11223_s10 + $0xc4] sm:$0xf]  ;;  %v8209_v19 = vld [vmem:[%s11223_s10 + $0x194] sm:$0xf]  ;;  %v7560_v12 = vor.u32 %v8159_v34, %v7557_v38  ;;  %v7624_v3 = vor.u32 %v8175_v45, %v7621_v1  ;;  %v7685_v56 = vld [vmem:[%s11223_s10 + $0x108] sm:$0xf0] }
 0x7e4   : > { %6196 = vmatpush.bf16.msra.mxu0 %v7736_v37  ;;  %v7656_v44 = vor.u32 %v8183_v36, %v7653_v63  ;;  %v7749_v36 = vld [vmem:[%s11223_s10 + $0x188] sm:$0xf0]  ;;  %v7688_v63 = vor.u32 %v8191_v48, %v7685_v56  ;;  %v8231_v46 = vld [vmem:[%s11225_s12 + $0x40] sm:$0xff]  ;;  %v8242_v1 = vld [vmem:[%s11227_s14 + $0x18] sm:$0xff] }
 0x7e5   : > { %5712 = vmatpush.bf16.msra.mxu1 %v5703_v14  ;;  %v8217_v14 = vld [vmem:[%s11223_s10 + $0x1d4] sm:$0xf]  ;;  %6171 = vmatpush.bf16.msrb.mxu2 %v7600_v40  ;;  %v7757_v40 = vld [vmem:[%s11223_s10 + $0x198] sm:$0xf0] }
 0x7e6   : > { %6183 = vmatpush.bf16.msrb.mxu3 %v7672_v27  ;;  %v7792_v58 = vor.u32 %v8217_v14, %v7789_v28  ;;  %v7693_v27 = vld [vmem:[%s11223_s10 + $0x118] sm:$0xf0] }
 0x7e7   : > { %v7696_v0 = vor.u32 %v8193_v21, %v7693_v27  ;;  %v8241_v21 = vld [vmem:[%s11227_s14 + $0x10] sm:$0xff] }
 0x7e8   : > { %7552 = vmatmul.msk.bf16.vlgmr.msra.gmra.mxu1 %vm5694_vm11, %v5692_v55  ;;  %v8165_v55 = vld [vmem:[%s11223_s10 + $0x34] sm:$0xf]  ;;  %6197 = vmatpush.bf16.msra.mxu0 %v7728_v51 }
 0x7e9   : > { %6156 = vmatpush.bf16.msrb.mxu1 %v7804_v25  ;;  %v7797_v25 = vld [vmem:[%s11223_s10 + $0x1e8] sm:$0xf0]  ;;  %6172 = vmatpush.bf16.msrb.mxu2 %v7592_v15  ;;  %v7584_v22 = vor.u32 %v8165_v55, %v7581_v61  ;;  %v8238_v55 = vld [vmem:[%s11225_s12 + $0x78] sm:$0xff] }
 0x7ea   : > { %v7800_v60 = vor.u32 %v8219_v62, %v7797_v25  ;;  %6184 = vmatpush.bf16.msrb.mxu3 %v7664_v53  ;;  %v7760_v53 = vor.u32 %v8209_v19, %v7757_v40  ;;  %v8207_v62 = vld [vmem:[%s11223_s10 + $0x184] sm:$0xf] }
 0x7eb   : > { %v7752_v37 = vor.u32 %v8207_v62, %v7749_v36 }
 0x7ed   : > { %6157 = vmatpush.bf16.msrb.mxu1 %v7796_v9  ;;  %v8181_v9 = vld [vmem:[%s11223_s10 + $0xb4] sm:$0xf]  ;;  %6173 = vmatpush.bf16.msrb.mxu2 %v7584_v22  ;;  %v8228_v22 = vld [vmem:[%s11225_s12 + $0x28] sm:$0xff] }
 0x7ee   : > { %6185 = vmatpush.bf16.msrb.mxu3 %v7656_v44  ;;  %v7648_v32 = vor.u32 %v8181_v9, %v7645_v50  ;;  %v8229_v9 = vld [vmem:[%s11225_s12 + $0x30] sm:$0xff]  ;;  %v8227_v50 = vld [vmem:[%s11225_s12 + $0x20] sm:$0xff] }
 0x7f1   : > { %6158 = vmatpush.bf16.msrb.mxu1 %v7788_v47  ;;  %v8163_v47 = vld [vmem:[%s11223_s10 + $0x24] sm:$0xf] }
 0x7f2   : > { %6186 = vmatpush.bf16.msrb.mxu3 %v7648_v32  ;;  %v8226_v32 = vld [vmem:[%s11225_s12 + $0x18] sm:$0xff] }
 0x7f5   : > { %6159 = vmatpush.bf16.msrb.mxu1 %v7780_v5  ;;  %v8179_v5 = vld [vmem:[%s11223_s10 + $0xa4] sm:$0xf] }
 0x7f6   : > { %v7640_v52 = vor.u32 %v8179_v5, %v7637_v29  ;;  %v8224_v5 = vld [vmem:[%s11225_s12 + $0x8] sm:$0xff]  ;;  %v8235_v29 = vld [vmem:[%s11225_s12 + $0x60] sm:$0xff] }
 0x7f8   : > { %6187 = vmatpush.bf16.msrb.mxu3 %v7640_v52  ;;  %v6113_v52 = vperm.slane %v5791_v41, 0 }
 0x7f9   : > { %6160 = vmatpush.bf16.msrb.mxu1 %v7772_v49  ;;  %v7720_v49 = vor.u32 %v8199_v26, %v7717_v24  ;;  %v8236_v26 = vld [vmem:[%s11225_s12 + $0x68] sm:$0xff]  ;;  %v8223_v24 = vld [vmem:[%s11225_s12] sm:$0xff] }
 0x7fb   : > { %6198 = vmatpush.bf16.msra.mxu0 %v7720_v49  ;;  %v8234_v49 = vld [vmem:[%s11225_s12 + $0x58] sm:$0xff] }
 0x7fc   : > { %6188 = vmatpush.bf16.msrb.mxu3 %v7632_v33 }
 0x7fd   : > { %6161 = vmatpush.bf16.msrb.mxu1 %v7764_v54  ;;  %v7576_v54 = vor.u32 %v8163_v47, %v7573_v13  ;;  %v8237_v47 = vld [vmem:[%s11225_s12 + $0x70] sm:$0xff] }
 0x7fe   : > { %v8225_v13 = vld [vmem:[%s11225_s12 + $0x10] sm:$0xff] }
 0x7ff   : > { %6174 = vmatpush.bf16.msrb.mxu2 %v7576_v54  ;;  %6199 = vmatpush.bf16.msra.mxu0 %v7712_v7  ;;  %v8232_v54 = vld [vmem:[%s11225_s12 + $0x48] sm:$0xff] }
 0x800   : > { %6189 = vmatpush.bf16.msrb.mxu3 %v7624_v3 }
 0x801   : > { %6162 = vmatpush.bf16.msrb.mxu1 %v7756_v43  ;;  %v7565_v43 = vld [vmem:[%s11223_s10 + $0x18] sm:$0xf0] }
 0x802   : > { %v7568_v6 = vor.u32 %v8161_v42, %v7565_v43  ;;  %v8246_v42 = vld [vmem:[%s11227_s14 + $0x38] sm:$0xff]  ;;  %v8245_v43 = vld [vmem:[%s11227_s14 + $0x30] sm:$0xff] }
 0x804   : > { %6175 = vmatpush.bf16.msrb.mxu2 %v7568_v6  ;;  %v8243_v6 = vld [vmem:[%s11227_s14 + $0x20] sm:$0xff] }
 0x805   : > { %6163 = vmatpush.bf16.msrb.mxu1 %v7748_v17  ;;  %v8211_v17 = vld [vmem:[%s11223_s10 + $0x1a4] sm:$0xf] }
 0x806   : > { %v7768_v57 = vor.u32 %v8211_v17, %v7765_v16 }
 0x808   : > { %6176 = vmatpush.bf16.msrb.mxu2 %v7560_v12 }
 0x809   : > { %6208 = vmatpush.bf16.msra.mxu1 %v7808_v39  ;;  %v7704_v39 = vor.u32 %v8195_v18, %v7701_v35  ;;  %v8244_v18 = vld [vmem:[%s11227_s14 + $0x28] sm:$0xff] }
 0x80b   : > { %6200 = vmatpush.bf16.msra.mxu0 %v7704_v39 }
 0x80d   : > { %6209 = vmatpush.bf16.msra.mxu1 %v7800_v60 }
 0x80f   : > { %6201 = vmatpush.bf16.msra.mxu0 %v7696_v0 }
 0x811   : > { %6210 = vmatpush.bf16.msra.mxu1 %v7792_v58  ;;  %v8230_v58 = vld [vmem:[%s11225_s12 + $0x38] sm:$0xff] }
 0x813   : > { %6202 = vmatpush.bf16.msra.mxu0 %v7688_v63 }
 0x815   : > { %6211 = vmatpush.bf16.msra.mxu1 %v7784_v4 }
 0x819   : > { %6212 = vmatpush.bf16.msra.mxu1 %v7776_v10 }
 0x81d   : > { %6213 = vmatpush.bf16.msra.mxu1 %v7768_v57  ;;  %v6114_v57 = vperm.slane %v5791_v41, 1 }
 0x821   : > { %6214 = vmatpush.bf16.msra.mxu1 %v7760_v53 }
 0x825   : > { %6215 = vmatpush.bf16.msra.mxu1 %v7752_v37  ;;  %v8240_v37 = vld [vmem:[%s11227_s14 + $0x8] sm:$0xff] }
 0x865   : > { %v5714_v25 = vpop.f32.mrf.mxu1 }
 0x866   : > { %5718 = vst [vmem:[#allocation7] sm:$0xf] %v5714_v25  ;;  %v8239_v25 = vld [vmem:[%s11227_s14] sm:$0xff] }
 0x86d   : > { %v5719_v60 = vld [vmem:[#allocation7] sm:$0x1]  ;;  %v5720_v23 = vld [vmem:[#allocation7 + $0x1] sm:$0x1]  ;;  %v5721_v30 = vld [vmem:[#allocation7 + $0x2] sm:$0x1]  ;;  %v5716_v14 = vpop.f32.mrf.mxu1 }
 0x86e   : > { %v5723_v15 = vpack.c.bf16 %v5719_v60, %v5719_v60  ;;  %v5724_v51 = vpack.c.bf16 %v5720_v23, %v5720_v23  ;;  %v5725_v28 = vpack.c.bf16 %v5721_v30, %v5721_v30  ;;  %v5722_v44 = vld [vmem:[#allocation7 + $0x3] sm:$0x1]  ;;  %v6257_v30 = vld [vmem:[%s11226_s13] sm:$0x1] }
 0x86f   : > { %v5726_v61 = vpack.c.bf16 %v5722_v44, %v5722_v44 }
 0x870   : > { %6125 = vmatmul.bf16.vlgmr.msra.gmra.mxu2 %v5723_v15  ;;  %6138 = vmatmul.bf16.vlgmr.msra.gmra.mxu3 %v5724_v51 }
 0x871   : > { %6151 = vmatmul.bf16.vlgmr.msrb.gmra.mxu0 %v5725_v28  ;;  %6164 = vmatmul.bf16.vlgmr.msrb.gmra.mxu1 %v5726_v61 }
 0x872   : > { %6354 = vmatpush.bf16.msra.mxu2 %v8230_v58  ;;  %6367 = vmatpush.bf16.msra.mxu3 %v8238_v55  ;;  %v6398_v55 = vld [vmem:[%s11356_s20] sm:$0x1] }
 0x873   : > { %6447 = vmatpush.bf16.msrb.mxu0 %v8246_v42 }
 0x876   : > { %6355 = vmatpush.bf16.msra.mxu2 %v8229_v9  ;;  %6368 = vmatpush.bf16.msra.mxu3 %v8237_v47 }
 0x877   : > { %6448 = vmatpush.bf16.msrb.mxu0 %v8245_v43 }
 0x87a   : > { %6356 = vmatpush.bf16.msra.mxu2 %v8228_v22  ;;  %6369 = vmatpush.bf16.msra.mxu3 %v8236_v26 }
 0x87b   : > { %6449 = vmatpush.bf16.msrb.mxu0 %v8244_v18 }
 0x87e   : > { %6357 = vmatpush.bf16.msra.mxu2 %v8227_v50  ;;  %6370 = vmatpush.bf16.msra.mxu3 %v8235_v29 }
 0x87f   : > { %6450 = vmatpush.bf16.msrb.mxu0 %v8243_v6 }
 0x880   : > { %6177 = vmatmul.bf16.vlgmr.msrb.gmra.mxu2 %v5723_v15  ;;  %6190 = vmatmul.bf16.vlgmr.msrb.gmra.mxu3 %v5724_v51 }
 0x881   : > { %6203 = vmatmul.bf16.vlgmr.msra.gmra.mxu0 %v5725_v28  ;;  %6216 = vmatmul.bf16.vlgmr.msra.gmra.mxu1 %v5726_v61 }
 0x882   : > { %6358 = vmatpush.bf16.msra.mxu2 %v8226_v32  ;;  %6371 = vmatpush.bf16.msra.mxu3 %v8234_v49 }
 0x883   : > { %6451 = vmatpush.bf16.msrb.mxu0 %v8242_v1 }
 0x886   : > { %6359 = vmatpush.bf16.msra.mxu2 %v8225_v13  ;;  %6372 = vmatpush.bf16.msra.mxu3 %v8233_v11 }
 0x887   : > { %6452 = vmatpush.bf16.msrb.mxu0 %v8241_v21 }
 0x88a   : > { %6360 = vmatpush.bf16.msra.mxu2 %v8224_v5  ;;  %6373 = vmatpush.bf16.msra.mxu3 %v8232_v54 }
 0x88b   : > { %6453 = vmatpush.bf16.msrb.mxu0 %v8240_v37 }
 0x88e   : > { %6361 = vmatpush.bf16.msra.mxu2 %v8223_v24  ;;  %6374 = vmatpush.bf16.msra.mxu3 %v8231_v46 }
 0x88f   : > { %6454 = vmatpush.bf16.msrb.mxu0 %v8239_v25 }
 0x8ee   : > { %v6152_v4 = vpop.f32.mrf.mxu0  ;;  %v6165_v20 = vpop.f32.mrf.mxu1 }
 0x8f3   : > { %v6126_v7 = vpop.f32.mrf.mxu2  ;;  %v6139_v2 = vpop.f32.mrf.mxu3 }
 0x8f4   : > { %v6127_v8 = vadd.f32 %v6126_v7, %v6113_v52 }
 0x8f6   : > { %v6140_v31 = vadd.f32 %v6139_v2, %v6127_v8  ;;  %v6154_v59 = vpop.f32.mrf.mxu0  ;;  %v6167_v10 = vpop.f32.mrf.mxu1 }
 0x8f8   : > { %v6153_v35 = vadd.f32 %v6152_v4, %v6140_v31 }
 0x8fa   : > { %v6166_v17 = vadd.f32 %v6165_v20, %v6153_v35 }
 0x8fb   : > { %v6128_v16 = vpop.f32.mrf.mxu2  ;;  %v6141_v33 = vpop.f32.mrf.mxu3 }
 0x8fc   : > { %v6221_v34 = vmax.f32 %v6166_v17, 0.0 }
 0x8fe   : > { %v6223_v38 = vpack.c.bf16 %v6221_v34, %v6221_v34  ;;  %v6204_v39 = vpop.f32.mrf.mxu0  ;;  %v6217_v45 = vpop.f32.mrf.mxu1 }
 0x900   : > { %6362 = vmatmul.bf16.vlgmr.msra.gmra.mxu2 %v6223_v38 }
 0x903   : > { %v6178_v27 = vpop.f32.mrf.mxu2  ;;  %v6191_v19 = vpop.f32.mrf.mxu3 }
 0x904   : > { %v6179_v12 = vadd.f32 %v6178_v27, %v6114_v57 }
 0x906   : > { %v6192_v40 = vadd.f32 %v6191_v19, %v6179_v12  ;;  %v6206_v3 = vpop.f32.mrf.mxu0  ;;  %v6219_v0 = vpop.f32.mrf.mxu1 }
 0x908   : > { %v6205_v53 = vadd.f32 %v6204_v39, %v6192_v40 }
 0x90a   : > { %v6218_v48 = vadd.f32 %v6217_v45, %v6205_v53 }
 0x90b   : > { %v6180_v56 = vpop.f32.mrf.mxu2  ;;  %v6193_v62 = vpop.f32.mrf.mxu3 }
 0x90c   : > { %v6222_v36 = vmax.f32 %v6218_v48, 0.0 }
 0x90e   : > { %v6224_v63 = vpack.c.bf16 %v6222_v36, %v6222_v36 }
 0x910   : > { %6375 = vmatmul.bf16.vlgmr.msra.gmra.mxu3 %v6224_v63 }
 0x983   : > { %v6363_v60 = vpop.f32.mrf.mxu2 }
 0x984   : > { %v6364_v14 = vadd.f32 %v6363_v60, %v6257_v30 }
 0x98b   : > { %v6365_v23 = vpop.f32.mrf.mxu2 }
 0x993   : > { %v6376_v15 = vpop.f32.mrf.mxu3 }
 0x994   : > { %v6377_v51 = vadd.f32 %v6376_v15, %v6364_v14 }
 0x996   : > { %v6380_v28 = vmax.f32 %v6377_v51, 0.0 }
 0x998   : > { %v6381_v44 = vpack.c.bf16 %v6380_v28, %v6380_v28 }
 0x99a   : > { %6455 = vmatmul.bf16.vlgmr.msrb.gmra.mxu0 %v6381_v44 }
 0x99b   : > { %v6378_v58 = vpop.f32.mrf.mxu3 }
 0xa17   : > { %v6456_v61 = vpop.f32.mrf.mxu0 }
 0xa18   : > { %v6457_v9 = vadd.f32 %v6456_v61, %v6398_v55 }
 0xa1a   : > { %6460 = vst [vmem:[%s513_s26] sm:$0x1] %v6457_v9 }
 0xa1b   : > { %8362 = shalt.err (!%p8359_p3)
}
 0xa1c   : > { %8275 = dma.vmem_to_hbm [thread:$0]  (%p8523_p5), %s6473_s30, 16, %s6475_s28, %s6462_s21  }
 0xa1f   : > { %v6458_v22 = vpop.f32.mrf.mxu0 }
 0xa20 PF: > { %s11357_s18 = sld [smem:[#allocation13_spill]] }
 0xa21   : > { %s11358_s24 = sld [smem:[#allocation11_spill]] }
 0xa26   : > { %p8281_p4 = scmp.ge.s32.totalorder %s11357_s18, 2 }
 0xa27   : > { %s6486_s26 = sand.u32 1, %s11358_s24  }
 0xa28   : > { %p8278_p7 = pnand %p8281_p4, %p8527_p6  ;;  %s6487_s25 = scalar_lea.sflag [#allocation9], %s6486_s26 }
 0xa2a   : > { %p8279_p8 = pneg %p8278_p7 }
 0xa2c   : > { %8380 = dma.done.wait (%p8279_p8), %s6487_s25, 16  }
 0xa2d   : > { %8382 = vsyncadd (%p8279_p8), %s6487_s25, 4294967280  ;;  %s11360_s24 = sld [smem:[#allocation14_spill]]  ;;  %s11363_s21 = smov %s8389_s22 }
 0xa2e   : > { %s11361_s29 = sld [smem:[#allocation12_spill]] }
 0xa2f   : > { %s11362_s23 = sld [smem:[#allocation15_spill]] }
 0xa33   : > { %p26_p9 = scmp.ge.s32.totalorder %s11360_s24, 4  }
 0xa34   : > { %s11364_s22 = smov %s11361_s29 }
 0xa35   :  { %28 = sbr.rel (!%p26_p9) target bundleno = 6 (0x6), region = 119 }
 0xa3a   :  { %6492 = vsyncpa [#allocation9], 1 }
 0xa3b   :  { %6494 = vsyncpa [#allocation9 + $0x1], 1 }

</bundles_post_ra>
